<compile_context>
chip_gen: v5e
topology: v5e:2x2
jax: 0.10.0
libtpu: 0.0.40
codegen_flags: <defaults>
</compile_context>

<pallas_src>
import jax
import jax.numpy as jnp
import numpy as np
from jax.experimental import pallas as pl
from jax.experimental.pallas import tpu as pltpu

_VMEM_LIMIT = 48 * 1024 * 1024    # requested scoped VMEM (leaves headroom on v7x's 64 MiB)
_VMEM_BUDGET = 40 * 1024 * 1024   # what Nb selection plans against (extra margin)


def _pick_nb(n, c, hw, cr):
    """Largest per-step image count Nb whose working set fits the VMEM budget,
    preferring a grid of >= 2 steps so both v7x TensorCores get work."""
    img = c * hw * 4                                   # one f32 image block

    def fits(nb):
        blocks = 2 * 2 * nb * img                      # double-buffered x + out blocks
        temps = 10 * nb * img                          # live full-size f32 temporaries
        consts = (2 * hw) * hw * 4                     # spatial-conv matmul matrix T
        consts += nb * c * 20 * 4                      # folded conv weights / biases
        consts += 2 * (nb * cr) * (nb * c) * 4         # block-diag channel-MLP weights
        return blocks + temps + consts <= _VMEM_BUDGET

    cands = [nb for nb in (128, 64, 32, 16, 8, 4, 2, 1) if n % nb == 0 and fits(nb)]
    if not cands:
        return 1
    for nb in cands:                                   # prefer >= 2 grid steps (v7x: 2 TCs)
        if n // nb >= 2:
            return nb
    return cands[0]


def _make_kernel(Nb, C, H, W):
    HW = H * W

    def kernel(x_ref, w1_ref, b1_ref, w2_ref, b2_ref,
               a1_ref, a2_ref, m3_ref, t7_ref, o_ref):
        x2 = x_ref[...]                       # (Nb*C, HW) lane-dense
        m3 = m3_ref[...]                      # (9, HW) 3x3 edge-validity masks

        def dw_bn_relu6(inp, w_ref, b_ref):
            # depthwise 3x3 (stride 1, pad 1); BN scale pre-folded into w.
            w = w_ref[...]                    # (Nb*C, 9)
            bias = b_ref[...]                 # (Nb*C, 1)
            # Seed one accumulator with the center tap (its mask is all-ones)
            # plus the folded BN bias; spread the other 8 taps over 3 more
            # partial accumulators to break the serial add chain.
            parts = [inp * w[:, 4:5] + bias, None, None, None]
            idx = 0
            for dy in range(3):
                for dx in range(3):
                    k = dy * 3 + dx
                    if k == 4:
                        continue
                    shift = (-((dy - 1) * W + (dx - 1))) % HW
                    contrib = pltpu.roll(inp, shift, 1) * w[:, k:k + 1] * m3[k]
                    j = 1 + (idx % 3)
                    parts[j] = contrib if parts[j] is None else parts[j] + contrib
                    idx += 1
            acc = (parts[0] + parts[1]) + (parts[2] + parts[3])
            return jnp.clip(acc, 0.0, 6.0)

        out = dw_bn_relu6(x2, w1_ref, b1_ref)     # conv1
        out = dw_bn_relu6(out, w2_ref, b2_ref)    # conv2

        # ---- CBAM2 channel attention (on the block input x) ----
        # MLP batched over the Nb images via block-diagonal weights,
        # max & avg pooled columns handled in one pair of matmuls.
        pmax = jnp.max(x2, axis=1, keepdims=True)                 # (Nb*C, 1)
        pavg = jnp.sum(x2, axis=1, keepdims=True) * (1.0 / HW)
        pcat = jnp.concatenate([pmax, pavg], axis=1)              # (Nb*C, 2)
        h = jnp.maximum(jnp.dot(a1_ref[...], pcat,
                                preferred_element_type=jnp.float32), 0.0)
        o = jnp.dot(a2_ref[...], h, preferred_element_type=jnp.float32)
        ch = jax.nn.sigmoid(o[:, 0:1] + o[:, 1:2])                # (Nb*C, 1)
        xc = x2 * ch

        # ---- CBAM2 spatial attention: 7x7 conv as ONE MXU matmul ----
        xc3 = xc.reshape(Nb, C, HW)
        smax = jnp.max(xc3, axis=1)                               # (Nb, HW)
        savg = jnp.sum(xc3, axis=1) * (1.0 / C)
        sp = jnp.concatenate([smax, savg], axis=1)                # (Nb, 2*HW)
        # T bakes tap weight * edge validity per (src, dst) pixel pair.
        sconv = jnp.dot(sp, t7_ref[...],
                        preferred_element_type=jnp.float32)       # (Nb, HW)
        sattn = jax.nn.sigmoid(sconv)
        attn = (xc3 * sattn[:, None, :]).reshape(Nb * C, HW)

        # residual (downsample=None) + conv path + attention, then ReLU
        o_ref[...] = jnp.maximum(x2 + out + attn, 0.0).astype(o_ref.dtype)

    return kernel


def little_cbam2_basic_block(x, params):
    N, C, H, W = x.shape
    HW = H * W
    w1, bn1, w2, bn2, mlp1, mlp2, wsp = params
    Cr = mlp1.shape[0]
    Nb = _pick_nb(N, C, HW, Cr)
    NbC = Nb * C
    f32 = jnp.float32

    # Fold BN scale into the depthwise weights; keep bias separate.
    w1s = (w1 * bn1[:, 0:1]).astype(f32)
    w2s = (w2 * bn2[:, 0:1]).astype(f32)
    b1 = bn1[:, 1:2].astype(f32)
    b2 = bn2[:, 1:2].astype(f32)
    # Tile per-channel params over the Nb images in one block.
    w1t = jnp.tile(w1s, (Nb, 1))              # (Nb*C, 9)
    w2t = jnp.tile(w2s, (Nb, 1))
    b1t = jnp.tile(b1, (Nb, 1))               # (Nb*C, 1)
    b2t = jnp.tile(b2, (Nb, 1))
    # Block-diagonal channel-MLP weights (batch the MLP over Nb images).
    # Size is accounted for in _pick_nb; negligible at C=32 / capped Nb.
    a1 = jnp.kron(jnp.eye(Nb, dtype=f32), mlp1.astype(f32))   # (Nb*Cr, Nb*C)
    a2 = jnp.kron(jnp.eye(Nb, dtype=f32), mlp2.astype(f32))   # (Nb*C, Nb*Cr)

    # 3x3 edge-validity masks for roll-based shifts (pad 1), numpy constants.
    p = np.arange(HW)
    rows, cols = p // W, p % W
    m3_np = np.stack([(((rows + dy - 1) >= 0) & ((rows + dy - 1) < H) &
                       ((cols + dx - 1) >= 0) & ((cols + dx - 1) < W)).astype(np.float32)
                      for dy in range(3) for dx in range(3)])          # (9, HW)
    m3 = jnp.asarray(m3_np)

    # CBAM spatial 7x7 conv as one (2*HW, HW) matmul matrix:
    # T[c2*HW + p_src, q_dst] = wsp[c2, tap(p_src, q_dst)] * valid(p_src, q_dst)
    dy = rows[:, None] - rows[None, :] + 3            # (src, dst)
    dx = cols[:, None] - cols[None, :] + 3
    valid = (dy >= 0) & (dy < 7) & (dx >= 0) & (dx < 7)
    tap = np.where(valid, dy * 7 + dx, 0).astype(np.int32)
    validf = jnp.asarray(valid.astype(np.float32))
    tap_j = jnp.asarray(tap)
    wsp_f = wsp.astype(f32)
    t7 = jnp.concatenate([jnp.take(wsp_f[0], tap_j) * validf,
                          jnp.take(wsp_f[1], tap_j) * validf], axis=0)  # (2*HW, HW)

    x2 = x.reshape(N * C, HW)
    kernel = _make_kernel(Nb, C, H, W)
    vmem = pl.BlockSpec(memory_space=pltpu.MemorySpace.VMEM)

    out2 = pl.pallas_call(
        kernel,
        out_shape=jax.ShapeDtypeStruct((N * C, HW), x.dtype),
        grid=(N // Nb,),
        in_specs=[
            pl.BlockSpec((NbC, HW), lambda i: (i, 0)),   # x: Nb images per step
            vmem,   # w1t  (Nb*C, 9)  scale-folded
            vmem,   # b1t  (Nb*C, 1)
            vmem,   # w2t  (Nb*C, 9)
            vmem,   # b2t  (Nb*C, 1)
            vmem,   # a1   (Nb*Cr, Nb*C) block-diag mlp1
            vmem,   # a2   (Nb*C, Nb*Cr) block-diag mlp2
            vmem,   # m3   (9, HW)
            vmem,   # t7   (2*HW, HW) spatial-conv matmul matrix
        ],
        out_specs=pl.BlockSpec((NbC, HW), lambda i: (i, 0)),
        compiler_params=pltpu.CompilerParams(
            dimension_semantics=("parallel",),            # batch axis -> both v7x TCs
            vmem_limit_bytes=_VMEM_LIMIT),
    )(x2, w1t, b1t, w2t, b2t, a1, a2, m3, t7)
    return out2.reshape(N, C, H, W)


def reference(x, w1, bn1, w2, bn2, mlp1, mlp2, wsp):
    """Pure-JAX reference with identical semantics (NCHW)."""
    N, C, H, W = x.shape

    def dw(inp, wf, bn):
        xp = jnp.pad(inp, ((0, 0), (0, 0), (1, 1), (1, 1)))
        acc = jnp.zeros_like(inp)
        for dy in range(3):
            for dx in range(3):
                acc = acc + xp[:, :, dy:dy + H, dx:dx + W] * wf[:, dy * 3 + dx].reshape(1, C, 1, 1)
        y = acc * bn[:, 0].reshape(1, C, 1, 1) + bn[:, 1].reshape(1, C, 1, 1)
        return jnp.clip(y, 0.0, 6.0)

    out = dw(dw(x, w1, bn1), w2, bn2)

    pmax = jnp.max(x, axis=(2, 3))
    pavg = jnp.mean(x, axis=(2, 3))

    def mlp(p):
        return jnp.maximum(p @ mlp1.T, 0.0) @ mlp2.T

    ch = jax.nn.sigmoid(mlp(pmax) + mlp(pavg))[:, :, None, None]
    xc = ch * x

    sp = jnp.concatenate([jnp.max(xc, axis=1, keepdims=True),
                          jnp.mean(xc, axis=1, keepdims=True)], axis=1)
    spp = jnp.pad(sp, ((0, 0), (0, 0), (3, 3), (3, 3)))
    sconv = jnp.zeros((N, 1, H, W), x.dtype)
    for c2 in range(2):
        for dy in range(7):
            for dx in range(7):
                sconv = sconv + spp[:, c2:c2 + 1, dy:dy + H, dx:dx + W] * wsp[c2, dy * 7 + dx]
    attn = jax.nn.sigmoid(sconv) * xc
    return jnp.maximum(x + out + attn, 0.0)


if __name__ == "__main__":
    N, C, H, W = 4, 32, 16, 16      # planes = inplanes = 32, reduction=16 -> Cr=2
    Cr = C // 16

    key = jax.random.PRNGKey(0)
    ks = jax.random.split(key, 8)
    x = jax.random.normal(ks[0], (N, C, H, W), jnp.float32)

    # depthwise 3x3 conv weights, flattened taps (C, 9)
    w1 = jax.random.normal(ks[1], (C, 9), jnp.float32) * 0.3
    w2 = jax.random.normal(ks[2], (C, 9), jnp.float32) * 0.3

    def make_bn(k):
        k1, k2, k3, k4 = jax.random.split(k, 4)
        gamma = 1.0 + 0.1 * jax.random.normal(k1, (C,), jnp.float32)
        beta = 0.1 * jax.random.normal(k2, (C,), jnp.float32)
        mean = 0.1 * jax.random.normal(k3, (C,), jnp.float32)
        var = jnp.abs(jax.random.normal(k4, (C,), jnp.float32)) + 0.5
        scale = gamma / jnp.sqrt(var + 1e-5)      # eval-mode BN folded
        bias = beta - mean * scale
        return jnp.stack([scale, bias], axis=1)   # (C, 2)

    bn1 = make_bn(ks[3])
    bn2 = make_bn(ks[4])

    # CBAM channel-MLP 1x1 conv weights
    mlp1 = jax.random.normal(ks[5], (Cr, C), jnp.float32) * 0.2
    mlp2 = jax.random.normal(ks[6], (C, Cr), jnp.float32) * 0.2
    # CBAM spatial 7x7 conv weight: (out=1, in=2, 7, 7) flattened to (2, 49)
    wsp = jax.random.normal(ks[7], (2, 49), jnp.float32) * 0.1

    params = (w1, bn1, w2, bn2, mlp1, mlp2, wsp)

    y = jax.jit(little_cbam2_basic_block)(x, params)
    jax.block_until_ready(y)

    y_ref = reference(x, *params)
    # Tolerance 1e-2: the CBAM spatial 7x7 conv now runs on the MXU at default
    # matmul precision (bf16 passes), vs the pure-f32 elementwise reference.
    np.testing.assert_allclose(np.asarray(y), np.asarray(y_ref), atol=1e-2, rtol=1e-2)

    print("KERNEL_OK")
</pallas_src>

<mosaic_0001>
module attributes {stable_mosaic.version = 11 : i64} {
  func.func @kernel(%arg0: i32, %arg1: memref<64x256xf32, #tpu.memory_space<vmem>>, %arg2: memref<64x9xf32, #tpu.memory_space<vmem>>, %arg3: memref<64x1xf32, #tpu.memory_space<vmem>>, %arg4: memref<64x9xf32, #tpu.memory_space<vmem>>, %arg5: memref<64x1xf32, #tpu.memory_space<vmem>>, %arg6: memref<4x64xf32, #tpu.memory_space<vmem>>, %arg7: memref<64x4xf32, #tpu.memory_space<vmem>>, %arg8: memref<9x256xf32, #tpu.memory_space<vmem>>, %arg9: memref<512x256xf32, #tpu.memory_space<vmem>>, %arg10: memref<64x256xf32, #tpu.memory_space<vmem>>) attributes {dimension_semantics = [#tpu.dimension_semantics<parallel>], iteration_bounds = array<i64: 2>, scalar_prefetch = 0 : i64, scratch_operands = 0 : i64, tpu.core_type = #tpu.core_type<tc>, window_params = [{transform_indices = @transform_0, window_bounds = array<i64: 64, 256>}, {pipeline_mode = #tpu.pipeline_mode<synchronous>, transform_indices = @transform_1, window_bounds = array<i64: 64, 9>}, {pipeline_mode = #tpu.pipeline_mode<synchronous>, transform_indices = @transform_2, window_bounds = array<i64: 64, 1>}, {pipeline_mode = #tpu.pipeline_mode<synchronous>, transform_indices = @transform_3, window_bounds = array<i64: 64, 9>}, {pipeline_mode = #tpu.pipeline_mode<synchronous>, transform_indices = @transform_4, window_bounds = array<i64: 64, 1>}, {pipeline_mode = #tpu.pipeline_mode<synchronous>, transform_indices = @transform_5, window_bounds = array<i64: 4, 64>}, {pipeline_mode = #tpu.pipeline_mode<synchronous>, transform_indices = @transform_6, window_bounds = array<i64: 64, 4>}, {pipeline_mode = #tpu.pipeline_mode<synchronous>, transform_indices = @transform_7, window_bounds = array<i64: 9, 256>}, {pipeline_mode = #tpu.pipeline_mode<synchronous>, transform_indices = @transform_8, window_bounds = array<i64: 512, 256>}, {transform_indices = @transform_9, window_bounds = array<i64: 64, 256>}]} {
    %c0 = arith.constant 0 : index
    %c0_0 = arith.constant 0 : index
    %0 = vector.load %arg1[%c0, %c0_0] : memref<64x256xf32, #tpu.memory_space<vmem>>, vector<64x256xf32>
    %c0_1 = arith.constant 0 : index
    %c0_2 = arith.constant 0 : index
    %1 = vector.load %arg8[%c0_1, %c0_2] : memref<9x256xf32, #tpu.memory_space<vmem>>, vector<9x256xf32>
    %c0_3 = arith.constant 0 : index
    %c0_4 = arith.constant 0 : index
    %2 = vector.load %arg2[%c0_3, %c0_4] : memref<64x9xf32, #tpu.memory_space<vmem>>, vector<64x9xf32>
    %c0_5 = arith.constant 0 : index
    %c0_6 = arith.constant 0 : index
    %3 = vector.load %arg3[%c0_5, %c0_6] : memref<64x1xf32, #tpu.memory_space<vmem>>, vector<64x1xf32>
    %4 = vector.extract_strided_slice %2 {offsets = [0, 4], sizes = [64, 1], strides = [1, 1]} : vector<64x9xf32> to vector<64x1xf32>
    %5 = vector.broadcast %4 : vector<64x1xf32> to vector<64x256xf32>
    %6 = arith.mulf %0, %5 : vector<64x256xf32>
    %7 = vector.broadcast %3 : vector<64x1xf32> to vector<64x256xf32>
    %8 = arith.addf %6, %7 : vector<64x256xf32>
    %c17_i32 = arith.constant 17 : i32
    %9 = tpu.dynamic_rotate %0 by %c17_i32 dim 1 : vector<64x256xf32>, i32 -> vector<64x256xf32>
    %10 = vector.extract_strided_slice %2 {offsets = [0, 0], sizes = [64, 1], strides = [1, 1]} : vector<64x9xf32> to vector<64x1xf32>
    %11 = vector.broadcast %10 : vector<64x1xf32> to vector<64x256xf32>
    %12 = arith.mulf %9, %11 : vector<64x256xf32>
    %13 = vector.extract_strided_slice %1 {offsets = [0, 0], sizes = [1, 256], strides = [1, 1]} : vector<9x256xf32> to vector<1x256xf32>
    %14 = vector.shape_cast %13 : vector<1x256xf32> to vector<256xf32>
    %15 = vector.shape_cast %14 : vector<256xf32> to vector<1x256xf32>
    %16 = vector.broadcast %15 : vector<1x256xf32> to vector<64x256xf32>
    %17 = arith.mulf %12, %16 : vector<64x256xf32>
    %c16_i32 = arith.constant 16 : i32
    %18 = tpu.dynamic_rotate %0 by %c16_i32 dim 1 : vector<64x256xf32>, i32 -> vector<64x256xf32>
    %19 = vector.extract_strided_slice %2 {offsets = [0, 1], sizes = [64, 1], strides = [1, 1]} : vector<64x9xf32> to vector<64x1xf32>
    %20 = vector.broadcast %19 : vector<64x1xf32> to vector<64x256xf32>
    %21 = arith.mulf %18, %20 : vector<64x256xf32>
    %22 = vector.extract_strided_slice %1 {offsets = [1, 0], sizes = [1, 256], strides = [1, 1]} : vector<9x256xf32> to vector<1x256xf32>
    %23 = vector.shape_cast %22 : vector<1x256xf32> to vector<256xf32>
    %24 = vector.shape_cast %23 : vector<256xf32> to vector<1x256xf32>
    %25 = vector.broadcast %24 : vector<1x256xf32> to vector<64x256xf32>
    %26 = arith.mulf %21, %25 : vector<64x256xf32>
    %c15_i32 = arith.constant 15 : i32
    %27 = tpu.dynamic_rotate %0 by %c15_i32 dim 1 : vector<64x256xf32>, i32 -> vector<64x256xf32>
    %28 = vector.extract_strided_slice %2 {offsets = [0, 2], sizes = [64, 1], strides = [1, 1]} : vector<64x9xf32> to vector<64x1xf32>
    %29 = vector.broadcast %28 : vector<64x1xf32> to vector<64x256xf32>
    %30 = arith.mulf %27, %29 : vector<64x256xf32>
    %31 = vector.extract_strided_slice %1 {offsets = [2, 0], sizes = [1, 256], strides = [1, 1]} : vector<9x256xf32> to vector<1x256xf32>
    %32 = vector.shape_cast %31 : vector<1x256xf32> to vector<256xf32>
    %33 = vector.shape_cast %32 : vector<256xf32> to vector<1x256xf32>
    %34 = vector.broadcast %33 : vector<1x256xf32> to vector<64x256xf32>
    %35 = arith.mulf %30, %34 : vector<64x256xf32>
    %c1_i32 = arith.constant 1 : i32
    %36 = tpu.dynamic_rotate %0 by %c1_i32 dim 1 : vector<64x256xf32>, i32 -> vector<64x256xf32>
    %37 = vector.extract_strided_slice %2 {offsets = [0, 3], sizes = [64, 1], strides = [1, 1]} : vector<64x9xf32> to vector<64x1xf32>
    %38 = vector.broadcast %37 : vector<64x1xf32> to vector<64x256xf32>
    %39 = arith.mulf %36, %38 : vector<64x256xf32>
    %40 = vector.extract_strided_slice %1 {offsets = [3, 0], sizes = [1, 256], strides = [1, 1]} : vector<9x256xf32> to vector<1x256xf32>
    %41 = vector.shape_cast %40 : vector<1x256xf32> to vector<256xf32>
    %42 = vector.shape_cast %41 : vector<256xf32> to vector<1x256xf32>
    %43 = vector.broadcast %42 : vector<1x256xf32> to vector<64x256xf32>
    %44 = arith.mulf %39, %43 : vector<64x256xf32>
    %45 = arith.addf %17, %44 : vector<64x256xf32>
    %c255_i32 = arith.constant 255 : i32
    %46 = tpu.dynamic_rotate %0 by %c255_i32 dim 1 : vector<64x256xf32>, i32 -> vector<64x256xf32>
    %47 = vector.extract_strided_slice %2 {offsets = [0, 5], sizes = [64, 1], strides = [1, 1]} : vector<64x9xf32> to vector<64x1xf32>
    %48 = vector.broadcast %47 : vector<64x1xf32> to vector<64x256xf32>
    %49 = arith.mulf %46, %48 : vector<64x256xf32>
    %50 = vector.extract_strided_slice %1 {offsets = [5, 0], sizes = [1, 256], strides = [1, 1]} : vector<9x256xf32> to vector<1x256xf32>
    %51 = vector.shape_cast %50 : vector<1x256xf32> to vector<256xf32>
    %52 = vector.shape_cast %51 : vector<256xf32> to vector<1x256xf32>
    %53 = vector.broadcast %52 : vector<1x256xf32> to vector<64x256xf32>
    %54 = arith.mulf %49, %53 : vector<64x256xf32>
    %55 = arith.addf %26, %54 : vector<64x256xf32>
    %c241_i32 = arith.constant 241 : i32
    %56 = tpu.dynamic_rotate %0 by %c241_i32 dim 1 : vector<64x256xf32>, i32 -> vector<64x256xf32>
    %57 = vector.extract_strided_slice %2 {offsets = [0, 6], sizes = [64, 1], strides = [1, 1]} : vector<64x9xf32> to vector<64x1xf32>
    %58 = vector.broadcast %57 : vector<64x1xf32> to vector<64x256xf32>
    %59 = arith.mulf %56, %58 : vector<64x256xf32>
    %60 = vector.extract_strided_slice %1 {offsets = [6, 0], sizes = [1, 256], strides = [1, 1]} : vector<9x256xf32> to vector<1x256xf32>
    %61 = vector.shape_cast %60 : vector<1x256xf32> to vector<256xf32>
    %62 = vector.shape_cast %61 : vector<256xf32> to vector<1x256xf32>
    %63 = vector.broadcast %62 : vector<1x256xf32> to vector<64x256xf32>
    %64 = arith.mulf %59, %63 : vector<64x256xf32>
    %65 = arith.addf %35, %64 : vector<64x256xf32>
    %c240_i32 = arith.constant 240 : i32
    %66 = tpu.dynamic_rotate %0 by %c240_i32 dim 1 : vector<64x256xf32>, i32 -> vector<64x256xf32>
    %67 = vector.extract_strided_slice %2 {offsets = [0, 7], sizes = [64, 1], strides = [1, 1]} : vector<64x9xf32> to vector<64x1xf32>
    %68 = vector.broadcast %67 : vector<64x1xf32> to vector<64x256xf32>
    %69 = arith.mulf %66, %68 : vector<64x256xf32>
    %70 = vector.extract_strided_slice %1 {offsets = [7, 0], sizes = [1, 256], strides = [1, 1]} : vector<9x256xf32> to vector<1x256xf32>
    %71 = vector.shape_cast %70 : vector<1x256xf32> to vector<256xf32>
    %72 = vector.shape_cast %71 : vector<256xf32> to vector<1x256xf32>
    %73 = vector.broadcast %72 : vector<1x256xf32> to vector<64x256xf32>
    %74 = arith.mulf %69, %73 : vector<64x256xf32>
    %75 = arith.addf %45, %74 : vector<64x256xf32>
    %c239_i32 = arith.constant 239 : i32
    %76 = tpu.dynamic_rotate %0 by %c239_i32 dim 1 : vector<64x256xf32>, i32 -> vector<64x256xf32>
    %77 = vector.extract_strided_slice %2 {offsets = [0, 8], sizes = [64, 1], strides = [1, 1]} : vector<64x9xf32> to vector<64x1xf32>
    %78 = vector.broadcast %77 : vector<64x1xf32> to vector<64x256xf32>
    %79 = arith.mulf %76, %78 : vector<64x256xf32>
    %80 = vector.extract_strided_slice %1 {offsets = [8, 0], sizes = [1, 256], strides = [1, 1]} : vector<9x256xf32> to vector<1x256xf32>
    %81 = vector.shape_cast %80 : vector<1x256xf32> to vector<256xf32>
    %82 = vector.shape_cast %81 : vector<256xf32> to vector<1x256xf32>
    %83 = vector.broadcast %82 : vector<1x256xf32> to vector<64x256xf32>
    %84 = arith.mulf %79, %83 : vector<64x256xf32>
    %85 = arith.addf %55, %84 : vector<64x256xf32>
    %86 = arith.addf %8, %75 : vector<64x256xf32>
    %87 = arith.addf %85, %65 : vector<64x256xf32>
    %88 = arith.addf %86, %87 : vector<64x256xf32>
    %cst = arith.constant 0.000000e+00 : f32
    %cst_7 = arith.constant 6.000000e+00 : f32
    %89 = vector.broadcast %cst : f32 to vector<64x256xf32>
    %90 = arith.maximumf %89, %88 : vector<64x256xf32>
    %91 = vector.broadcast %cst_7 : f32 to vector<64x256xf32>
    %92 = arith.minimumf %91, %90 : vector<64x256xf32>
    %c0_8 = arith.constant 0 : index
    %c0_9 = arith.constant 0 : index
    %93 = vector.load %arg4[%c0_8, %c0_9] : memref<64x9xf32, #tpu.memory_space<vmem>>, vector<64x9xf32>
    %c0_10 = arith.constant 0 : index
    %c0_11 = arith.constant 0 : index
    %94 = vector.load %arg5[%c0_10, %c0_11] : memref<64x1xf32, #tpu.memory_space<vmem>>, vector<64x1xf32>
    %95 = vector.extract_strided_slice %93 {offsets = [0, 4], sizes = [64, 1], strides = [1, 1]} : vector<64x9xf32> to vector<64x1xf32>
    %96 = vector.broadcast %95 : vector<64x1xf32> to vector<64x256xf32>
    %97 = arith.mulf %92, %96 : vector<64x256xf32>
    %98 = vector.broadcast %94 : vector<64x1xf32> to vector<64x256xf32>
    %99 = arith.addf %97, %98 : vector<64x256xf32>
    %c17_i32_12 = arith.constant 17 : i32
    %100 = tpu.dynamic_rotate %92 by %c17_i32_12 dim 1 : vector<64x256xf32>, i32 -> vector<64x256xf32>
    %101 = vector.extract_strided_slice %93 {offsets = [0, 0], sizes = [64, 1], strides = [1, 1]} : vector<64x9xf32> to vector<64x1xf32>
    %102 = vector.broadcast %101 : vector<64x1xf32> to vector<64x256xf32>
    %103 = arith.mulf %100, %102 : vector<64x256xf32>
    %104 = vector.extract_strided_slice %1 {offsets = [0, 0], sizes = [1, 256], strides = [1, 1]} : vector<9x256xf32> to vector<1x256xf32>
    %105 = vector.shape_cast %104 : vector<1x256xf32> to vector<256xf32>
    %106 = vector.shape_cast %105 : vector<256xf32> to vector<1x256xf32>
    %107 = vector.broadcast %106 : vector<1x256xf32> to vector<64x256xf32>
    %108 = arith.mulf %103, %107 : vector<64x256xf32>
    %c16_i32_13 = arith.constant 16 : i32
    %109 = tpu.dynamic_rotate %92 by %c16_i32_13 dim 1 : vector<64x256xf32>, i32 -> vector<64x256xf32>
    %110 = vector.extract_strided_slice %93 {offsets = [0, 1], sizes = [64, 1], strides = [1, 1]} : vector<64x9xf32> to vector<64x1xf32>
    %111 = vector.broadcast %110 : vector<64x1xf32> to vector<64x256xf32>
    %112 = arith.mulf %109, %111 : vector<64x256xf32>
    %113 = vector.extract_strided_slice %1 {offsets = [1, 0], sizes = [1, 256], strides = [1, 1]} : vector<9x256xf32> to vector<1x256xf32>
    %114 = vector.shape_cast %113 : vector<1x256xf32> to vector<256xf32>
    %115 = vector.shape_cast %114 : vector<256xf32> to vector<1x256xf32>
    %116 = vector.broadcast %115 : vector<1x256xf32> to vector<64x256xf32>
    %117 = arith.mulf %112, %116 : vector<64x256xf32>
    %c15_i32_14 = arith.constant 15 : i32
    %118 = tpu.dynamic_rotate %92 by %c15_i32_14 dim 1 : vector<64x256xf32>, i32 -> vector<64x256xf32>
    %119 = vector.extract_strided_slice %93 {offsets = [0, 2], sizes = [64, 1], strides = [1, 1]} : vector<64x9xf32> to vector<64x1xf32>
    %120 = vector.broadcast %119 : vector<64x1xf32> to vector<64x256xf32>
    %121 = arith.mulf %118, %120 : vector<64x256xf32>
    %122 = vector.extract_strided_slice %1 {offsets = [2, 0], sizes = [1, 256], strides = [1, 1]} : vector<9x256xf32> to vector<1x256xf32>
    %123 = vector.shape_cast %122 : vector<1x256xf32> to vector<256xf32>
    %124 = vector.shape_cast %123 : vector<256xf32> to vector<1x256xf32>
    %125 = vector.broadcast %124 : vector<1x256xf32> to vector<64x256xf32>
    %126 = arith.mulf %121, %125 : vector<64x256xf32>
    %c1_i32_15 = arith.constant 1 : i32
    %127 = tpu.dynamic_rotate %92 by %c1_i32_15 dim 1 : vector<64x256xf32>, i32 -> vector<64x256xf32>
    %128 = vector.extract_strided_slice %93 {offsets = [0, 3], sizes = [64, 1], strides = [1, 1]} : vector<64x9xf32> to vector<64x1xf32>
    %129 = vector.broadcast %128 : vector<64x1xf32> to vector<64x256xf32>
    %130 = arith.mulf %127, %129 : vector<64x256xf32>
    %131 = vector.extract_strided_slice %1 {offsets = [3, 0], sizes = [1, 256], strides = [1, 1]} : vector<9x256xf32> to vector<1x256xf32>
    %132 = vector.shape_cast %131 : vector<1x256xf32> to vector<256xf32>
    %133 = vector.shape_cast %132 : vector<256xf32> to vector<1x256xf32>
    %134 = vector.broadcast %133 : vector<1x256xf32> to vector<64x256xf32>
    %135 = arith.mulf %130, %134 : vector<64x256xf32>
    %136 = arith.addf %108, %135 : vector<64x256xf32>
    %c255_i32_16 = arith.constant 255 : i32
    %137 = tpu.dynamic_rotate %92 by %c255_i32_16 dim 1 : vector<64x256xf32>, i32 -> vector<64x256xf32>
    %138 = vector.extract_strided_slice %93 {offsets = [0, 5], sizes = [64, 1], strides = [1, 1]} : vector<64x9xf32> to vector<64x1xf32>
    %139 = vector.broadcast %138 : vector<64x1xf32> to vector<64x256xf32>
    %140 = arith.mulf %137, %139 : vector<64x256xf32>
    %141 = vector.extract_strided_slice %1 {offsets = [5, 0], sizes = [1, 256], strides = [1, 1]} : vector<9x256xf32> to vector<1x256xf32>
    %142 = vector.shape_cast %141 : vector<1x256xf32> to vector<256xf32>
    %143 = vector.shape_cast %142 : vector<256xf32> to vector<1x256xf32>
    %144 = vector.broadcast %143 : vector<1x256xf32> to vector<64x256xf32>
    %145 = arith.mulf %140, %144 : vector<64x256xf32>
    %146 = arith.addf %117, %145 : vector<64x256xf32>
    %c241_i32_17 = arith.constant 241 : i32
    %147 = tpu.dynamic_rotate %92 by %c241_i32_17 dim 1 : vector<64x256xf32>, i32 -> vector<64x256xf32>
    %148 = vector.extract_strided_slice %93 {offsets = [0, 6], sizes = [64, 1], strides = [1, 1]} : vector<64x9xf32> to vector<64x1xf32>
    %149 = vector.broadcast %148 : vector<64x1xf32> to vector<64x256xf32>
    %150 = arith.mulf %147, %149 : vector<64x256xf32>
    %151 = vector.extract_strided_slice %1 {offsets = [6, 0], sizes = [1, 256], strides = [1, 1]} : vector<9x256xf32> to vector<1x256xf32>
    %152 = vector.shape_cast %151 : vector<1x256xf32> to vector<256xf32>
    %153 = vector.shape_cast %152 : vector<256xf32> to vector<1x256xf32>
    %154 = vector.broadcast %153 : vector<1x256xf32> to vector<64x256xf32>
    %155 = arith.mulf %150, %154 : vector<64x256xf32>
    %156 = arith.addf %126, %155 : vector<64x256xf32>
    %c240_i32_18 = arith.constant 240 : i32
    %157 = tpu.dynamic_rotate %92 by %c240_i32_18 dim 1 : vector<64x256xf32>, i32 -> vector<64x256xf32>
    %158 = vector.extract_strided_slice %93 {offsets = [0, 7], sizes = [64, 1], strides = [1, 1]} : vector<64x9xf32> to vector<64x1xf32>
    %159 = vector.broadcast %158 : vector<64x1xf32> to vector<64x256xf32>
    %160 = arith.mulf %157, %159 : vector<64x256xf32>
    %161 = vector.extract_strided_slice %1 {offsets = [7, 0], sizes = [1, 256], strides = [1, 1]} : vector<9x256xf32> to vector<1x256xf32>
    %162 = vector.shape_cast %161 : vector<1x256xf32> to vector<256xf32>
    %163 = vector.shape_cast %162 : vector<256xf32> to vector<1x256xf32>
    %164 = vector.broadcast %163 : vector<1x256xf32> to vector<64x256xf32>
    %165 = arith.mulf %160, %164 : vector<64x256xf32>
    %166 = arith.addf %136, %165 : vector<64x256xf32>
    %c239_i32_19 = arith.constant 239 : i32
    %167 = tpu.dynamic_rotate %92 by %c239_i32_19 dim 1 : vector<64x256xf32>, i32 -> vector<64x256xf32>
    %168 = vector.extract_strided_slice %93 {offsets = [0, 8], sizes = [64, 1], strides = [1, 1]} : vector<64x9xf32> to vector<64x1xf32>
    %169 = vector.broadcast %168 : vector<64x1xf32> to vector<64x256xf32>
    %170 = arith.mulf %167, %169 : vector<64x256xf32>
    %171 = vector.extract_strided_slice %1 {offsets = [8, 0], sizes = [1, 256], strides = [1, 1]} : vector<9x256xf32> to vector<1x256xf32>
    %172 = vector.shape_cast %171 : vector<1x256xf32> to vector<256xf32>
    %173 = vector.shape_cast %172 : vector<256xf32> to vector<1x256xf32>
    %174 = vector.broadcast %173 : vector<1x256xf32> to vector<64x256xf32>
    %175 = arith.mulf %170, %174 : vector<64x256xf32>
    %176 = arith.addf %146, %175 : vector<64x256xf32>
    %177 = arith.addf %99, %166 : vector<64x256xf32>
    %178 = arith.addf %176, %156 : vector<64x256xf32>
    %179 = arith.addf %177, %178 : vector<64x256xf32>
    %cst_20 = arith.constant 0.000000e+00 : f32
    %cst_21 = arith.constant 6.000000e+00 : f32
    %180 = vector.broadcast %cst_20 : f32 to vector<64x256xf32>
    %181 = arith.maximumf %180, %179 : vector<64x256xf32>
    %182 = vector.broadcast %cst_21 : f32 to vector<64x256xf32>
    %183 = arith.minimumf %182, %181 : vector<64x256xf32>
    %cst_22 = arith.constant dense<0xFF800000> : vector<64xf32>
    %184 = vector.multi_reduction <maximumf>, %0, %cst_22 [1] : vector<64x256xf32> to vector<64xf32>
    %185 = vector.shape_cast %184 : vector<64xf32> to vector<64x1xf32>
    %cst_23 = arith.constant dense<0.000000e+00> : vector<64xf32>
    %186 = vector.multi_reduction <add>, %0, %cst_23 [1] : vector<64x256xf32> to vector<64xf32>
    %187 = vector.shape_cast %186 : vector<64xf32> to vector<64x1xf32>
    %cst_24 = arith.constant 3.906250e-03 : f32
    %188 = vector.broadcast %cst_24 : f32 to vector<64x1xf32>
    %189 = arith.mulf %187, %188 : vector<64x1xf32>
    %190 = tpu.concatenate %185, %189 in 1 : vector<64x1xf32>, vector<64x1xf32> -> vector<64x2xf32>
    %c0_25 = arith.constant 0 : index
    %c0_26 = arith.constant 0 : index
    %191 = vector.load %arg6[%c0_25, %c0_26] : memref<4x64xf32, #tpu.memory_space<vmem>>, vector<4x64xf32>
    %cst_27 = arith.constant dense<0.000000e+00> : vector<4x2xf32>
    %192 = tpu.matmul %191, %190, %cst_27 {dimension_numbers = #tpu.dot_dimension_numbers<[1], [0], [0], [1], [0, 0, 1, 1], [], []>} : vector<4x64xf32>, vector<64x2xf32>, vector<4x2xf32> -> vector<4x2xf32>
    %cst_28 = arith.constant 0.000000e+00 : f32
    %193 = vector.broadcast %cst_28 : f32 to vector<4x2xf32>
    %194 = arith.maximumf %192, %193 : vector<4x2xf32>
    %c0_29 = arith.constant 0 : index
    %c0_30 = arith.constant 0 : index
    %195 = vector.load %arg7[%c0_29, %c0_30] : memref<64x4xf32, #tpu.memory_space<vmem>>, vector<64x4xf32>
    %cst_31 = arith.constant dense<0.000000e+00> : vector<64x2xf32>
    %196 = tpu.matmul %195, %194, %cst_31 {dimension_numbers = #tpu.dot_dimension_numbers<[1], [0], [0], [1], [0, 0, 1, 1], [], []>} : vector<64x4xf32>, vector<4x2xf32>, vector<64x2xf32> -> vector<64x2xf32>
    %197 = vector.extract_strided_slice %196 {offsets = [0, 0], sizes = [64, 1], strides = [1, 1]} : vector<64x2xf32> to vector<64x1xf32>
    %198 = vector.extract_strided_slice %196 {offsets = [0, 1], sizes = [64, 1], strides = [1, 1]} : vector<64x2xf32> to vector<64x1xf32>
    %199 = arith.addf %197, %198 : vector<64x1xf32>
    %200 = arith.negf %199 : vector<64x1xf32>
    %201 = math.exp %200 : vector<64x1xf32>
    %cst_32 = arith.constant 1.000000e+00 : f32
    %202 = vector.broadcast %cst_32 : f32 to vector<64x1xf32>
    %203 = arith.addf %202, %201 : vector<64x1xf32>
    %204 = arith.divf %202, %203 : vector<64x1xf32>
    %205 = vector.broadcast %204 : vector<64x1xf32> to vector<64x256xf32>
    %206 = arith.mulf %0, %205 : vector<64x256xf32>
    %207 = vector.shape_cast %206 : vector<64x256xf32> to vector<2x32x256xf32>
    %cst_33 = arith.constant dense<0xFF800000> : vector<2x256xf32>
    %208 = vector.multi_reduction <maximumf>, %207, %cst_33 [1] : vector<2x32x256xf32> to vector<2x256xf32>
    %cst_34 = arith.constant dense<0.000000e+00> : vector<2x256xf32>
    %209 = vector.multi_reduction <add>, %207, %cst_34 [1] : vector<2x32x256xf32> to vector<2x256xf32>
    %cst_35 = arith.constant 3.125000e-02 : f32
    %210 = vector.broadcast %cst_35 : f32 to vector<2x256xf32>
    %211 = arith.mulf %209, %210 : vector<2x256xf32>
    %212 = tpu.concatenate %208, %211 in 1 : vector<2x256xf32>, vector<2x256xf32> -> vector<2x512xf32>
    %c0_36 = arith.constant 0 : index
    %c0_37 = arith.constant 0 : index
    %213 = vector.load %arg9[%c0_36, %c0_37] : memref<512x256xf32, #tpu.memory_space<vmem>>, vector<512x256xf32>
    %cst_38 = arith.constant dense<0.000000e+00> : vector<2x256xf32>
    %214 = tpu.matmul %212, %213, %cst_38 {dimension_numbers = #tpu.dot_dimension_numbers<[1], [0], [0], [1], [0, 0, 1, 1], [], []>} : vector<2x512xf32>, vector<512x256xf32>, vector<2x256xf32> -> vector<2x256xf32>
    %215 = arith.negf %214 : vector<2x256xf32>
    %216 = math.exp %215 : vector<2x256xf32>
    %cst_39 = arith.constant 1.000000e+00 : f32
    %217 = vector.broadcast %cst_39 : f32 to vector<2x256xf32>
    %218 = arith.addf %217, %216 : vector<2x256xf32>
    %219 = arith.divf %217, %218 : vector<2x256xf32>
    %220 = vector.shape_cast %219 : vector<2x256xf32> to vector<2x1x256xf32>
    %221 = vector.broadcast %220 : vector<2x1x256xf32> to vector<2x32x256xf32>
    %222 = arith.mulf %207, %221 : vector<2x32x256xf32>
    %223 = vector.shape_cast %222 : vector<2x32x256xf32> to vector<64x256xf32>
    %224 = arith.addf %0, %183 : vector<64x256xf32>
    %225 = arith.addf %224, %223 : vector<64x256xf32>
    %cst_40 = arith.constant 0.000000e+00 : f32
    %226 = vector.broadcast %cst_40 : f32 to vector<64x256xf32>
    %227 = arith.maximumf %225, %226 : vector<64x256xf32>
    %c0_41 = arith.constant 0 : index
    %c0_42 = arith.constant 0 : index
    %228 = vector.load %arg10[%c0_41, %c0_42] : memref<64x256xf32, #tpu.memory_space<vmem>>, vector<64x256xf32>
    tpu.vector_store %arg10[%c0_41, %c0_42], %227 {strides = array<i32>} : memref<64x256xf32, #tpu.memory_space<vmem>>, vector<64x256xf32>,
    return
  }
  func.func @transform_0(%arg0: i32) -> (i32, i32) {
    %c0_i32 = arith.constant 0 : i32
    %c0_i32_0 = arith.constant 0 : i32
    return %arg0, %c0_i32 : i32, i32
  }
  func.func @transform_1(%arg0: i32) -> (i32, i32) {
    %c0_i32 = arith.constant 0 : i32
    %c0_i32_0 = arith.constant 0 : i32
    %c0_i32_1 = arith.constant 0 : i32
    return %c0_i32, %c0_i32_0 : i32, i32
  }
  func.func @transform_2(%arg0: i32) -> (i32, i32) {
    %c0_i32 = arith.constant 0 : i32
    %c0_i32_0 = arith.constant 0 : i32
    %c0_i32_1 = arith.constant 0 : i32
    return %c0_i32, %c0_i32_0 : i32, i32
  }
  func.func @transform_3(%arg0: i32) -> (i32, i32) {
    %c0_i32 = arith.constant 0 : i32
    %c0_i32_0 = arith.constant 0 : i32
    %c0_i32_1 = arith.constant 0 : i32
    return %c0_i32, %c0_i32_0 : i32, i32
  }
  func.func @transform_4(%arg0: i32) -> (i32, i32) {
    %c0_i32 = arith.constant 0 : i32
    %c0_i32_0 = arith.constant 0 : i32
    %c0_i32_1 = arith.constant 0 : i32
    return %c0_i32, %c0_i32_0 : i32, i32
  }
  func.func @transform_5(%arg0: i32) -> (i32, i32) {
    %c0_i32 = arith.constant 0 : i32
    %c0_i32_0 = arith.constant 0 : i32
    %c0_i32_1 = arith.constant 0 : i32
    return %c0_i32, %c0_i32_0 : i32, i32
  }
  func.func @transform_6(%arg0: i32) -> (i32, i32) {
    %c0_i32 = arith.constant 0 : i32
    %c0_i32_0 = arith.constant 0 : i32
    %c0_i32_1 = arith.constant 0 : i32
    return %c0_i32, %c0_i32_0 : i32, i32
  }
  func.func @transform_7(%arg0: i32) -> (i32, i32) {
    %c0_i32 = arith.constant 0 : i32
    %c0_i32_0 = arith.constant 0 : i32
    %c0_i32_1 = arith.constant 0 : i32
    return %c0_i32, %c0_i32_0 : i32, i32
  }
  func.func @transform_8(%arg0: i32) -> (i32, i32) {
    %c0_i32 = arith.constant 0 : i32
    %c0_i32_0 = arith.constant 0 : i32
    %c0_i32_1 = arith.constant 0 : i32
    return %c0_i32, %c0_i32_0 : i32, i32
  }
  func.func @transform_9(%arg0: i32) -> (i32, i32) {
    %c0_i32 = arith.constant 0 : i32
    %c0_i32_0 = arith.constant 0 : i32
    return %arg0, %c0_i32 : i32, i32
  }
}

</mosaic_0001>

<bundles_post_ra>
// kernel: little_cbam2_basic_block.1
= control target key start
LH: loop header
LB: loop body
LE: loop exit
PB: predicated region body
PF: predicated region fallthrough
CT: control target
= control target key end

     0   :  { %s4044_s30 = smov 0   ;;  %s8672_s0 = inlined_call_operand.vmem [shape: f32[128,256], index: 0, kind: input, shape index: {}]   ;;  %s8673_s1 = inlined_call_operand.vmem [shape: f32[64,9], index: 1, kind: input, shape index: {}]   ;;  %s8674_s2 = inlined_call_operand.vmem [shape: f32[64,1], index: 2, kind: input, shape index: {}]   ;;  %s8675_s3 = inlined_call_operand.vmem [shape: f32[64,9], index: 3, kind: input, shape index: {}]   ;;  %s8676_s4 = inlined_call_operand.vmem [shape: f32[64,1], index: 4, kind: input, shape index: {}]   ;;  %s8677_s5 = inlined_call_operand.vmem [shape: f32[4,64], index: 5, kind: input, shape index: {}]   ;;  %s8678_s6 = inlined_call_operand.vmem [shape: f32[64,4], index: 6, kind: input, shape index: {}]   ;;  %s8679_s7 = inlined_call_operand.vmem [shape: f32[9,256], index: 7, kind: input, shape index: {}]   ;;  %s8680_s8 = inlined_call_operand.vmem [shape: f32[512,256], index: 8, kind: input, shape index: {}]   ;;  %s8681_s9 = inlined_call_operand.vmem [shape: f32[128,256], index: 9, kind: output, shape index: {}]  }
   0x1 LB: > { %s3744_s10 = sadd.s32 4294967295, %s3975_s30   ;;  %p3748_p0 = scmp.ge.s32.totalorder %s3975_s30, 1  ;;  %s3975_s30 = sphi %s4044_s30, %s19_s30  }
   0x2   : > { %p289_p1 = scmp.lt.s32.totalorder %s3975_s30, 3 }
   0x4   : > { %p290_p2 = pnand %p3748_p0, %p289_p1 }
   0x6   : > { %293 = sbr.rel (%p290_p2) target bundleno = 1848 (0x738), region = 56 }
   0xb   : > { %v370_v0 = vld [vmem:[%s8674_s2 + $0x8] sm:$0xff]  ;;  %v4058_v1 = vld [vmem:[%s8673_s1 + $0x20] sm:$0xff]  ;;  %v4063_v2 = vld [vmem:[%s8673_s1 + $0x10] sm:$0xff]  ;;  %s3749_s17 = sshll.u32 %s3744_s10, 3  ;;  %v8684_v3 = vmov 0   ;;  %v8688_v4 = vmov 4  }
   0xc   : > { %3807 = vset.pattern.permute.xlu0 %v8684_v3  ;;  %3805 = vset.pattern.permute.xlu2 %v8688_v4  ;;  %p328_p3 = scmp.lt.s32.totalorder %s3749_s17, 15  ;;  %v375_v5 = vld [vmem:[%s8674_s2 + $0x30] sm:$0xff]  ;;  %v4078_v6 = vld [vmem:[%s8673_s1 + $0x28] sm:$0xff]  ;;  %v4083_v7 = vld [vmem:[%s8673_s1 + $0x18] sm:$0xff]  ;;  %s3979_s12 = smov 17   ;;  %v8686_v40 = vmov 1  }
   0xd   : > { %3804 = vset.pattern.permute.xlu1 %v8688_v4  ;;  %440 = vperm.xlu0 %3807, %v370_v0   ;;  %v4101_v9 = vld [vmem:[%s8673_s1 + $0x38] sm:$0xff]  ;;  %v369_v10 = vld [vmem:[%s8674_s2] sm:$0xff]  ;;  %v371_v13 = vld [vmem:[%s8674_s2 + $0x10] sm:$0xff]  ;;  %s3980_s10 = smov 16   ;;  %s3982_s14 = smov 15   ;;  %v8682_v47 = vmov 2  }
   0xe   : > { %399 = vperm.xlu2 %3805, %v4058_v1   ;;  %389 = vperm.xlu1 %3804, %v4063_v2   ;;  %s9865_s17 = smov (!%p328_p3, %s3749_s17), 15  ;;  %v372_v12 = vld [vmem:[%s8674_s2 + $0x18] sm:$0xff]  ;;  %v374_v15 = vld [vmem:[%s8674_s2 + $0x28] sm:$0xff]  ;;  %v373_v16 = vld [vmem:[%s8674_s2 + $0x20] sm:$0xff]  ;;  %s3984_s15 = smov 1   ;;  %vm2811_vm8 = vcmask 7168  }
   0xf   : > { %s3777_s24 = sshll.u32 %s9865_s17, 4  ;;  %v376_v18 = vld [vmem:[%s8674_s2 + $0x38] sm:$0xff]  ;;  %v4164_v23 = vld [vmem:[%s8673_s1] sm:$0xff]  ;;  %v4191_v28 = vld [vmem:[%s8673_s1 + $0x30] sm:$0xff]  ;;  %s3986_s16 = smov 127   ;;  %vm2821_vm9 = vcmask 523264  }
  0x10   : > { %s4093_s27 = scalar_lea.vmem %s8672_s0, %s3777_s24  ;;  %v4219_v33 = vld [vmem:[%s8673_s1 + $0x8] sm:$0xff]  ;;  %s3988_s18 = smov 113   ;;  %vm2879_vm10 = vcmask 1043456   ;;  %vm2854_vm11 = vcmask 31744  }
  0x11   : > { %v4096_v8 = vld [vmem:[%s4093_s27 + $0x10] sm:$0xff]  ;;  %v4111_v11 = vld [vmem:[%s4093_s27 + $0x40] sm:$0xff]  ;;  %v4134_v17 = vld [vmem:[%s4093_s27 + $0x28] sm:$0xff]  ;;  %s3990_s19 = smov 112   ;;  %s3992_s20 = smov 111  }
  0x12   : > { %v4123_v14 = vld [vmem:[%s4093_s27 + $0x70] sm:$0xff]  ;;  %v4140_v19 = vld [vmem:[%s4093_s27] sm:$0xff]  ;;  %v4147_v20 = vld [vmem:[%s4093_s27 + $0x58] sm:$0xff] }
  0x13   : > { %v4150_v21 = vld [vmem:[%s4093_s27 + $0x20] sm:$0xff]  ;;  %v4153_v22 = vld [vmem:[%s4093_s27 + $0x30] sm:$0xff]  ;;  %v4178_v26 = vld [vmem:[%s4093_s27 + $0x8] sm:$0xff] }
  0x14   : > { %v4167_v24 = vld [vmem:[%s4093_s27 + $0x50] sm:$0xff]  ;;  %v4170_v25 = vld [vmem:[%s4093_s27 + $0x60] sm:$0xff]  ;;  %v4181_v27 = vld [vmem:[%s4093_s27 + $0x18] sm:$0xff] }
  0x15   : > { %465 = vperm.xlu0 %3807, %v375_v5   ;;  %v4194_v29 = vld [vmem:[%s4093_s27 + $0x38] sm:$0xff]  ;;  %v4197_v30 = vld [vmem:[%s4093_s27 + $0x48] sm:$0xff] }
  0x16   : > { %404 = vperm.xlu2 %3805, %v4078_v6   ;;  %394 = vperm.xlu1 %3804, %v4083_v7   ;;  %v4205_v31 = vld [vmem:[%s4093_s27 + $0x68] sm:$0xff]  ;;  %v4208_v32 = vld [vmem:[%s4093_s27 + $0x78] sm:$0xff] }
  0x1d   : > { %491 = vrot.lane.b32.xlu0 %v4096_v8, %s3979_s12 }
  0x1e   : > { %3806 = vset.pattern.permute.xlu2 %v8684_v3  ;;  %414 = vperm.xlu1 %3804, %v4101_v9  }
  0x1f   : > { %435 = vperm.xlu2 %3806, %v369_v10  }
  0x25   : > { %497 = vrot.lane.b32.xlu0 %v4111_v11, %s3979_s12 }
  0x26   : > { %3808 = vset.pattern.permute.xlu1 %v8684_v3 }
  0x27   : > { %450 = vperm.xlu2 %3806, %v372_v12   ;;  %445 = vperm.xlu1 %3808, %v371_v13  }
  0x2d   : > { %503 = vrot.lane.b32.xlu0 %v4123_v14, %s3979_s12 }
  0x2f   : > { %460 = vperm.xlu2 %3806, %v374_v15   ;;  %455 = vperm.xlu1 %3808, %v373_v16   ;;  %v8690_v15 = vmov 3  }
  0x35   : > { %509 = vrot.lane.b32.xlu0 %v4134_v17, %s3979_s12 }
  0x37   : > { %470 = vperm.xlu1 %3808, %v376_v18   ;;  %489 = vrot.lane.b32.xlu2 %v4140_v19, %s3979_s12 }
  0x3d   : > { %515 = vrot.lane.b32.xlu0 %v4147_v20, %s3979_s12 }
  0x3f   : > { %493 = vrot.lane.b32.xlu1 %v4150_v21, %s3979_s12  ;;  %495 = vrot.lane.b32.xlu2 %v4153_v22, %s3979_s12 }
  0x45   : > { %541 = vperm.xlu0 %3807, %v4164_v23  }
  0x47   : > { %499 = vrot.lane.b32.xlu1 %v4167_v24, %s3979_s12  ;;  %501 = vrot.lane.b32.xlu2 %v4170_v25, %s3979_s12 }
  0x4d   : > { %553 = vperm.xlu0 %3807, %v4083_v7  }
  0x4f   : > { %505 = vrot.lane.b32.xlu1 %v4178_v26, %s3979_s12  ;;  %507 = vrot.lane.b32.xlu2 %v4181_v27, %s3979_s12 }
  0x55   : > { %565 = vperm.xlu0 %3807, %v4191_v28  }
  0x57   : > { %511 = vrot.lane.b32.xlu1 %v4194_v29, %s3979_s12  ;;  %513 = vrot.lane.b32.xlu2 %v4197_v30, %s3979_s12 }
  0x5d   : > { %608 = vrot.lane.b32.xlu0 %v4096_v8, %s3980_s10 }
  0x5e   : > { %3813 = vset.pattern.permute.xlu0 %v8682_v47 }
  0x5f   : > { %517 = vrot.lane.b32.xlu1 %v4205_v31, %s3979_s12  ;;  %519 = vrot.lane.b32.xlu2 %v4208_v32, %s3979_s12 }
  0x65   : > { %614 = vrot.lane.b32.xlu0 %v4111_v11, %s3980_s10 }
  0x67   : > { %545 = vperm.xlu1 %3808, %v4219_v33   ;;  %549 = vperm.xlu2 %3806, %v4063_v2  }
  0x68   : > { %v4225_v34 = vpop.permute.xlu2 %399 }
  0x6d   : > { %620 = vrot.lane.b32.xlu0 %v4123_v14, %s3980_s10 }
  0x6f   : > { %557 = vperm.xlu1 %3808, %v4058_v1   ;;  %561 = vperm.xlu2 %3806, %v4078_v6  }
  0x70   : > { %v4231_v35 = vpop.permute.xlu2 %404 }
  0x75   : > { %626 = vrot.lane.b32.xlu0 %v4134_v17, %s3980_s10 }
  0x77   : > { %569 = vperm.xlu1 %3808, %v4101_v9   ;;  %606 = vrot.lane.b32.xlu2 %v4140_v19, %s3980_s10 }
  0x78   : > { %3810 = vset.pattern.permute.xlu2 %v8686_v40 }
  0x79   : > { %v4238_v36 = vpop.permute.xlu2 %435 }
  0x7a   : > { %9019 = vst [vmem:[#allocation2_spill] sm:$0xff] %v4238_v36 }
  0x7d   : > { %632 = vrot.lane.b32.xlu0 %v4147_v20, %s3980_s10 }
  0x7f   : > { %610 = vrot.lane.b32.xlu1 %v4150_v21, %s3980_s10  ;;  %612 = vrot.lane.b32.xlu2 %v4153_v22, %s3980_s10  ;;  %v4246_v37 = vpop.permute.xlu0 %440 }
  0x80   : > { %9020 = vst [vmem:[#allocation3_spill] sm:$0xff] %v4246_v37  ;;  %v4248_v38 = vpop.permute.xlu1 %389  ;;  %3809 = vset.pattern.permute.xlu1 %v8686_v40 }
  0x81   : > { %v4250_v39 = vpop.permute.xlu2 %450 }
  0x85   : > { %721 = vrot.lane.b32.xlu0 %v4140_v19, %s3982_s14 }
  0x87   : > { %616 = vrot.lane.b32.xlu1 %v4167_v24, %s3980_s10  ;;  %618 = vrot.lane.b32.xlu2 %v4170_v25, %s3980_s10  ;;  %v4260_v41 = vpop.permute.xlu0 %465 }
  0x88   : > { %9021 = vst [vmem:[#allocation4_spill] sm:$0xff] %v4260_v41  ;;  %v4262_v42 = vpop.permute.xlu1 %394 }
  0x89   : > { %v4264_v43 = vpop.permute.xlu2 %460 }
  0x8a   : > { %9022 = vst [vmem:[#allocation5_spill] sm:$0xff] %v4264_v43 }
  0x8d   : > { %727 = vrot.lane.b32.xlu0 %v4153_v22, %s3982_s14 }
  0x8f   : > { %622 = vrot.lane.b32.xlu1 %v4178_v26, %s3980_s10  ;;  %624 = vrot.lane.b32.xlu2 %v4181_v27, %s3980_s10  ;;  %v4272_v44 = vpop.permute.xlu0 %491 }
  0x90   : > { %v4274_v45 = vpop.permute.xlu1 %414 }
  0x91   : > { %9023 = vst [vmem:[#allocation6_spill] sm:$0xff] %v4274_v45  ;;  %v4276_v46 = vpop.permute.xlu2 %489 }
  0x95   : > { %733 = vrot.lane.b32.xlu0 %v4170_v25, %s3982_s14 }
  0x97   : > { %628 = vrot.lane.b32.xlu1 %v4194_v29, %s3980_s10  ;;  %630 = vrot.lane.b32.xlu2 %v4197_v30, %s3980_s10  ;;  %v4285_v48 = vpop.permute.xlu0 %497 }
  0x99   : > { %v4287_v49 = vpop.permute.xlu1 %445  ;;  %v4289_v50 = vpop.permute.xlu2 %495 }
  0x9d   : > { %739 = vrot.lane.b32.xlu0 %v4181_v27, %s3982_s14 }
  0x9f   : > { %634 = vrot.lane.b32.xlu1 %v4205_v31, %s3980_s10  ;;  %636 = vrot.lane.b32.xlu2 %v4208_v32, %s3980_s10  ;;  %v4297_v51 = vpop.permute.xlu0 %503 }
  0xa1   : > { %v4299_v52 = vpop.permute.xlu1 %455  ;;  %v4301_v53 = vpop.permute.xlu2 %501 }
  0xa5   : > { %745 = vrot.lane.b32.xlu0 %v4197_v30, %s3982_s14 }
  0xa7   : > { %660 = vperm.xlu1 %3809, %v4219_v33   ;;  %664 = vperm.xlu2 %3810, %v4063_v2   ;;  %v4307_v54 = vpop.permute.xlu0 %509 }
  0xa9   : > { %v4309_v55 = vpop.permute.xlu1 %470  ;;  %v4311_v56 = vpop.permute.xlu2 %507 }
  0xaa   : > { %9024 = vst [vmem:[#allocation7_spill] sm:$0xff] %v4309_v55 }
  0xad   : > { %751 = vrot.lane.b32.xlu0 %v4208_v32, %s3982_s14 }
  0xaf   : > { %668 = vperm.xlu1 %3809, %v4083_v7   ;;  %672 = vperm.xlu2 %3810, %v4058_v1   ;;  %v4317_v57 = vpop.permute.xlu0 %515 }
  0xb1   : > { %v4319_v58 = vpop.permute.xlu1 %493  ;;  %v4321_v59 = vpop.permute.xlu2 %513 }
  0xb5   : > { %779 = vperm.xlu0 %3813, %v4063_v2  }
  0xb7   : > { %680 = vperm.xlu1 %3809, %v4191_v28   ;;  %684 = vperm.xlu2 %3810, %v4101_v9   ;;  %v4326_v60 = vpop.permute.xlu0 %541 }
  0xb9   : > { %v4328_v61 = vpop.permute.xlu1 %499  ;;  %v4330_v62 = vpop.permute.xlu2 %519 }
  0xbd   : > { %799 = vperm.xlu0 %3813, %v4101_v9  }
  0xbf   : > { %723 = vrot.lane.b32.xlu1 %v4096_v8, %s3982_s14  ;;  %725 = vrot.lane.b32.xlu2 %v4150_v21, %s3982_s14  ;;  %v4337_v63 = vpop.permute.xlu0 %553 }
  0xc0   : > { %3811 = vset.pattern.permute.xlu1 %v8682_v47  ;;  %3812 = vset.pattern.permute.xlu2 %v8682_v47 }
  0xc1   : > { %v4341_v0 = vpop.permute.xlu1 %505  ;;  %v4343_v5 = vpop.permute.xlu2 %549 }
  0xc5   : > { %840 = vrot.lane.b32.xlu0 %v4150_v21, %s3984_s15 }
  0xc6   : > { %3815 = vset.pattern.permute.xlu0 %v8690_v15 }
  0xc7   : > { %729 = vrot.lane.b32.xlu1 %v4111_v11, %s3982_s14  ;;  %731 = vrot.lane.b32.xlu2 %v4167_v24, %s3982_s14  ;;  %v4351_v10 = vpop.permute.xlu0 %565 }
  0xc9   : > { %v4353_v12 = vpop.permute.xlu1 %511  ;;  %v4355_v13 = vpop.permute.xlu2 %561 }
  0xcd   : > { %846 = vrot.lane.b32.xlu0 %v4167_v24, %s3984_s15 }
  0xcf   : > { %735 = vrot.lane.b32.xlu1 %v4123_v14, %s3982_s14  ;;  %737 = vrot.lane.b32.xlu2 %v4178_v26, %s3982_s14  ;;  %v4364_v16 = vpop.permute.xlu0 %608 }
  0xd0   : > { %9025 = vst [vmem:[#allocation8_spill] sm:$0xff] %v4364_v16 }
  0xd1   : > { %v4366_v18 = vpop.permute.xlu1 %517  ;;  %v4368_v47 = vpop.permute.xlu2 %606 }
  0xd2   : > { %9026 = vst [vmem:[#allocation9_spill] sm:$0xff] %v4368_v47 }
  0xd5   : > { %852 = vrot.lane.b32.xlu0 %v4178_v26, %s3984_s15 }
  0xd7   : > { %741 = vrot.lane.b32.xlu1 %v4134_v17, %s3982_s14  ;;  %743 = vrot.lane.b32.xlu2 %v4194_v29, %s3982_s14  ;;  %v4376_v3 = vpop.permute.xlu0 %614 }
  0xd8   : > { %9027 = vst [vmem:[#allocation10_spill] sm:$0xff] %v4376_v3 }
  0xd9   : > { %v4378_v40 = vpop.permute.xlu1 %545  ;;  %v4380_v4 = vpop.permute.xlu2 %612 }
  0xda   : > { %9028 = vst [vmem:[#allocation11_spill] sm:$0xff] %v4380_v4 }
  0xdd   : > { %858 = vrot.lane.b32.xlu0 %v4194_v29, %s3984_s15 }
  0xdf   : > { %747 = vrot.lane.b32.xlu1 %v4147_v20, %s3982_s14  ;;  %749 = vrot.lane.b32.xlu2 %v4205_v31, %s3982_s14  ;;  %v4388_v15 = vpop.permute.xlu0 %620 }
  0xe0   : > { %9029 = vst [vmem:[#allocation12_spill] sm:$0xff] %v4388_v15 }
  0xe1   : > { %v4390_v41 = vpop.permute.xlu1 %557  ;;  %v4392_v37 = vpop.permute.xlu2 %618 }
  0xe2   : > { %9030 = vst [vmem:[#allocation13_spill] sm:$0xff] %v4392_v37 }
  0xe5   : > { %864 = vrot.lane.b32.xlu0 %v4205_v31, %s3984_s15 }
  0xe7   : > { %771 = vperm.xlu1 %3811, %v4164_v23   ;;  %775 = vperm.xlu2 %3812, %v4219_v33   ;;  %v4398_v36 = vpop.permute.xlu0 %626 }
  0xe8   : > { %9031 = vst [vmem:[#allocation14_spill] sm:$0xff] %v4398_v36 }
  0xe9   : > { %v4400_v4 = vpop.permute.xlu1 %569  ;;  %v4402_v47 = vpop.permute.xlu2 %624 }
  0xea   : > { %9032 = vst [vmem:[#allocation15_spill] sm:$0xff] %v4400_v4 }
  0xeb   : > { %9033 = vst [vmem:[#allocation16_spill] sm:$0xff] %v4402_v47 }
  0xed   : > { %890 = vperm.xlu0 %3815, %v4219_v33  }
  0xef   : > { %783 = vperm.xlu1 %3811, %v4083_v7   ;;  %787 = vperm.xlu2 %3812, %v4058_v1   ;;  %v4407_v37 = vpop.permute.xlu0 %632 }
  0xf0   : > { %9034 = vst [vmem:[#allocation17_spill] sm:$0xff] %v4407_v37 }
  0xf1   : > { %v4409_v15 = vpop.permute.xlu1 %610  ;;  %v4411_v3 = vpop.permute.xlu2 %630 }
  0xf2   : > { %9035 = vst [vmem:[#allocation18_spill] sm:$0xff] %v4409_v15 }
  0xf3   : > { %9036 = vst [vmem:[#allocation19_spill] sm:$0xff] %v4411_v3  ;;  %v9041_v3 = vmov 3  }
  0xf5   : > { %910 = vperm.xlu0 %3815, %v4191_v28  }
  0xf7   : > { %791 = vperm.xlu1 %3811, %v4078_v6   ;;  %795 = vperm.xlu2 %3812, %v4191_v28   ;;  %v4416_v36 = vpop.permute.xlu0 %721 }
  0xf8   : > { %9037 = vst [vmem:[#allocation20_spill] sm:$0xff] %v4416_v36 }
  0xf9   : > { %v4418_v16 = vpop.permute.xlu1 %616  ;;  %v4420_v47 = vpop.permute.xlu2 %636 }
  0xfa   : > { %9038 = vst [vmem:[#allocation21_spill] sm:$0xff] %v4418_v16 }
  0xfb   : > { %9039 = vst [vmem:[#allocation22_spill] sm:$0xff] %v4420_v47  ;;  %v8711_v47 = vmov 5  }
  0xfd   : > { %969 = vrot.lane.b32.xlu0 %v4096_v8, %s3986_s16 }
  0xfe   : > { %3817 = vset.pattern.permute.xlu0 %v8711_v47 }
  0xff   : > { %836 = vrot.lane.b32.xlu1 %v4140_v19, %s3984_s15  ;;  %838 = vrot.lane.b32.xlu2 %v4096_v8, %s3984_s15  ;;  %v4428_v37 = vpop.permute.xlu0 %727 }
 0x100   : > { %9040 = vst [vmem:[#allocation23_spill] sm:$0xff] %v4428_v37  ;;  %3814 = vset.pattern.permute.xlu2 %v9041_v3  ;;  %3816 = vset.pattern.permute.xlu1 %v9041_v3 }
 0x101   : > { %v4432_v36 = vpop.permute.xlu1 %622  ;;  %v4434_v16 = vpop.permute.xlu2 %664 }
 0x102   : > { %9042 = vst [vmem:[#allocation24_spill] sm:$0xff] %v4432_v36 }
 0x103   : > { %9043 = vst [vmem:[#allocation25_spill] sm:$0xff] %v4434_v16 }
 0x105   : > { %975 = vrot.lane.b32.xlu0 %v4111_v11, %s3986_s16 }
 0x107   : > { %842 = vrot.lane.b32.xlu1 %v4153_v22, %s3984_s15  ;;  %844 = vrot.lane.b32.xlu2 %v4111_v11, %s3984_s15  ;;  %v4443_v37 = vpop.permute.xlu0 %733 }
 0x108   : > { %9044 = vst [vmem:[#allocation26_spill] sm:$0xff] %v4443_v37 }
 0x109   : > { %v4445_v15 = vpop.permute.xlu1 %628  ;;  %v4447_v3 = vpop.permute.xlu2 %672 }
 0x10a   : > { %9045 = vst [vmem:[#allocation27_spill] sm:$0xff] %v4445_v15 }
 0x10b   : > { %9046 = vst [vmem:[#allocation28_spill] sm:$0xff] %v4447_v3 }
 0x10d   : > { %981 = vrot.lane.b32.xlu0 %v4123_v14, %s3986_s16 }
 0x10f   : > { %848 = vrot.lane.b32.xlu1 %v4170_v25, %s3984_s15  ;;  %850 = vrot.lane.b32.xlu2 %v4123_v14, %s3984_s15  ;;  %v4455_v47 = vpop.permute.xlu0 %739 }
 0x110   : > { %9047 = vst [vmem:[#allocation29_spill] sm:$0xff] %v4455_v47 }
 0x111   : > { %v4457_v36 = vpop.permute.xlu1 %634  ;;  %v4459_v16 = vpop.permute.xlu2 %684 }
 0x112   : > { %9048 = vst [vmem:[#allocation30_spill] sm:$0xff] %v4457_v36 }
 0x113   : > { %9049 = vst [vmem:[#allocation31_spill] sm:$0xff] %v4459_v16 }
 0x115   : > { %987 = vrot.lane.b32.xlu0 %v4134_v17, %s3986_s16 }
 0x117   : > { %854 = vrot.lane.b32.xlu1 %v4181_v27, %s3984_s15  ;;  %856 = vrot.lane.b32.xlu2 %v4134_v17, %s3984_s15  ;;  %v4467_v37 = vpop.permute.xlu0 %745 }
 0x118   : > { %9050 = vst [vmem:[#allocation32_spill] sm:$0xff] %v4467_v37 }
 0x119   : > { %v4469_v15 = vpop.permute.xlu1 %660  ;;  %v4471_v3 = vpop.permute.xlu2 %725 }
 0x11a   : > { %9051 = vst [vmem:[#allocation33_spill] sm:$0xff] %v4469_v15 }
 0x11b   : > { %9052 = vst [vmem:[#allocation34_spill] sm:$0xff] %v4471_v3 }
 0x11d   : > { %993 = vrot.lane.b32.xlu0 %v4147_v20, %s3986_s16 }
 0x11f   : > { %860 = vrot.lane.b32.xlu1 %v4197_v30, %s3984_s15  ;;  %862 = vrot.lane.b32.xlu2 %v4147_v20, %s3984_s15  ;;  %v4479_v47 = vpop.permute.xlu0 %751 }
 0x120   : > { %9053 = vst [vmem:[#allocation35_spill] sm:$0xff] %v4479_v47 }
 0x121   : > { %v4481_v36 = vpop.permute.xlu1 %668  ;;  %v4483_v16 = vpop.permute.xlu2 %731 }
 0x122   : > { %9054 = vst [vmem:[#allocation36_spill] sm:$0xff] %v4481_v36 }
 0x123   : > { %9055 = vst [vmem:[#allocation37_spill] sm:$0xff] %v4483_v16 }
 0x125   : > { %1017 = vperm.xlu0 %3817, %v4164_v23  }
 0x127   : > { %866 = vrot.lane.b32.xlu1 %v4208_v32, %s3984_s15  ;;  %886 = vperm.xlu2 %3814, %v4164_v23   ;;  %v4489_v37 = vpop.permute.xlu0 %779 }
 0x128   : > { %9056 = vst [vmem:[#allocation38_spill] sm:$0xff] %v4489_v37 }
 0x129   : > { %v4491_v3 = vpop.permute.xlu1 %680  ;;  %v4493_v15 = vpop.permute.xlu2 %737 }
 0x12a   : > { %9057 = vst [vmem:[#allocation39_spill] sm:$0xff] %v4491_v3 }
 0x12b   : > { %9058 = vst [vmem:[#allocation40_spill] sm:$0xff] %v4493_v15 }
 0x12d   : > { %1037 = vperm.xlu0 %3817, %v4078_v6  }
 0x12f   : > { %894 = vperm.xlu1 %3816, %v4063_v2   ;;  %898 = vperm.xlu2 %3814, %v4083_v7   ;;  %v4498_v16 = vpop.permute.xlu0 %799 }
 0x130   : > { %9059 = vst [vmem:[#allocation41_spill] sm:$0xff] %v4498_v16  ;;  %v9066_v16 = vmov 5  }
 0x131   : > { %v4500_v47 = vpop.permute.xlu1 %723  ;;  %v4502_v36 = vpop.permute.xlu2 %743 }
 0x132   : > { %9060 = vst [vmem:[#allocation42_spill] sm:$0xff] %v4500_v47 }
 0x133   : > { %9061 = vst [vmem:[#allocation43_spill] sm:$0xff] %v4502_v36 }
 0x135   : > { %1098 = vrot.lane.b32.xlu0 %v4140_v19, %s3988_s18 }
 0x137   : > { %902 = vperm.xlu1 %3816, %v4058_v1   ;;  %906 = vperm.xlu2 %3814, %v4078_v6   ;;  %v4508_v37 = vpop.permute.xlu0 %840 }
 0x138   : > { %9062 = vst [vmem:[#allocation44_spill] sm:$0xff] %v4508_v37  ;;  %v8738_v37 = vmov 6  }
 0x139   : > { %v4510_v15 = vpop.permute.xlu1 %729  ;;  %v4512_v3 = vpop.permute.xlu2 %749  ;;  %3822 = vset.pattern.permute.xlu0 %v8738_v37 }
 0x13a   : > { %9063 = vst [vmem:[#allocation45_spill] sm:$0xff] %v4510_v15 }
 0x13b   : > { %9064 = vst [vmem:[#allocation46_spill] sm:$0xff] %v4512_v3 }
 0x13d   : > { %1104 = vrot.lane.b32.xlu0 %v4153_v22, %s3988_s18 }
 0x13f   : > { %914 = vperm.xlu1 %3816, %v4101_v9   ;;  %967 = vrot.lane.b32.xlu2 %v4140_v19, %s3986_s16  ;;  %v4519_v36 = vpop.permute.xlu0 %846 }
 0x140   : > { %9065 = vst [vmem:[#allocation47_spill] sm:$0xff] %v4519_v36  ;;  %3819 = vset.pattern.permute.xlu2 %v9066_v16 }
 0x141   : > { %v4522_v47 = vpop.permute.xlu1 %735  ;;  %v4524_v4 = vpop.permute.xlu2 %775 }
 0x142   : > { %9067 = vst [vmem:[#allocation48_spill] sm:$0xff] %v4522_v47  ;;  %v8761_v47 = vmov 7  }
 0x143   : > { %9068 = vst [vmem:[#allocation49_spill] sm:$0xff] %v4524_v4 }
 0x145   : > { %1110 = vrot.lane.b32.xlu0 %v4170_v25, %s3988_s18 }
 0x147   : > { %971 = vrot.lane.b32.xlu1 %v4150_v21, %s3986_s16  ;;  %973 = vrot.lane.b32.xlu2 %v4153_v22, %s3986_s16  ;;  %v4533_v3 = vpop.permute.xlu0 %852 }
 0x148   : > { %9069 = vst [vmem:[#allocation50_spill] sm:$0xff] %v4533_v3  ;;  %3818 = vset.pattern.permute.xlu1 %v9066_v16 }
 0x149   : > { %v4536_v36 = vpop.permute.xlu1 %741  ;;  %v4538_v15 = vpop.permute.xlu2 %787 }
 0x14a   : > { %9070 = vst [vmem:[#allocation51_spill] sm:$0xff] %v4536_v36 }
 0x14b   : > { %9071 = vst [vmem:[#allocation52_spill] sm:$0xff] %v4538_v15 }
 0x14d   : > { %1116 = vrot.lane.b32.xlu0 %v4181_v27, %s3988_s18 }
 0x14f   : > { %977 = vrot.lane.b32.xlu1 %v4167_v24, %s3986_s16  ;;  %979 = vrot.lane.b32.xlu2 %v4170_v25, %s3986_s16  ;;  %v4546_v37 = vpop.permute.xlu0 %858 }
 0x150   : > { %9072 = vst [vmem:[#allocation53_spill] sm:$0xff] %v4546_v37 }
 0x151   : > { %v4548_v4 = vpop.permute.xlu1 %747  ;;  %v4550_v3 = vpop.permute.xlu2 %795 }
 0x152   : > { %9073 = vst [vmem:[#allocation54_spill] sm:$0xff] %v4548_v4 }
 0x153   : > { %9074 = vst [vmem:[#allocation55_spill] sm:$0xff] %v4550_v3 }
 0x155   : > { %1122 = vrot.lane.b32.xlu0 %v4197_v30, %s3988_s18 }
 0x157   : > { %983 = vrot.lane.b32.xlu1 %v4178_v26, %s3986_s16  ;;  %985 = vrot.lane.b32.xlu2 %v4181_v27, %s3986_s16  ;;  %v4558_v16 = vpop.permute.xlu0 %864 }
 0x158   : > { %9075 = vst [vmem:[#allocation56_spill] sm:$0xff] %v4558_v16 }
 0x159   : > { %v4560_v15 = vpop.permute.xlu1 %771  ;;  %v4562_v36 = vpop.permute.xlu2 %838 }
 0x15a   : > { %9076 = vst [vmem:[#allocation57_spill] sm:$0xff] %v4560_v15 }
 0x15b   : > { %9077 = vst [vmem:[#allocation58_spill] sm:$0xff] %v4562_v36 }
 0x15d   : > { %1128 = vrot.lane.b32.xlu0 %v4208_v32, %s3988_s18 }
 0x15f   : > { %989 = vrot.lane.b32.xlu1 %v4194_v29, %s3986_s16  ;;  %991 = vrot.lane.b32.xlu2 %v4197_v30, %s3986_s16  ;;  %v4570_v37 = vpop.permute.xlu0 %890 }
 0x160   : > { %9078 = vst [vmem:[#allocation59_spill] sm:$0xff] %v4570_v37 }
 0x161   : > { %v4572_v4 = vpop.permute.xlu1 %783  ;;  %v4574_v3 = vpop.permute.xlu2 %844 }
 0x162   : > { %9079 = vst [vmem:[#allocation60_spill] sm:$0xff] %v4572_v4 }
 0x163   : > { %9080 = vst [vmem:[#allocation61_spill] sm:$0xff] %v4574_v3 }
 0x165   : > { %1156 = vperm.xlu0 %3822, %v4063_v2  }
 0x167   : > { %995 = vrot.lane.b32.xlu1 %v4205_v31, %s3986_s16  ;;  %997 = vrot.lane.b32.xlu2 %v4208_v32, %s3986_s16  ;;  %v4581_v36 = vpop.permute.xlu0 %910 }
 0x168   : > { %9081 = vst [vmem:[#allocation62_spill] sm:$0xff] %v4581_v36 }
 0x169   : > { %v4583_v16 = vpop.permute.xlu1 %791  ;;  %v4585_v15 = vpop.permute.xlu2 %850 }
 0x16a   : > { %9082 = vst [vmem:[#allocation63_spill] sm:$0xff] %v4583_v16 }
 0x16b   : > { %9083 = vst [vmem:[#allocation64_spill] sm:$0xff] %v4585_v15 }
 0x16d   : > { %1176 = vperm.xlu0 %3822, %v4101_v9  }
 0x16f   : > { %1021 = vperm.xlu1 %3818, %v4219_v33   ;;  %1025 = vperm.xlu2 %3819, %v4063_v2   ;;  %v4590_v3 = vpop.permute.xlu0 %969 }
 0x170   : > { %9084 = vst [vmem:[#allocation65_spill] sm:$0xff] %v4590_v3 }
 0x171   : > { %v4592_v37 = vpop.permute.xlu1 %836  ;;  %v4594_v4 = vpop.permute.xlu2 %856 }
 0x172   : > { %9085 = vst [vmem:[#allocation66_spill] sm:$0xff] %v4592_v37 }
 0x173   : > { %9086 = vst [vmem:[#allocation67_spill] sm:$0xff] %v4594_v4 }
 0x175   : > { %1233 = vrot.lane.b32.xlu0 %v4150_v21, %s3990_s19 }
 0x176   : > { %3824 = vset.pattern.permute.xlu0 %v8761_v47 }
 0x177   : > { %1029 = vperm.xlu1 %3818, %v4083_v7   ;;  %1033 = vperm.xlu2 %3819, %v4058_v1   ;;  %v4600_v15 = vpop.permute.xlu0 %975 }
 0x178   : > { %9087 = vst [vmem:[#allocation68_spill] sm:$0xff] %v4600_v15  ;;  %v9094_v15 = vmov 6  }
 0x179   : > { %v4602_v36 = vpop.permute.xlu1 %842  ;;  %v4604_v16 = vpop.permute.xlu2 %862 }
 0x17a   : > { %9088 = vst [vmem:[#allocation69_spill] sm:$0xff] %v4602_v36 }
 0x17b   : > { %9089 = vst [vmem:[#allocation70_spill] sm:$0xff] %v4604_v16 }
 0x17d   : > { %1239 = vrot.lane.b32.xlu0 %v4167_v24, %s3990_s19 }
 0x17f   : > { %1041 = vperm.xlu1 %3818, %v4191_v28   ;;  %1045 = vperm.xlu2 %3819, %v4101_v9   ;;  %v4611_v3 = vpop.permute.xlu0 %981 }
 0x180   : > { %9090 = vst [vmem:[#allocation71_spill] sm:$0xff] %v4611_v3 }
 0x181   : > { %v4613_v4 = vpop.permute.xlu1 %848  ;;  %v4615_v37 = vpop.permute.xlu2 %886 }
 0x182   : > { %9091 = vst [vmem:[#allocation72_spill] sm:$0xff] %v4613_v4 }
 0x183   : > { %9092 = vst [vmem:[#allocation73_spill] sm:$0xff] %v4615_v37 }
 0x185   : > { %1245 = vrot.lane.b32.xlu0 %v4178_v26, %s3990_s19 }
 0x187   : > { %1100 = vrot.lane.b32.xlu1 %v4096_v8, %s3988_s18  ;;  %1102 = vrot.lane.b32.xlu2 %v4150_v21, %s3988_s18  ;;  %v4623_v47 = vpop.permute.xlu0 %987 }
 0x188   : > { %9093 = vst [vmem:[#allocation74_spill] sm:$0xff] %v4623_v47  ;;  %3820 = vset.pattern.permute.xlu1 %v9094_v15  ;;  %3821 = vset.pattern.permute.xlu2 %v9094_v15 }
 0x189   : > { %v4627_v3 = vpop.permute.xlu1 %854  ;;  %v4629_v16 = vpop.permute.xlu2 %898 }
 0x18a   : > { %9095 = vst [vmem:[#allocation75_spill] sm:$0xff] %v4627_v3 }
 0x18b   : > { %9096 = vst [vmem:[#allocation76_spill] sm:$0xff] %v4629_v16 }
 0x18d   : > { %1251 = vrot.lane.b32.xlu0 %v4194_v29, %s3990_s19 }
 0x18f   : > { %1106 = vrot.lane.b32.xlu1 %v4111_v11, %s3988_s18  ;;  %1108 = vrot.lane.b32.xlu2 %v4167_v24, %s3988_s18  ;;  %v4637_v36 = vpop.permute.xlu0 %993 }
 0x190   : > { %9097 = vst [vmem:[#allocation77_spill] sm:$0xff] %v4637_v36 }
 0x191   : > { %v4639_v47 = vpop.permute.xlu1 %860  ;;  %v4641_v37 = vpop.permute.xlu2 %906 }
 0x192   : > { %9098 = vst [vmem:[#allocation78_spill] sm:$0xff] %v4639_v47 }
 0x193   : > { %9099 = vst [vmem:[#allocation79_spill] sm:$0xff] %v4641_v37 }
 0x195   : > { %1257 = vrot.lane.b32.xlu0 %v4205_v31, %s3990_s19 }
 0x197   : > { %1112 = vrot.lane.b32.xlu1 %v4123_v14, %s3988_s18  ;;  %1114 = vrot.lane.b32.xlu2 %v4178_v26, %s3988_s18  ;;  %v4649_v15 = vpop.permute.xlu0 %1017 }
 0x198   : > { %9100 = vst [vmem:[#allocation80_spill] sm:$0xff] %v4649_v15 }
 0x199   : > { %v4651_v16 = vpop.permute.xlu1 %866  ;;  %v4653_v3 = vpop.permute.xlu2 %967 }
 0x19a   : > { %9101 = vst [vmem:[#allocation81_spill] sm:$0xff] %v4651_v16 }
 0x19b   : > { %9102 = vst [vmem:[#allocation82_spill] sm:$0xff] %v4653_v3 }
 0x19d   : > { %1283 = vperm.xlu0 %3824, %v4219_v33  }
 0x19f   : > { %1118 = vrot.lane.b32.xlu1 %v4134_v17, %s3988_s18  ;;  %1120 = vrot.lane.b32.xlu2 %v4194_v29, %s3988_s18  ;;  %v4660_v36 = vpop.permute.xlu0 %1037 }
 0x1a0   : > { %9103 = vst [vmem:[#allocation83_spill] sm:$0xff] %v4660_v36 }
 0x1a1   : > { %v4662_v47 = vpop.permute.xlu1 %894  ;;  %v4664_v37 = vpop.permute.xlu2 %973 }
 0x1a2   : > { %9104 = vst [vmem:[#allocation84_spill] sm:$0xff] %v4662_v47 }
 0x1a3   : > { %9105 = vst [vmem:[#allocation85_spill] sm:$0xff] %v4664_v37 }
 0x1a5   : > { %1303 = vperm.xlu0 %3824, %v4191_v28  }
 0x1a7   : > { %1124 = vrot.lane.b32.xlu1 %v4147_v20, %s3988_s18  ;;  %1126 = vrot.lane.b32.xlu2 %v4205_v31, %s3988_s18  ;;  %v4671_v15 = vpop.permute.xlu0 %1098 }
 0x1a8   : > { %9106 = vst [vmem:[#allocation86_spill] sm:$0xff] %v4671_v15  ;;  %v8786_v15 = vmov 8  }
 0x1a9   : > { %v4673_v3 = vpop.permute.xlu1 %902  ;;  %v4675_v16 = vpop.permute.xlu2 %979 }
 0x1aa   : > { %9107 = vst [vmem:[#allocation87_spill] sm:$0xff] %v4673_v3 }
 0x1ab   : > { %9108 = vst [vmem:[#allocation88_spill] sm:$0xff] %v4675_v16 }
 0x1ad   : > { %1362 = vrot.lane.b32.xlu0 %v4096_v8, %s3992_s20 }
 0x1ae   : > { %3826 = vset.pattern.permute.xlu0 %v8786_v15 }
 0x1af   : > { %1148 = vperm.xlu1 %3820, %v4164_v23   ;;  %1152 = vperm.xlu2 %3821, %v4219_v33   ;;  %v4681_v37 = vpop.permute.xlu0 %1104 }
 0x1b0   : > { %9109 = vst [vmem:[#allocation89_spill] sm:$0xff] %v4681_v37 }
 0x1b1   : > { %v4683_v36 = vpop.permute.xlu1 %914  ;;  %v4685_v47 = vpop.permute.xlu2 %985 }
 0x1b2   : > { %9110 = vst [vmem:[#allocation90_spill] sm:$0xff] %v4683_v36 }
 0x1b3   : > { %9111 = vst [vmem:[#allocation91_spill] sm:$0xff] %v4685_v47 }
 0x1b5   : > { %1368 = vrot.lane.b32.xlu0 %v4111_v11, %s3992_s20 }
 0x1b7   : > { %1160 = vperm.xlu1 %3820, %v4083_v7   ;;  %1164 = vperm.xlu2 %3821, %v4058_v1   ;;  %v4692_v16 = vpop.permute.xlu0 %1110 }
 0x1b8   : > { %9112 = vst [vmem:[#allocation92_spill] sm:$0xff] %v4692_v16 }
 0x1b9   : > { %v4694_v3 = vpop.permute.xlu1 %971  ;;  %v4696_v4 = vpop.permute.xlu2 %991 }
 0x1ba   : > { %9113 = vst [vmem:[#allocation93_spill] sm:$0xff] %v4694_v3 }
 0x1bb   : > { %9114 = vst [vmem:[#allocation94_spill] sm:$0xff] %v4696_v4  ;;  %v9119_v4 = vmov 7  }
 0x1bd   : > { %1374 = vrot.lane.b32.xlu0 %v4123_v14, %s3992_s20 }
 0x1bf   : > { %1168 = vperm.xlu1 %3820, %v4078_v6   ;;  %1172 = vperm.xlu2 %3821, %v4191_v28   ;;  %v4702_v37 = vpop.permute.xlu0 %1116 }
 0x1c0   : > { %9115 = vst [vmem:[#allocation95_spill] sm:$0xff] %v4702_v37 }
 0x1c1   : > { %v4704_v15 = vpop.permute.xlu1 %977  ;;  %v4706_v47 = vpop.permute.xlu2 %997 }
 0x1c2   : > { %9116 = vst [vmem:[#allocation96_spill] sm:$0xff] %v4704_v15  ;;  %v9131_v15 = vmov 4  }
 0x1c3   : > { %9117 = vst [vmem:[#allocation97_spill] sm:$0xff] %v4706_v47 }
 0x1c5   : > { %1380 = vrot.lane.b32.xlu0 %v4134_v17, %s3992_s20 }
 0x1c7   : > { %1229 = vrot.lane.b32.xlu1 %v4140_v19, %s3990_s19  ;;  %1231 = vrot.lane.b32.xlu2 %v4096_v8, %s3990_s19  ;;  %v4714_v16 = vpop.permute.xlu0 %1122 }
 0x1c8   : > { %9118 = vst [vmem:[#allocation98_spill] sm:$0xff] %v4714_v16  ;;  %3823 = vset.pattern.permute.xlu2 %v9119_v4  ;;  %3825 = vset.pattern.permute.xlu1 %v9119_v4 }
 0x1c9   : > { %v4718_v37 = vpop.permute.xlu1 %983  ;;  %v4720_v3 = vpop.permute.xlu2 %1025 }
 0x1ca   : > { %9120 = vst [vmem:[#allocation99_spill] sm:$0xff] %v4718_v37 }
 0x1cb   : > { %9121 = vst [vmem:[#allocation100_spill] sm:$0xff] %v4720_v3 }
 0x1cd   : > { %1386 = vrot.lane.b32.xlu0 %v4147_v20, %s3992_s20 }
 0x1cf   : > { %1235 = vrot.lane.b32.xlu1 %v4153_v22, %s3990_s19  ;;  %1237 = vrot.lane.b32.xlu2 %v4111_v11, %s3990_s19  ;;  %v4728_v8 = vpop.permute.xlu0 %1128 }
 0x1d0   : > { %9122 = vst [vmem:[#allocation101_spill] sm:$0xff] %v4728_v8 }
 0x1d1   : > { %v4730_v16 = vpop.permute.xlu1 %989  ;;  %v4732_v47 = vpop.permute.xlu2 %1033 }
 0x1d2   : > { %9123 = vst [vmem:[#allocation102_spill] sm:$0xff] %v4730_v16 }
 0x1d3   : > { %9124 = vst [vmem:[#allocation103_spill] sm:$0xff] %v4732_v47 }
 0x1d5   : > { %1410 = vperm.xlu0 %3826, %v4164_v23  }
 0x1d7   : > { %1241 = vrot.lane.b32.xlu1 %v4170_v25, %s3990_s19  ;;  %1243 = vrot.lane.b32.xlu2 %v4123_v14, %s3990_s19  ;;  %v4739_v4 = vpop.permute.xlu0 %1156 }
 0x1d8   : > { %9125 = vst [vmem:[#allocation104_spill] sm:$0xff] %v4739_v4 }
 0x1d9   : > { %v4741_v3 = vpop.permute.xlu1 %995  ;;  %v4743_v37 = vpop.permute.xlu2 %1045 }
 0x1da   : > { %9126 = vst [vmem:[#allocation105_spill] sm:$0xff] %v4741_v3 }
 0x1db   : > { %9127 = vst [vmem:[#allocation106_spill] sm:$0xff] %v4743_v37 }
 0x1dd   : > { %1430 = vperm.xlu0 %3826, %v4078_v6  }
 0x1df   : > { %1247 = vrot.lane.b32.xlu1 %v4181_v27, %s3990_s19  ;;  %1249 = vrot.lane.b32.xlu2 %v4134_v17, %s3990_s19  ;;  %v4750_v8 = vpop.permute.xlu0 %1176 }
 0x1e0   : > { %9128 = vst [vmem:[#allocation107_spill] sm:$0xff] %v4750_v8 }
 0x1e1   : > { %v4752_v16 = vpop.permute.xlu1 %1021  ;;  %v4754_v47 = vpop.permute.xlu2 %1102 }
 0x1e2   : > { %9129 = vst [vmem:[#allocation108_spill] sm:$0xff] %v4752_v16 }
 0x1e3   : > { %9130 = vst [vmem:[#allocation109_spill] sm:$0xff] %v4754_v47 }
 0x1e5   : > { %3829 = vset.pattern.permute.xlu0 %v9131_v15 }
 0x1e6   : > { %379 = vperm.xlu0 %3829, %v4164_v23  }
 0x1e7   : > { %1253 = vrot.lane.b32.xlu1 %v4197_v30, %s3990_s19  ;;  %1255 = vrot.lane.b32.xlu2 %v4147_v20, %s3990_s19  ;;  %v4762_v4 = vpop.permute.xlu0 %1233 }
 0x1e8   : > { %9132 = vst [vmem:[#allocation110_spill] sm:$0xff] %v4762_v4 }
 0x1e9   : > { %v4764_v3 = vpop.permute.xlu1 %1029  ;;  %v4766_v37 = vpop.permute.xlu2 %1108 }
 0x1ea   : > { %9133 = vst [vmem:[#allocation111_spill] sm:$0xff] %v4764_v3 }
 0x1eb   : > { %9134 = vst [vmem:[#allocation112_spill] sm:$0xff] %v4766_v37 }
 0x1ee   : > { %384 = vperm.xlu0 %3829, %v4219_v33  }
 0x1ef   : > { %1259 = vrot.lane.b32.xlu1 %v4208_v32, %s3990_s19  ;;  %1279 = vperm.xlu2 %3823, %v4164_v23   ;;  %v4772_v47 = vpop.permute.xlu0 %1239 }
 0x1f0   : > { %9135 = vst [vmem:[#allocation113_spill] sm:$0xff] %v4772_v47  ;;  %v1571_v47 = vld [vmem:[%s8675_s3] sm:$0xff] }
 0x1f1   : > { %v4774_v8 = vpop.permute.xlu1 %1041  ;;  %v4776_v16 = vpop.permute.xlu2 %1114 }
 0x1f2   : > { %9136 = vst [vmem:[#allocation114_spill] sm:$0xff] %v4774_v8 }
 0x1f3   : > { %9137 = vst [vmem:[#allocation115_spill] sm:$0xff] %v4776_v16 }
 0x1f6   : > { %409 = vperm.xlu0 %3829, %v4191_v28  }
 0x1f7   : > { %1287 = vperm.xlu1 %3825, %v4063_v2   ;;  %1291 = vperm.xlu2 %3823, %v4083_v7   ;;  %v4781_v37 = vpop.permute.xlu0 %1245 }
 0x1f8   : > { %9138 = vst [vmem:[#allocation116_spill] sm:$0xff] %v4781_v37  ;;  %v1576_v37 = vld [vmem:[%s8675_s3 + $0x28] sm:$0xff] }
 0x1f9   : > { %v4783_v4 = vpop.permute.xlu1 %1100  ;;  %v4785_v3 = vpop.permute.xlu2 %1120 }
 0x1fa   : > { %9139 = vst [vmem:[#allocation117_spill] sm:$0xff] %v4783_v4 }
 0x1fb   : > { %9140 = vst [vmem:[#allocation118_spill] sm:$0xff] %v4785_v3  ;;  %v9145_v3 = vmov 8  }
 0x1fe   : > { %1589 = vperm.xlu0 %3829, %v1571_v47  }
 0x1ff   : > { %1295 = vperm.xlu1 %3825, %v4058_v1   ;;  %1299 = vperm.xlu2 %3823, %v4078_v6   ;;  %v4792_v16 = vpop.permute.xlu0 %1251 }
 0x200   : > { %9141 = vst [vmem:[#allocation119_spill] sm:$0xff] %v4792_v16 }
 0x201   : > { %v4794_v8 = vpop.permute.xlu1 %1106  ;;  %v4796_v36 = vpop.permute.xlu2 %1126 }
 0x202   : > { %9142 = vst [vmem:[#allocation120_spill] sm:$0xff] %v4794_v8  ;;  %v9146_v8 = vmov 1  }
 0x203   : > { %9143 = vst [vmem:[#allocation121_spill] sm:$0xff] %v4796_v36 }
 0x206   : > { %1614 = vperm.xlu0 %3829, %v1576_v37  }
 0x207   : > { %1307 = vperm.xlu1 %3825, %v4101_v9   ;;  %1360 = vrot.lane.b32.xlu2 %v4140_v19, %s3992_s20  ;;  %v4804_v47 = vpop.permute.xlu0 %1257 }
 0x208   : > { %9144 = vst [vmem:[#allocation122_spill] sm:$0xff] %v4804_v47  ;;  %3828 = vset.pattern.permute.xlu2 %v9145_v3 }
 0x209   : > { %v4807_v4 = vpop.permute.xlu1 %1112  ;;  %v4809_v16 = vpop.permute.xlu2 %1152 }
 0x20e   : > { %3832 = vset.pattern.permute.xlu0 %v9146_v8 }
 0x20f   : > { %1364 = vrot.lane.b32.xlu1 %v4150_v21, %s3992_s20  ;;  %1366 = vrot.lane.b32.xlu2 %v4153_v22, %s3992_s20  ;;  %v4816_v37 = vpop.permute.xlu0 %1283 }
 0x210   : > { %9147 = vst [vmem:[#allocation123_spill] sm:$0xff] %v4816_v37  ;;  %656 = vperm.xlu0 %3832, %v4164_v23   ;;  %3827 = vset.pattern.permute.xlu1 %v9145_v3 }
 0x211   : > { %v4820_v19 = vpop.permute.xlu1 %1118  ;;  %v4822_v47 = vpop.permute.xlu2 %1164 }
 0x212   : > { %9148 = vst [vmem:[#allocation124_spill] sm:$0xff] %v4822_v47 }
 0x217   : > { %1370 = vrot.lane.b32.xlu1 %v4167_v24, %s3992_s20  ;;  %1372 = vrot.lane.b32.xlu2 %v4170_v25, %s3992_s20  ;;  %v4828_v8 = vpop.permute.xlu0 %1303 }
 0x218   : > { %9149 = vst [vmem:[#allocation125_spill] sm:$0xff] %v4828_v8  ;;  %676 = vperm.xlu0 %3832, %v4078_v6  }
 0x219   : > { %v4831_v36 = vpop.permute.xlu1 %1124  ;;  %v4833_v37 = vpop.permute.xlu2 %1172 }
 0x21a   : > { %9150 = vst [vmem:[#allocation126_spill] sm:$0xff] %v4831_v36 }
 0x21b   : > { %9151 = vst [vmem:[#allocation127_spill] sm:$0xff] %v4833_v37  ;;  %v9222_v37 = vld [vmem:[#allocation51_spill] sm:$0xff] }
 0x21f   : > { %1376 = vrot.lane.b32.xlu1 %v4178_v26, %s3992_s20  ;;  %1378 = vrot.lane.b32.xlu2 %v4181_v27, %s3992_s20  ;;  %v4839_v23 = vpop.permute.xlu0 %1362 }
 0x220   : > { %9152 = vst [vmem:[#allocation128_spill] sm:$0xff] %v4839_v23 }
 0x221   : > { %v4841_v3 = vpop.permute.xlu1 %1148  ;;  %v4843_v47 = vpop.permute.xlu2 %1231 }
 0x222   : > { %9153 = vst [vmem:[#allocation129_spill] sm:$0xff] %v4841_v3  ;;  %v9276_v3 = vmov 0  }
 0x223   : > { %9154 = vst [vmem:[#allocation130_spill] sm:$0xff] %v4843_v47  ;;  %v521_v47 = vlaneseq }
 0x227   : > { %1382 = vrot.lane.b32.xlu1 %v4194_v29, %s3992_s20  ;;  %1384 = vrot.lane.b32.xlu2 %v4197_v30, %s3992_s20  ;;  %v4849_v6 = vpop.permute.xlu0 %1368 }
 0x228   : > { %9155 = vst [vmem:[#allocation131_spill] sm:$0xff] %v4849_v6 }
 0x229   : > { %v4851_v25 = vpop.permute.xlu1 %1160  ;;  %v4853_v26 = vpop.permute.xlu2 %1237 }
 0x22a   : > { %9156 = vst [vmem:[#allocation132_spill] sm:$0xff] %v4851_v25 }
 0x22b   : > { %9157 = vst [vmem:[#allocation133_spill] sm:$0xff] %v4853_v26  ;;  %v423_v26 = vmul.f32 %v4262_v42, %v4153_v22  ;;  %v421_v22 = vmul.f32 %v4248_v38, %v4150_v21  ;;  %v4907_v21 = vld [vmem:[%s8679_s7 + $0x8] sm:$0xff] }
 0x22f   : > { %1388 = vrot.lane.b32.xlu1 %v4205_v31, %s3992_s20  ;;  %1390 = vrot.lane.b32.xlu2 %v4208_v32, %s3992_s20  ;;  %v4859_v27 = vpop.permute.xlu0 %1374  ;;  %v424_v31 = vmul.f32 %v4262_v42, %v4194_v29  ;;  %v4873_v32 = vand.u32 127, %v521_v47  ;;  %v4890_v29 = vld [vmem:[%s8679_s7] sm:$0xff]  ;;  %v4894_v42 = vmul.f32 %v4231_v35, %v4147_v20  ;;  %v431_v20 = vmul.f32 %v4274_v45, %v4123_v14 }
 0x230   : > { %9158 = vst [vmem:[#allocation134_spill] sm:$0xff] %v4859_v27 }
 0x231   : > { %v4861_v23 = vpop.permute.xlu1 %1168  ;;  %v4863_v8 = vpop.permute.xlu2 %1243  ;;  %9163 = vst [vmem:[#allocation139_spill] sm:$0xff] %v4894_v42  ;;  %vm523_vm0 = vcmp.lt.s32.totalorder %v4873_v32, 17  ;;  %v4931_v47 = vadd.f32 %v4309_v55, %v431_v20  ;;  %vm638_vm1 = vcmp.lt.s32.totalorder %v4873_v32, 16  ;;  %v9197_v42 = vld [vmem:[#allocation28_spill] sm:$0xff]  ;;  %vm753_vm2 = vcmp.lt.s32.totalorder %v4873_v32, 15 }
 0x232   : > { %9159 = vst [vmem:[#allocation135_spill] sm:$0xff] %v4861_v23  ;;  %v525_v14 = vsel %vm523_vm0, %v4272_v44, %v4311_v56  ;;  %v9228_v23 = vld [vmem:[#allocation45_spill] sm:$0xff]  ;;  %vm868_vm3 = vcmp.lt.s32.totalorder %v4873_v32, 1  ;;  %vm999_vm4 = vcmp.lt.s32.totalorder %v4873_v32, 127  ;;  %vm1130_vm5 = vcmp.lt.s32.totalorder %v4873_v32, 113 }
 0x233   : > { %9160 = vst [vmem:[#allocation136_spill] sm:$0xff] %v4863_v8  ;;  %v427_v8 = vmul.f32 %v4231_v35, %v4167_v24  ;;  %v422_v24 = vmul.f32 %v4248_v38, %v4134_v17  ;;  %v4915_v35 = vadd.f32 %v4287_v49, %v421_v22  ;;  %vm1261_vm6 = vcmp.lt.s32.totalorder %v4873_v32, 112 }
 0x234   : > { %9172 = vst [vmem:[#allocation148_spill] sm:$0xff] %v4931_v47  ;;  %vm1392_vm7 = vcmp.lt.s32.totalorder %v4873_v32, 111 }
 0x235   : > { %9167 = vst [vmem:[#allocation143_spill] sm:$0xff] %v4915_v35  ;;  %v4919_v17 = vadd.f32 %v4287_v49, %v422_v24  ;;  %v533_v49 = vsel %vm523_vm0, %v4311_v56, %v4272_v44  ;;  %v528_v44 = vsel %vm523_vm0, %v4285_v48, %v4321_v59  ;;  %v524_v56 = vsel %vm523_vm0, %v4276_v46, %v4341_v0  ;;  %v9221_v35 = vld [vmem:[#allocation34_spill] sm:$0xff] }
 0x237   : > { %1414 = vperm.xlu1 %3827, %v4219_v33   ;;  %1418 = vperm.xlu2 %3828, %v4063_v2   ;;  %v4867_v6 = vpop.permute.xlu0 %1380  ;;  %v425_v2 = vmul.f32 %v4225_v34, %v4111_v11  ;;  %v426_v33 = vmul.f32 %v4225_v34, %v4197_v30  ;;  %v4899_v11 = vadd.f32 %v4250_v39, %v423_v26  ;;  %v4942_v26 = vperm.slane %v4907_v21, 0 }
 0x238   : > { %9161 = vst [vmem:[#allocation137_spill] sm:$0xff] %v4867_v6  ;;  %v4902_v30 = vadd.f32 %v4264_v43, %v427_v8  ;;  %v4910_v34 = vadd.f32 %v4250_v39, %v424_v31  ;;  %v4928_v39 = vperm.slane %v4890_v29, 0  ;;  %v526_v31 = vsel %vm523_vm0, %v4319_v58, %v4307_v54  ;;  %v9224_v6 = vld [vmem:[#allocation41_spill] sm:$0xff] }
 0x239   : > { %v4875_v27 = vpop.permute.xlu1 %1229  ;;  %v4877_v25 = vpop.permute.xlu2 %1249  ;;  %9164 = vst [vmem:[#allocation140_spill] sm:$0xff] %v4899_v11  ;;  %v4922_v38 = vadd.f32 %v4299_v52, %v425_v2  ;;  %v4925_v8 = vadd.f32 %v4299_v52, %v426_v33  ;;  %v534_v2 = vsel %vm523_vm0, %v4307_v54, %v4319_v58  ;;  %v529_v54 = vsel %vm523_vm0, %v4328_v61, %v4317_v57 }
 0x23a   : > { %9162 = vst [vmem:[#allocation138_spill] sm:$0xff] %v4875_v27  ;;  %v576_v58 = vmul.f32 %v4343_v5, %v534_v2  ;;  %v577_v24 = vmul.f32 %v4343_v5, %v526_v31  ;;  %v531_v5 = vsel %vm523_vm0, %v4297_v51, %v4330_v62  ;;  %v573_v31 = vmul.f32 %v4326_v60, %v524_v56  ;;  %v9227_v27 = vld [vmem:[#allocation32_spill] sm:$0xff] }
 0x23b   : > { %9165 = vst [vmem:[#allocation141_spill] sm:$0xff] %v4902_v30  ;;  %v581_v56 = vmul.f32 %v4390_v41, %v528_v44  ;;  %v9220_v30 = vld [vmem:[#allocation42_spill] sm:$0xff] }
 0x23c   : > { %9166 = vst [vmem:[#allocation142_spill] sm:$0xff] %v4910_v34  ;;  %v5015_v2 = vmul.f32 %v4928_v39, %v576_v58  ;;  %v5036_v58 = vmul.f32 %v4942_v26, %v573_v31  ;;  %v9184_v31 = vld [vmem:[#allocation16_spill] sm:$0xff] }
 0x23d   : > { %9168 = vst [vmem:[#allocation144_spill] sm:$0xff] %v4919_v17 }
 0x23e   : > { %9169 = vst [vmem:[#allocation145_spill] sm:$0xff] %v4922_v38  ;;  %v9203_v38 = vld [vmem:[#allocation33_spill] sm:$0xff] }
 0x23f   : > { %9170 = vst [vmem:[#allocation146_spill] sm:$0xff] %v4925_v8  ;;  %1422 = vperm.xlu1 %3827, %v4083_v7   ;;  %1426 = vperm.xlu2 %3828, %v4058_v1   ;;  %v4946_v52 = vpop.permute.xlu0 %1386  ;;  %v532_v1 = vsel %vm523_vm0, %v4341_v0, %v4276_v46  ;;  %v536_v7 = vsel %vm523_vm0, %v4321_v59, %v4285_v48  ;;  %v9196_v8 = vld [vmem:[#allocation25_spill] sm:$0xff] }
 0x240   : > { %9171 = vst [vmem:[#allocation147_spill] sm:$0xff] %v4928_v39  ;;  %v527_v48 = vsel %vm523_vm0, %v4289_v50, %v4353_v12  ;;  %v535_v59 = vsel %vm523_vm0, %v4353_v12, %v4289_v50  ;;  %v538_v46 = vsel %vm523_vm0, %v4366_v18, %v4301_v53  ;;  %v537_v0 = vsel %vm523_vm0, %v4317_v57, %v4328_v61 }
 0x241   : > { %9173 = vst [vmem:[#allocation149_spill] sm:$0xff] %v4942_v26  ;;  %v4977_v33 = vpop.permute.xlu1 %1235  ;;  %v4979_v22 = vpop.permute.xlu2 %1255  ;;  %v572_v20 = vmul.f32 %v4326_v60, %v532_v1  ;;  %v530_v50 = vsel %vm523_vm0, %v4301_v53, %v4366_v18  ;;  %v539_v12 = vsel %vm523_vm0, %v4330_v62, %v4297_v51  ;;  %v582_v57 = vmul.f32 %v4355_v13, %v537_v0 }
 0x242   : > { %9174 = vst [vmem:[#allocation150_spill] sm:$0xff] %v4946_v52  ;;  %v583_v61 = vmul.f32 %v4355_v13, %v529_v54  ;;  %v578_v1 = vmul.f32 %v4337_v63, %v535_v59  ;;  %v579_v55 = vmul.f32 %v4337_v63, %v527_v48  ;;  %v584_v53 = vmul.f32 %v4351_v10, %v538_v46 }
 0x243   : > { %9175 = vst [vmem:[#allocation151_spill] sm:$0xff] %v4977_v33  ;;  %v5021_v18 = vmul.f32 %v4942_v26, %v577_v24  ;;  %v585_v51 = vmul.f32 %v4351_v10, %v530_v50  ;;  %v574_v60 = vmul.f32 %v4378_v40, %v533_v49  ;;  %v575_v62 = vmul.f32 %v4378_v40, %v525_v14  ;;  %v9178_v14 = vld [vmem:[#allocation15_spill] sm:$0xff] }
 0x244   : > { %9176 = vst [vmem:[#allocation152_spill] sm:$0xff] %v4979_v22  ;;  %v5027_v13 = vmul.f32 %v4928_v39, %v572_v20  ;;  %v580_v54 = vmul.f32 %v4390_v41, %v536_v7  ;;  %v5039_v10 = vmul.f32 %v4928_v39, %v582_v57  ;;  %v5042_v40 = vmul.f32 %v4942_v26, %v583_v61  ;;  %v9185_v57 = vld [vmem:[#allocation8_spill] sm:$0xff]  ;;  %v9215_v33 = vld [vmem:[#allocation35_spill] sm:$0xff] }
 0x245   : > { %v586_v49 = vmul.f32 %v9178_v14, %v539_v12  ;;  %v5046_v7 = vmul.f32 %v4928_v39, %v578_v1  ;;  %v5060_v24 = vmul.f32 %v4942_v26, %v585_v51  ;;  %v5063_v48 = vmul.f32 %v4928_v39, %v574_v60  ;;  %v9187_v51 = vld [vmem:[#allocation18_spill] sm:$0xff] }
 0x246   : > { %v5066_v59 = vmul.f32 %v4942_v26, %v575_v62  ;;  %v5072_v46 = vmul.f32 %v4928_v39, %v580_v54  ;;  %v5075_v0 = vmul.f32 %v4942_v26, %v581_v56  ;;  %v5078_v20 = vmul.f32 %v9178_v14, %v531_v5  ;;  %v9188_v62 = vld [vmem:[#allocation19_spill] sm:$0xff]  ;;  %v9189_v54 = vld [vmem:[#allocation10_spill] sm:$0xff] }
 0x247   : > { %1434 = vperm.xlu1 %3827, %v4191_v28   ;;  %1438 = vperm.xlu2 %3828, %v4101_v9   ;;  %v5033_v63 = vpop.permute.xlu0 %1410  ;;  %v5049_v28 = vmul.f32 %v4942_v26, %v579_v55  ;;  %v5052_v9 = vmul.f32 %v4928_v39, %v584_v53  ;;  %v5069_v55 = vperm.slane %v4890_v29, 1  ;;  %v5081_v50 = vperm.slane %v4907_v21, 1  ;;  %v9186_v53 = vld [vmem:[#allocation14_spill] sm:$0xff] }
 0x248   : > { %9177 = vst [vmem:[#allocation153_spill] sm:$0xff] %v5033_v63  ;;  %v5084_v12 = vmul.f32 %v4928_v39, %v586_v49  ;;  %v640_v61 = vsel %vm638_vm1, %v9185_v57, %v9184_v31  ;;  %v648_v1 = vsel %vm638_vm1, %v9184_v31, %v9185_v57  ;;  %v641_v5 = vsel %vm638_vm1, %v9187_v51, %v9186_v53  ;;  %v9190_v49 = vld [vmem:[#allocation17_spill] sm:$0xff] }
 0x249   : > { %v5055_v41 = vpop.permute.xlu1 %1241  ;;  %v5057_v44 = vpop.permute.xlu2 %1279  ;;  %9181 = vst [vmem:[#allocation155_spill] sm:$0xff] %v5069_v55  ;;  %v649_v60 = vsel %vm638_vm1, %v9186_v53, %v9187_v51  ;;  %v643_v56 = vsel %vm638_vm1, %v9189_v54, %v9188_v62  ;;  %v651_v14 = vsel %vm638_vm1, %v9188_v62, %v9189_v54  ;;  %v9191_v31 = vld [vmem:[#allocation21_spill] sm:$0xff]  ;;  %v1572_v53 = vld [vmem:[%s8675_s3 + $0x8] sm:$0xff]  ;;  %v1573_v51 = vld [vmem:[%s8675_s3 + $0x10] sm:$0xff]  ;;  %v5248_v63 = vperm.slane %v4907_v21, 2 }
 0x24a   : > { %9179 = vst [vmem:[#allocation15_spill] sm:$0xff] %v5055_v41  ;;  %v5114_v57 = vsel %vm638_vm1, %v9191_v31, %v9190_v49  ;;  %v5126_v39 = vsel %vm638_vm1, %v9190_v49, %v9191_v31  ;;  %v9194_v62 = vld [vmem:[#allocation22_spill] sm:$0xff]  ;;  %v9195_v54 = vld [vmem:[#allocation12_spill] sm:$0xff]  ;;  %v691_v26 = vmul.f32 %v9196_v8, %v649_v60  ;;  %v695_v17 = vmul.f32 %v9197_v42, %v651_v14 }
 0x24b   : > { %9180 = vst [vmem:[#allocation154_spill] sm:$0xff] %v5057_v44  ;;  %v646_v45 = vsel %vm638_vm1, %v9195_v54, %v9194_v62  ;;  %v654_v43 = vsel %vm638_vm1, %v9194_v62, %v9195_v54  ;;  %v696_v47 = vmul.f32 %v9197_v42, %v643_v56  ;;  %v9199_v31 = vld [vmem:[#allocation24_spill] sm:$0xff]  ;;  %v689_v62 = vmul.f32 %v9203_v38, %v648_v1  ;;  %v9206_v56 = vld [vmem:[#allocation11_spill] sm:$0xff] }
 0x24c   : > { %9182 = vst [vmem:[#allocation156_spill] sm:$0xff] %v5078_v20  ;;  %v692_v20 = vmul.f32 %v9196_v8, %v641_v5  ;;  %v9202_v5 = vld [vmem:[#allocation31_spill] sm:$0xff]  ;;  %v690_v1 = vmul.f32 %v9203_v38, %v640_v61  ;;  %v5172_v54 = vmul.f32 %v5069_v55, %v691_v26  ;;  %v5180_v41 = vmul.f32 %v5069_v55, %v695_v17  ;;  %v9210_v38 = vld [vmem:[#allocation30_spill] sm:$0xff]  ;;  %v9211_v61 = vld [vmem:[#allocation13_spill] sm:$0xff] }
 0x24d   : > { %9183 = vst [vmem:[#allocation157_spill] sm:$0xff] %v5081_v50  ;;  %v701_v60 = vmul.f32 %v9202_v5, %v654_v43  ;;  %v653_v26 = vsel %vm638_vm1, %v9210_v38, %v9211_v61  ;;  %v758_v52 = vsel %vm753_vm2, %v9228_v23, %v9227_v27 }
 0x24e   : > { %9192 = vst [vmem:[#allocation16_spill] sm:$0xff] %v5114_v57  ;;  %v9200_v57 = vld [vmem:[#allocation9_spill] sm:$0xff] }
 0x24f   : > { %9193 = vst [vmem:[#allocation8_spill] sm:$0xff] %v5126_v39  ;;  %3830 = vset.pattern.permute.xlu1 %v9131_v15  ;;  %3831 = vset.pattern.permute.xlu2 %v9131_v15  ;;  %v5142_v49 = vpop.permute.xlu0 %1430  ;;  %v5148_v8 = vsel %vm638_vm1, %v9200_v57, %v9199_v31  ;;  %v5156_v42 = vsel %vm638_vm1, %v9199_v31, %v9200_v57  ;;  %v9205_v15 = vld [vmem:[#allocation27_spill] sm:$0xff]  ;;  %v9209_v31 = vld [vmem:[#allocation36_spill] sm:$0xff] }
 0x250   : > { %9198 = vst [vmem:[#allocation14_spill] sm:$0xff] %v5142_v49  ;;  %1594 = vperm.xlu1 %3830, %v1572_v53   ;;  %1599 = vperm.xlu2 %3831, %v1573_v51   ;;  %v642_v14 = vsel %vm638_vm1, %v9206_v56, %v9205_v15  ;;  %v650_v43 = vsel %vm638_vm1, %v9205_v15, %v9206_v56  ;;  %v9278_v39 = vld [vmem:[#allocation44_spill] sm:$0xff] }
 0x251   : > { %9201 = vst [vmem:[#allocation18_spill] sm:$0xff] %v5148_v8  ;;  %v5167_v53 = vpop.permute.xlu1 %1247  ;;  %v5169_v51 = vpop.permute.xlu2 %1291  ;;  %v5175_v57 = vmul.f32 %v5081_v50, %v692_v20  ;;  %v693_v34 = vmul.f32 %v9209_v31, %v650_v43  ;;  %v694_v11 = vmul.f32 %v9209_v31, %v642_v14  ;;  %v5183_v15 = vmul.f32 %v5081_v50, %v696_v47  ;;  %v9213_v43 = vld [vmem:[#allocation39_spill] sm:$0xff] }
 0x252   : > { %9204 = vst [vmem:[#allocation19_spill] sm:$0xff] %v5156_v42  ;;  %v645_v56 = vsel %vm638_vm1, %v9211_v61, %v9210_v38  ;;  %v5195_v20 = vmul.f32 %v9202_v5, %v646_v45  ;;  %v5198_v17 = vmul.f32 %v5069_v55, %v701_v60  ;;  %v5201_v47 = vmul.f32 %v5069_v55, %v689_v62  ;;  %v1574_v45 = vld [vmem:[%s8675_s3 + $0x18] sm:$0xff]  ;;  %v1575_v5 = vld [vmem:[%s8675_s3 + $0x20] sm:$0xff]  ;;  %v9217_v61 = vld [vmem:[#allocation20_spill] sm:$0xff] }
 0x253   : > { %9207 = vst [vmem:[#allocation10_spill] sm:$0xff] %v5167_v53  ;;  %v5204_v14 = vmul.f32 %v5081_v50, %v690_v1  ;;  %v699_v31 = vmul.f32 %v9213_v43, %v653_v26  ;;  %v700_v53 = vmul.f32 %v9213_v43, %v645_v56  ;;  %v5219_v60 = vmul.f32 %v5069_v55, %v693_v34  ;;  %v9216_v1 = vld [vmem:[#allocation40_spill] sm:$0xff] }
 0x254   : > { %9208 = vst [vmem:[#allocation17_spill] sm:$0xff] %v5169_v51  ;;  %v9214_v51 = vld [vmem:[#allocation48_spill] sm:$0xff]  ;;  %v5222_v62 = vmul.f32 %v5081_v50, %v694_v11  ;;  %v754_v56 = vsel %vm753_vm2, %v9217_v61, %v9216_v1  ;;  %v5229_v26 = vperm.slane %v4890_v29, 2  ;;  %v762_v43 = vsel %vm753_vm2, %v9216_v1, %v9217_v61  ;;  %v9225_v61 = vld [vmem:[#allocation49_spill] sm:$0xff] }
 0x255   : > { %9212 = vst [vmem:[#allocation21_spill] sm:$0xff] %v5195_v20  ;;  %v769_v38 = vsel %vm753_vm2, %v9215_v33, %v9214_v51  ;;  %v9219_v20 = vld [vmem:[#allocation29_spill] sm:$0xff]  ;;  %v764_v8 = vsel %vm753_vm2, %v9222_v37, %v9221_v35 }
 0x256   : > { %9218 = vst [vmem:[#allocation22_spill] sm:$0xff] %v5229_v26  ;;  %v755_v34 = vsel %vm753_vm2, %v9220_v30, %v9219_v20  ;;  %v763_v11 = vsel %vm753_vm2, %v9219_v20, %v9220_v30  ;;  %v816_v1 = vmul.f32 %v9224_v6, %v769_v38  ;;  %v5256_v30 = vmul.f32 %v5069_v55, %v699_v31  ;;  %v9231_v31 = vld [vmem:[#allocation38_spill] sm:$0xff] }
 0x257   : > { %9223 = vst [vmem:[#allocation12_spill] sm:$0xff] %v5248_v63  ;;  %v804_v49 = vmul.f32 %v9225_v61, %v763_v11  ;;  %v805_v44 = vmul.f32 %v9225_v61, %v755_v34  ;;  %v5259_v20 = vmul.f32 %v5081_v50, %v700_v53  ;;  %v766_v38 = vsel %vm753_vm2, %v9227_v27, %v9228_v23  ;;  %v9232_v11 = vld [vmem:[#allocation52_spill] sm:$0xff]  ;;  %v9233_v50 = vld [vmem:[#allocation43_spill] sm:$0xff] }
 0x258   : > { %1604 = vperm.xlu1 %3830, %v1574_v45   ;;  %1609 = vperm.xlu2 %3831, %v1575_v5   ;;  %v5253_v22 = vpop.permute.xlu0 %379  ;;  %v756_v53 = vsel %vm753_vm2, %v9221_v35, %v9222_v37  ;;  %v806_v34 = vmul.f32 %v9231_v31, %v764_v8  ;;  %v810_v61 = vmul.f32 %v9232_v11, %v766_v38 }
 0x259   : > { %9226 = vst [vmem:[#allocation25_spill] sm:$0xff] %v5253_v22  ;;  %v5269_v45 = vpop.permute.xlu1 %1253  ;;  %v5271_v5 = vpop.permute.xlu2 %1299  ;;  %v811_v6 = vmul.f32 %v9232_v11, %v758_v52  ;;  %v9234_v22 = vld [vmem:[#allocation23_spill] sm:$0xff]  ;;  %v5300_v52 = vsel %vm753_vm2, %v9214_v51, %v9215_v33  ;;  %v5303_v8 = vmul.f32 %v5229_v26, %v816_v1  ;;  %v807_v38 = vmul.f32 %v9231_v31, %v756_v53  ;;  %v1577_v33 = vld [vmem:[%s8675_s3 + $0x30] sm:$0xff]  ;;  %v9244_v31 = vld [vmem:[#allocation37_spill] sm:$0xff] }
 0x25a   : > { %9229 = vst [vmem:[#allocation28_spill] sm:$0xff] %v5269_v45  ;;  %v757_v23 = vsel %vm753_vm2, %v9234_v22, %v9233_v50  ;;  %v765_v27 = vsel %vm753_vm2, %v9233_v50, %v9234_v22  ;;  %v9235_v45 = vld [vmem:[#allocation46_spill] sm:$0xff]  ;;  %v5306_v22 = vmul.f32 %v5229_v26, %v804_v49  ;;  %v5309_v50 = vmul.f32 %v5248_v63, %v805_v44  ;;  %v9238_v11 = vld [vmem:[#allocation55_spill] sm:$0xff]  ;;  %v1578_v49 = vld [vmem:[%s8675_s3 + $0x38] sm:$0xff] }
 0x25b   : > { %9230 = vst [vmem:[#allocation24_spill] sm:$0xff] %v5271_v5  ;;  %v9236_v5 = vld [vmem:[#allocation26_spill] sm:$0xff]  ;;  %v5322_v51 = vmul.f32 %v5229_v26, %v806_v34  ;;  %v5325_v44 = vmul.f32 %v5229_v26, %v810_v61  ;;  %v5328_v1 = vmul.f32 %v5248_v63, %v811_v6  ;;  %v9245_v34 = vld [vmem:[#allocation60_spill] sm:$0xff]  ;;  %v9246_v6 = vld [vmem:[#allocation63_spill] sm:$0xff] }
 0x25c   : > { %v760_v37 = vsel %vm753_vm2, %v9236_v5, %v9235_v45  ;;  %v768_v35 = vsel %vm753_vm2, %v9235_v45, %v9236_v5  ;;  %9237 = vst [vmem:[#allocation9_spill] sm:$0xff] %v5300_v52  ;;  %v9239_v5 = vld [vmem:[#allocation57_spill] sm:$0xff]  ;;  %v809_v61 = vmul.f32 %v9245_v34, %v757_v23 }
 0x25d   : > { %v814_v55 = vmul.f32 %v9238_v11, %v768_v35  ;;  %v815_v45 = vmul.f32 %v9238_v11, %v760_v37  ;;  %v802_v42 = vmul.f32 %v9239_v5, %v762_v43  ;;  %9240 = vst [vmem:[#allocation31_spill] sm:$0xff] %v5322_v51  ;;  %v803_v53 = vmul.f32 %v9239_v5, %v754_v56  ;;  %v9243_v43 = vld [vmem:[#allocation54_spill] sm:$0xff] }
 0x25e   : > { %9241 = vst [vmem:[#allocation33_spill] sm:$0xff] %v5325_v44  ;;  %v759_v37 = vsel %vm753_vm2, %v9244_v31, %v9243_v43  ;;  %v767_v35 = vsel %vm753_vm2, %v9243_v43, %v9244_v31  ;;  %v808_v11 = vmul.f32 %v9245_v34, %v765_v27  ;;  %v9261_v34 = vld [vmem:[#allocation72_spill] sm:$0xff] }
 0x25f   : > { %9242 = vst [vmem:[#allocation27_spill] sm:$0xff] %v5328_v1  ;;  %v812_v52 = vmul.f32 %v9246_v6, %v767_v35  ;;  %v813_v56 = vmul.f32 %v9246_v6, %v759_v37  ;;  %v5347_v1 = vmul.f32 %v5248_v63, %v807_v38  ;;  %v5350_v44 = vmul.f32 %v5229_v26, %v814_v55  ;;  %v9256_v37 = vld [vmem:[#allocation50_spill] sm:$0xff]  ;;  %v9260_v35 = vld [vmem:[#allocation56_spill] sm:$0xff] }
 0x260   : > { %1619 = vperm.xlu1 %3830, %v1577_v33   ;;  %1624 = vperm.xlu2 %3831, %v1578_v49   ;;  %v5344_v5 = vpop.permute.xlu0 %384  ;;  %v5353_v27 = vmul.f32 %v5248_v63, %v815_v45  ;;  %v5356_v43 = vmul.f32 %v5229_v26, %v802_v42  ;;  %v5363_v33 = vmul.f32 %v5248_v63, %v803_v53  ;;  %v9255_v49 = vld [vmem:[#allocation66_spill] sm:$0xff]  ;;  %v5370_v55 = vperm.slane %v4890_v29, 3 }
 0x261   : > { %9247 = vst [vmem:[#allocation11_spill] sm:$0xff] %v5344_v5  ;;  %v5358_v23 = vpop.permute.xlu1 %1259  ;;  %v5360_v31 = vpop.permute.xlu2 %1360  ;;  %v877_v38 = vsel %vm868_vm3, %v9256_v37, %v9255_v49  ;;  %v5373_v45 = vperm.slane %v4907_v21, 3  ;;  %v5376_v42 = vmul.f32 %v5229_v26, %v808_v11  ;;  %v875_v53 = vsel %vm868_vm3, %v9261_v34, %v9260_v35 }
 0x262   : > { %9248 = vst [vmem:[#allocation36_spill] sm:$0xff] %v5347_v1  ;;  %v883_v6 = vsel %vm868_vm3, %v9260_v35, %v9261_v34  ;;  %v5394_v11 = vmul.f32 %v5248_v63, %v813_v56  ;;  %v9266_v1 = vld [vmem:[#allocation53_spill] sm:$0xff]  ;;  %v9269_v34 = vld [vmem:[#allocation58_spill] sm:$0xff] }
 0x263   : > { %9249 = vst [vmem:[#allocation30_spill] sm:$0xff] %v5350_v44  ;;  %v5391_v44 = vmul.f32 %v5229_v26, %v812_v52  ;;  %v9271_v26 = vld [vmem:[#allocation47_spill] sm:$0xff] }
 0x264   : > { %9250 = vst [vmem:[#allocation13_spill] sm:$0xff] %v5353_v27  ;;  %v5388_v27 = vmul.f32 %v5248_v63, %v809_v61  ;;  %v9268_v61 = vld [vmem:[#allocation75_spill] sm:$0xff] }
 0x265   : > { %9251 = vst [vmem:[#allocation39_spill] sm:$0xff] %v5356_v43  ;;  %v870_v52 = vsel %vm868_vm3, %v9269_v34, %v9268_v61  ;;  %v878_v56 = vsel %vm868_vm3, %v9268_v61, %v9269_v34  ;;  %v1581_v61 = vld [vmem:[%s8676_s4 + $0x10] sm:$0xff] }
 0x266   : > { %9252 = vst [vmem:[#allocation48_spill] sm:$0xff] %v5358_v23  ;;  %v9262_v23 = vld [vmem:[#allocation73_spill] sm:$0xff]  ;;  %v9273_v34 = vld [vmem:[#allocation76_spill] sm:$0xff] }
 0x267   : > { %9253 = vst [vmem:[#allocation35_spill] sm:$0xff] %v5360_v31  ;;  %v917_v5 = vmul.f32 %v9262_v23, %v877_v38  ;;  %v9275_v31 = vld [vmem:[#allocation79_spill] sm:$0xff] }
 0x268   : > { %9254 = vst [vmem:[#allocation40_spill] sm:$0xff] %v5363_v33  ;;  %v9267_v33 = vld [vmem:[#allocation69_spill] sm:$0xff]  ;;  %3833 = vset.pattern.permute.xlu1 %v9276_v3  ;;  %3834 = vset.pattern.permute.xlu2 %v9276_v3  ;;  %v5441_v36 = vpop.permute.xlu0 %409 }
 0x269   : > { %9257 = vst [vmem:[#allocation20_spill] sm:$0xff] %v5370_v55  ;;  %v872_v35 = vsel %vm868_vm3, %v9267_v33, %v9266_v1  ;;  %1655 = vperm.xlu2 %3834, %v1581_v61  }
 0x26a   : > { %9258 = vst [vmem:[#allocation29_spill] sm:$0xff] %v5373_v45 }
 0x26b   : > { %9259 = vst [vmem:[#allocation42_spill] sm:$0xff] %v5376_v42  ;;  %v869_v42 = vsel %vm868_vm3, %v9255_v49, %v9256_v37  ;;  %v880_v49 = vsel %vm868_vm3, %v9266_v1, %v9267_v33  ;;  %v9270_v37 = vld [vmem:[#allocation70_spill] sm:$0xff]  ;;  %v935_v33 = vmul.f32 %v5370_v55, %v917_v5 }
 0x26c   : > { %9263 = vst [vmem:[#allocation34_spill] sm:$0xff] %v5388_v27  ;;  %v918_v38 = vmul.f32 %v9262_v23, %v869_v42  ;;  %v874_v23 = vsel %vm868_vm3, %v9271_v26, %v9270_v37  ;;  %v9272_v42 = vld [vmem:[#allocation62_spill] sm:$0xff]  ;;  %v1580_v27 = vld [vmem:[%s8676_s4 + $0x8] sm:$0xff]  ;;  %v882_v1 = vsel %vm868_vm3, %v9270_v37, %v9271_v26 }
 0x26d   : > { %9264 = vst [vmem:[#allocation51_spill] sm:$0xff] %v5391_v44  ;;  %v929_v63 = vmul.f32 %v9272_v42, %v883_v6  ;;  %v923_v44 = vmul.f32 %v9273_v34, %v880_v49  ;;  %v924_v6 = vmul.f32 %v9273_v34, %v872_v35  ;;  %v927_v51 = vmul.f32 %v9275_v31, %v882_v1  ;;  %v9279_v26 = vld [vmem:[#allocation67_spill] sm:$0xff] }
 0x26e   : > { %9265 = vst [vmem:[#allocation49_spill] sm:$0xff] %v5394_v11  ;;  %v930_v11 = vmul.f32 %v9272_v42, %v875_v53  ;;  %v9274_v53 = vld [vmem:[#allocation59_spill] sm:$0xff]  ;;  %v879_v5 = vsel %vm868_vm3, %v9279_v26, %v9278_v39  ;;  %v936_v49 = vmul.f32 %v5373_v45, %v918_v38  ;;  %v928_v35 = vmul.f32 %v9275_v31, %v874_v23 }
 0x26f   : > { %v919_v42 = vmul.f32 %v9274_v53, %v878_v56  ;;  %v920_v43 = vmul.f32 %v9274_v53, %v870_v52  ;;  %9277 = vst [vmem:[#allocation32_spill] sm:$0xff] %v5441_v36  ;;  %1650 = vperm.xlu1 %3833, %v1580_v27   ;;  %v5449_v56 = vpop.permute.xlu1 %1287  ;;  %v5451_v52 = vpop.permute.xlu2 %1366  ;;  %v871_v37 = vsel %vm868_vm3, %v9278_v39, %v9279_v26  ;;  %v9282_v53 = vld [vmem:[#allocation84_spill] sm:$0xff]  ;;  %v9283_v39 = vld [vmem:[#allocation61_spill] sm:$0xff]  ;;  %v9284_v26 = vld [vmem:[#allocation78_spill] sm:$0xff] }
 0x270   : > { %9280 = vst [vmem:[#allocation45_spill] sm:$0xff] %v5449_v56  ;;  %v947_v1 = vmul.f32 %v5370_v55, %v929_v63  ;;  %v948_v34 = vmul.f32 %v5373_v45, %v930_v11  ;;  %v921_v3 = vmul.f32 %v9282_v53, %v879_v5  ;;  %v5461_v38 = vadd.f32 %v935_v33, %v5027_v13  ;;  %v9287_v5 = vld [vmem:[#allocation64_spill] sm:$0xff] }
 0x271   : > { %9281 = vst [vmem:[#allocation38_spill] sm:$0xff] %v5451_v52  ;;  %v941_v27 = vmul.f32 %v5370_v55, %v923_v44  ;;  %v942_v31 = vmul.f32 %v5373_v45, %v924_v6  ;;  %v922_v23 = vmul.f32 %v9282_v53, %v871_v37  ;;  %v937_v61 = vmul.f32 %v5370_v55, %v919_v42  ;;  %v9285_v6 = vld [vmem:[#allocation87_spill] sm:$0xff]  ;;  %v9288_v37 = vld [vmem:[#allocation81_spill] sm:$0xff] }
 0x272   : > { %v938_v52 = vmul.f32 %v5373_v45, %v920_v43  ;;  %v881_v63 = vsel %vm868_vm3, %v9284_v26, %v9283_v39  ;;  %v945_v11 = vmul.f32 %v5370_v55, %v927_v51  ;;  %v5474_v13 = vadd.f32 %v936_v49, %v5036_v58  ;;  %v1582_v53 = vld [vmem:[%s8676_s4 + $0x18] sm:$0xff] }
 0x273   : > { %v873_v44 = vsel %vm868_vm3, %v9283_v39, %v9284_v26  ;;  %v946_v33 = vmul.f32 %v5373_v45, %v928_v35  ;;  %v925_v42 = vmul.f32 %v9285_v6, %v881_v63  ;;  %v5483_v43 = vadd.f32 %v947_v1, %v5052_v9  ;;  %v1583_v35 = vld [vmem:[%s8676_s4 + $0x20] sm:$0xff] }
 0x274   : > { %v884_v51 = vsel %vm868_vm3, %v9288_v37, %v9287_v5  ;;  %v939_v58 = vmul.f32 %v5370_v55, %v921_v3  ;;  %v926_v49 = vmul.f32 %v9285_v6, %v873_v44  ;;  %v5498_v9 = vadd.f32 %v948_v34, %v5060_v24  ;;  %v9290_v26 = vld [vmem:[#allocation90_spill] sm:$0xff]  ;;  %v5517_v24 = vpop.permute.xlu0 %1589  ;;  %1665 = vperm.xlu2 %3834, %v1583_v35  }
 0x275   : > { %9286 = vst [vmem:[#allocation52_spill] sm:$0xff] %v5483_v43  ;;  %v5501_v1 = vadd.f32 %v941_v27, %v5046_v7  ;;  %v940_v39 = vmul.f32 %v5373_v45, %v922_v23  ;;  %v931_v3 = vmul.f32 %v9290_v26, %v884_v51  ;;  %v5506_v63 = vadd.f32 %v937_v61, %v5063_v48  ;;  %v9299_v61 = vld [vmem:[#allocation77_spill] sm:$0xff]  ;;  %v9303_v51 = vld [vmem:[#allocation99_spill] sm:$0xff] }
 0x276   : > { %9289 = vst [vmem:[#allocation43_spill] sm:$0xff] %v5498_v9  ;;  %v5509_v44 = vadd.f32 %v938_v52, %v5066_v59  ;;  %v5512_v6 = vadd.f32 %v942_v31, %v5049_v28  ;;  %v5515_v36 = vadd.f32 %v945_v11, %v5039_v10  ;;  %v5520_v7 = vadd.f32 %v946_v33, %v5042_v40  ;;  %v9300_v11 = vld [vmem:[#allocation96_spill] sm:$0xff] }
 0x277   : > { %9291 = vst [vmem:[#allocation23_spill] sm:$0xff] %v5506_v63  ;;  %v876_v48 = vsel %vm868_vm3, %v9287_v5, %v9288_v37  ;;  %v943_v34 = vmul.f32 %v5370_v55, %v925_v42  ;;  %1660 = vperm.xlu1 %3833, %v1582_v53   ;;  %v5528_v28 = vpop.permute.xlu1 %1295  ;;  %v5530_v10 = vpop.permute.xlu2 %1372  ;;  %v5533_v59 = vadd.f32 %v939_v58, %v5015_v2  ;;  %v5537_v52 = vperm.slane %v4890_v29, 5  ;;  %v9301_v42 = vld [vmem:[#allocation74_spill] sm:$0xff]  ;;  %v9302_v5 = vld [vmem:[#allocation93_spill] sm:$0xff] }
 0x278   : > { %9292 = vst [vmem:[#allocation46_spill] sm:$0xff] %v5509_v44  ;;  %v944_v40 = vmul.f32 %v5373_v45, %v926_v49  ;;  %v5540_v27 = vperm.slane %v4907_v21, 5  ;;  %v5543_v31 = vadd.f32 %v940_v39, %v5021_v18  ;;  %v949_v23 = vmul.f32 %v5370_v55, %v931_v3  ;;  %v9304_v58 = vld [vmem:[#allocation82_spill] sm:$0xff]  ;;  %v9307_v3 = vld [vmem:[#allocation68_spill] sm:$0xff]  ;;  %v9310_v55 = vld [vmem:[#allocation83_spill] sm:$0xff] }
 0x279   : > { %9293 = vst [vmem:[#allocation26_spill] sm:$0xff] %v5517_v24  ;;  %v1005_v33 = vsel %vm999_vm4, %v9300_v11, %v9299_v61  ;;  %v1013_v2 = vsel %vm999_vm4, %v9299_v61, %v9300_v11  ;;  %v1002_v37 = vsel %vm999_vm4, %v9302_v5, %v9301_v42  ;;  %v1010_v18 = vsel %vm999_vm4, %v9301_v42, %v9302_v5  ;;  %v9306_v39 = vld [vmem:[#allocation94_spill] sm:$0xff]  ;;  %v9308_v11 = vld [vmem:[#allocation100_spill] sm:$0xff] }
 0x27a   : > { %9294 = vst [vmem:[#allocation55_spill] sm:$0xff] %v5520_v7  ;;  %v1000_v49 = vsel %vm999_vm4, %v9304_v58, %v9303_v51  ;;  %v1008_v53 = vsel %vm999_vm4, %v9303_v51, %v9304_v58  ;;  %v5571_v35 = vadd.f32 %v943_v34, %v5072_v46  ;;  %v1004_v61 = vsel %vm999_vm4, %v9307_v3, %v9306_v39  ;;  %v9311_v51 = vld [vmem:[#allocation103_spill] sm:$0xff]  ;;  %v1585_v46 = vld [vmem:[%s8676_s4 + $0x30] sm:$0xff]  ;;  %v1586_v34 = vld [vmem:[%s8676_s4 + $0x38] sm:$0xff] }
 0x27b   : > { %9295 = vst [vmem:[#allocation57_spill] sm:$0xff] %v5530_v10  ;;  %v1052_v42 = vmul.f32 %v9308_v11, %v1002_v37  ;;  %v1053_v5 = vmul.f32 %v9308_v11, %v1010_v18  ;;  %v5580_v24 = vadd.f32 %v944_v40, %v5075_v0  ;;  %v1058_v45 = vmul.f32 %v9310_v55, %v1005_v33  ;;  %v9313_v18 = vld [vmem:[#allocation91_spill] sm:$0xff]  ;;  %v9314_v0 = vld [vmem:[#allocation65_spill] sm:$0xff]  ;;  %v9315_v33 = vld [vmem:[#allocation80_spill] sm:$0xff] }
 0x27c   : > { %9296 = vst [vmem:[#allocation54_spill] sm:$0xff] %v5537_v52  ;;  %v1059_v7 = vmul.f32 %v9310_v55, %v1013_v2  ;;  %v1056_v58 = vmul.f32 %v9311_v51, %v1004_v61  ;;  %v5592_v37 = vmul.f32 %v9290_v26, %v876_v48  ;;  %v1001_v40 = vsel %vm999_vm4, %v9314_v0, %v9313_v18  ;;  %v9317_v48 = vld [vmem:[#allocation97_spill] sm:$0xff] }
 0x27d   : > { %9297 = vst [vmem:[#allocation37_spill] sm:$0xff] %v5540_v27  ;;  %v1048_v55 = vmul.f32 %v9315_v33, %v1000_v49  ;;  %v1049_v2 = vmul.f32 %v9315_v33, %v1008_v53  ;;  %v5601_v61 = vadd.f32 %v949_v23, %v5084_v12  ;;  %v1009_v11 = vsel %vm999_vm4, %v9313_v18, %v9314_v0 }
 0x27e   : > { %9298 = vst [vmem:[#allocation60_spill] sm:$0xff] %v5543_v31  ;;  %v1012_v26 = vsel %vm999_vm4, %v9306_v39, %v9307_v3  ;;  %v1070_v23 = vmul.f32 %v5537_v52, %v1052_v42  ;;  %v1071_v53 = vmul.f32 %v5540_v27, %v1053_v5  ;;  %1680 = vperm.xlu2 %3834, %v1586_v34   ;;  %v9323_v34 = vld [vmem:[#allocation85_spill] sm:$0xff] }
 0x27f   : > { %9305 = vst [vmem:[#allocation63_spill] sm:$0xff] %v5571_v35  ;;  %1675 = vperm.xlu1 %3833, %v1585_v46   ;;  %v5623_v18 = vpop.permute.xlu1 %1307  ;;  %v5625_v39 = vpop.permute.xlu2 %1378  ;;  %v5628_v3 = vmul.f32 %v5537_v52, %v1058_v45  ;;  %v5631_v0 = vmul.f32 %v5540_v27, %v1059_v7  ;;  %v1057_v33 = vmul.f32 %v9311_v51, %v1012_v26  ;;  %v9322_v46 = vld [vmem:[#allocation102_spill] sm:$0xff]  ;;  %v9325_v26 = vld [vmem:[#allocation108_spill] sm:$0xff] }
 0x280   : > { %9309 = vst [vmem:[#allocation66_spill] sm:$0xff] %v5580_v24  ;;  %v5615_v24 = vpop.permute.xlu0 %1614  ;;  %v5636_v42 = vmul.f32 %v5537_v52, %v1048_v55  ;;  %v5639_v5 = vmul.f32 %v5540_v27, %v1049_v2  ;;  %v1011_v45 = vsel %vm999_vm4, %v9322_v46, %v9323_v34  ;;  %v9324_v7 = vld [vmem:[#allocation106_spill] sm:$0xff]  ;;  %v1051_v55 = vmul.f32 %v9325_v26, %v1009_v11 }
 0x281   : > { %9312 = vst [vmem:[#allocation50_spill] sm:$0xff] %v5592_v37  ;;  %v9318_v37 = vld [vmem:[#allocation71_spill] sm:$0xff]  ;;  %v5654_v2 = vadd.f32 %v1070_v23, %v5172_v54  ;;  %v5657_v44 = vadd.f32 %v1071_v53, %v5175_v57 }
 0x282   : > { %9316 = vst [vmem:[#allocation56_spill] sm:$0xff] %v5601_v61  ;;  %v1007_v49 = vsel %vm999_vm4, %v9318_v37, %v9317_v48  ;;  %v1015_v12 = vsel %vm999_vm4, %v9317_v48, %v9318_v37  ;;  %v1074_v37 = vmul.f32 %v5537_v52, %v1056_v58  ;;  %v1003_v48 = vsel %vm999_vm4, %v9323_v34, %v9322_v46  ;;  %v9330_v34 = vld [vmem:[#allocation88_spill] sm:$0xff] }
 0x283   : > { %9319 = vst [vmem:[#allocation72_spill] sm:$0xff] %v5615_v24  ;;  %v1062_v51 = vmul.f32 %v9324_v7, %v1007_v49  ;;  %v1050_v58 = vmul.f32 %v9325_v26, %v1001_v40  ;;  %v9326_v24 = vld [vmem:[#allocation111_spill] sm:$0xff]  ;;  %v1075_v46 = vmul.f32 %v5540_v27, %v1057_v33  ;;  %v9329_v40 = vld [vmem:[#allocation105_spill] sm:$0xff]  ;;  %v1063_v57 = vmul.f32 %v9324_v7, %v1015_v12 }
 0x284   : > { %9320 = vst [vmem:[#allocation73_spill] sm:$0xff] %v5623_v18  ;;  %v1055_v31 = vmul.f32 %v9326_v24, %v1011_v45  ;;  %v5663_v49 = vadd.f32 %v1074_v37, %v5180_v41  ;;  %v1006_v11 = vsel %vm999_vm4, %v9330_v34, %v9329_v40  ;;  %v1014_v54 = vsel %vm999_vm4, %v9329_v40, %v9330_v34  ;;  %v9332_v33 = vld [vmem:[#allocation101_spill] sm:$0xff]  ;;  %v9333_v12 = vld [vmem:[#allocation95_spill] sm:$0xff] }
 0x285   : > { %9321 = vst [vmem:[#allocation53_spill] sm:$0xff] %v5631_v0  ;;  %v1054_v0 = vmul.f32 %v9326_v24, %v1003_v48  ;;  %v9331_v24 = vld [vmem:[#allocation114_spill] sm:$0xff]  ;;  %v1138_v41 = vsel %vm1130_vm5, %v4807_v4, %v9332_v33  ;;  %v1080_v37 = vmul.f32 %v5537_v52, %v1062_v51  ;;  %v1068_v48 = vmul.f32 %v5537_v52, %v1050_v58  ;;  %v9334_v7 = vld [vmem:[#allocation117_spill] sm:$0xff] }
 0x286   : > { %9327 = vst [vmem:[#allocation69_spill] sm:$0xff] %v5657_v44  ;;  %v1060_v23 = vmul.f32 %v9331_v24, %v1006_v11  ;;  %v1061_v53 = vmul.f32 %v9331_v24, %v1014_v54  ;;  %v1069_v45 = vmul.f32 %v5540_v27, %v1051_v55  ;;  %v1073_v40 = vmul.f32 %v5540_v27, %v1055_v31  ;;  %v9337_v31 = vld [vmem:[#allocation107_spill] sm:$0xff] }
 0x287   : > { %9328 = vst [vmem:[#allocation75_spill] sm:$0xff] %v5663_v49  ;;  %v1072_v26 = vmul.f32 %v5537_v52, %v1054_v0  ;;  %v1132_v34 = vsel %vm1130_vm5, %v9334_v7, %v9333_v12  ;;  %v1140_v11 = vsel %vm1130_vm5, %v9333_v12, %v9334_v7  ;;  %v5694_v51 = vperm.slane %v4890_v29, 6  ;;  %v5696_v58 = vpop.permute.xlu1 %1364  ;;  %v5698_v55 = vpop.permute.xlu2 %1384 }
 0x288   : > { %9336 = vst [vmem:[#allocation70_spill] sm:$0xff] %v5696_v58  ;;  %v5701_v0 = vperm.slane %v4907_v21, 6  ;;  %v1193_v54 = vmul.f32 %v9337_v31, %v1138_v41  ;;  %v1181_v24 = vmul.f32 %v4809_v16, %v1132_v34  ;;  %v1182_v44 = vmul.f32 %v4809_v16, %v1140_v11  ;;  %v5706_v10 = vpop.permute.xlu0 %656 }
 0x289   : > { %9335 = vst [vmem:[#allocation58_spill] sm:$0xff] %v5694_v51  ;;  %v5709_v12 = vadd.f32 %v1075_v46, %v5183_v15  ;;  %v5712_v7 = vmul.f32 %v5540_v27, %v1063_v57  ;;  %v1078_v61 = vmul.f32 %v5537_v52, %v1060_v23  ;;  %v1079_v35 = vmul.f32 %v5540_v27, %v1061_v53  ;;  %v9345_v46 = vld [vmem:[#allocation115_spill] sm:$0xff]  ;;  %v9346_v57 = vld [vmem:[#allocation86_spill] sm:$0xff]  ;;  %v9363_v27 = vld [vmem:[#allocation124_spill] sm:$0xff] }
 0x28a   : > { %v5717_v18 = vadd.f32 %v1080_v37, %v5198_v17  ;;  %v5720_v41 = vadd.f32 %v1068_v48, %v5201_v47  ;;  %v5723_v16 = vadd.f32 %v1069_v45, %v5204_v14  ;;  %v5726_v34 = vadd.f32 %v1072_v26, %v5219_v60  ;;  %v9347_v47 = vld [vmem:[#allocation109_spill] sm:$0xff]  ;;  %v9350_v26 = vld [vmem:[#allocation118_spill] sm:$0xff] }
 0x28b   : > { %9338 = vst [vmem:[#allocation47_spill] sm:$0xff] %v5709_v12  ;;  %v5729_v15 = vadd.f32 %v1073_v40, %v5222_v62  ;;  %v1131_v23 = vsel %vm1130_vm5, %v9346_v57, %v9345_v46  ;;  %v5739_v17 = vsel %vm1130_vm5, %v9345_v46, %v9346_v57  ;;  %v1133_v14 = vsel %vm1130_vm5, %v9347_v47, %v4820_v19  ;;  %v9351_v40 = vld [vmem:[#allocation89_spill] sm:$0xff]  ;;  %v9356_v46 = vld [vmem:[#allocation92_spill] sm:$0xff]  ;;  %v9373_v12 = vld [vmem:[#allocation135_spill] sm:$0xff] }
 0x28c   : > { %9339 = vst [vmem:[#allocation62_spill] sm:$0xff] %v5712_v7  ;;  %v1146_v60 = vsel %vm1130_vm5, %v9332_v33, %v4807_v4  ;;  %v1211_v62 = vmul.f32 %v5694_v51, %v1193_v54  ;;  %v1199_v53 = vmul.f32 %v5694_v51, %v1181_v24  ;;  %v1200_v37 = vmul.f32 %v5701_v0, %v1182_v44  ;;  %v9352_v33 = vld [vmem:[#allocation98_spill] sm:$0xff]  ;;  %v9353_v44 = vld [vmem:[#allocation120_spill] sm:$0xff]  ;;  %v9355_v24 = vld [vmem:[#allocation121_spill] sm:$0xff] }
 0x28d   : > { %9340 = vst [vmem:[#allocation76_spill] sm:$0xff] %v5717_v18  ;;  %v5753_v48 = vadd.f32 %v1078_v61, %v5256_v30  ;;  %v5756_v45 = vadd.f32 %v1079_v35, %v5259_v20  ;;  %v5762_v11 = vsel %vm1130_vm5, %v9351_v40, %v9350_v26  ;;  %v5768_v4 = vsel %vm1130_vm5, %v9350_v26, %v9351_v40  ;;  %v9354_v35 = vld [vmem:[#allocation104_spill] sm:$0xff] }
 0x28e   : > { %9341 = vst [vmem:[#allocation59_spill] sm:$0xff] %v5720_v41  ;;  %v1135_v30 = vsel %vm1130_vm5, %v9353_v44, %v9352_v33  ;;  %v1141_v20 = vsel %vm1130_vm5, %v4820_v19, %v9347_v47  ;;  %v1183_v61 = vmul.f32 %v9354_v35, %v1133_v14  ;;  %v1143_v54 = vsel %vm1130_vm5, %v9352_v33, %v9353_v44 }
 0x28f   : > { %9342 = vst [vmem:[#allocation79_spill] sm:$0xff] %v5723_v16  ;;  %v1137_v57 = vsel %vm1130_vm5, %v9356_v46, %v9355_v24  ;;  %v5792_v26 = vsel %vm1130_vm5, %v9355_v24, %v9356_v46  ;;  %v5795_v19 = vmul.f32 %v9337_v31, %v1146_v60  ;;  %v5797_v47 = vpop.permute.xlu1 %1370  ;;  %v5799_v14 = vpop.permute.xlu2 %1390  ;;  %v5802_v40 = vadd.f32 %v1211_v62, %v5303_v8  ;;  %v9365_v46 = vld [vmem:[#allocation110_spill] sm:$0xff]  ;;  %v9366_v62 = vld [vmem:[#allocation8_spill] sm:$0xff]  ;;  %v9377_v16 = vld [vmem:[#allocation113_spill] sm:$0xff] }
 0x290   : > { %9343 = vst [vmem:[#allocation44_spill] sm:$0xff] %v5726_v34  ;;  %v5805_v33 = vadd.f32 %v1199_v53, %v5306_v22  ;;  %v5808_v44 = vadd.f32 %v1200_v37, %v5309_v50  ;;  %v1187_v52 = vmul.f32 %v9363_v27, %v1135_v30  ;;  %v5811_v24 = vpop.permute.xlu0 %676  ;;  %v1184_v31 = vmul.f32 %v9354_v35, %v1141_v20  ;;  %v9367_v50 = vld [vmem:[#allocation126_spill] sm:$0xff]  ;;  %v9368_v37 = vld [vmem:[#allocation112_spill] sm:$0xff] }
 0x291   : > { %9344 = vst [vmem:[#allocation67_spill] sm:$0xff] %v5729_v15  ;;  %v1188_v60 = vmul.f32 %v9363_v27, %v1143_v54  ;;  %v1264_v8 = vsel %vm1261_vm6, %v9365_v46, %v4877_v25  ;;  %v697_v22 = vmul.f32 %v5811_v24, %v9366_v62  ;;  %v1201_v53 = vmul.f32 %v5694_v51, %v1183_v61  ;;  %v9369_v27 = vld [vmem:[#allocation129_spill] sm:$0xff]  ;;  %v9371_v54 = vld [vmem:[#allocation19_spill] sm:$0xff]  ;;  %v9372_v62 = vld [vmem:[#allocation150_spill] sm:$0xff] }
 0x292   : > { %9348 = vst [vmem:[#allocation84_spill] sm:$0xff] %v5753_v48  ;;  %v1136_v30 = vsel %vm1130_vm5, %v9368_v37, %v9367_v50  ;;  %v1179_v20 = vmul.f32 %v9369_v27, %v1131_v23  ;;  %v5830_v35 = vperm.slane %v4890_v29, 7  ;;  %v687_v7 = vmul.f32 %v5706_v10, %v9371_v54  ;;  %v9376_v23 = vld [vmem:[#allocation152_spill] sm:$0xff] }
 0x293   : > { %9349 = vst [vmem:[#allocation61_spill] sm:$0xff] %v5756_v45  ;;  %v1398_v61 = vsel %vm1392_vm7, %v5797_v47, %v9372_v62  ;;  %v9374_v45 = vld [vmem:[#allocation116_spill] sm:$0xff]  ;;  %v1267_v29 = vsel %vm1261_vm6, %v9377_v16, %v9376_v23  ;;  %v5850_v18 = vmul.f32 %v5701_v0, %v1188_v60  ;;  %v9380_v62 = vld [vmem:[#allocation154_spill] sm:$0xff]  ;;  %v5855_v34 = vmul.f32 %v5701_v0, %v1184_v31  ;;  %v9387_v31 = vld [vmem:[#allocation137_spill] sm:$0xff] }
 0x294   : > { %9357 = vst [vmem:[#allocation78_spill] sm:$0xff] %v5795_v19  ;;  %v1314_v19 = vmul.f32 %v5449_v56, %v1264_v8  ;;  %v9375_v8 = vld [vmem:[#allocation138_spill] sm:$0xff]  ;;  %v9382_v56 = vld [vmem:[#allocation31_spill] sm:$0xff]  ;;  %v1197_v60 = vmul.f32 %v5694_v51, %v1179_v20 }
 0x295   : > { %9358 = vst [vmem:[#allocation87_spill] sm:$0xff] %v5797_v47  ;;  %v1262_v48 = vsel %vm1261_vm6, %v9375_v8, %v9374_v45  ;;  %v9389_v20 = vld [vmem:[#allocation35_spill] sm:$0xff] }
 0x296   : > { %9359 = vst [vmem:[#allocation64_spill] sm:$0xff] %v5799_v14  ;;  %v1310_v47 = vmul.f32 %v9380_v62, %v1262_v48  ;;  %v1332_v49 = vmul.f32 %v5830_v35, %v1314_v19  ;;  %v9386_v48 = vld [vmem:[#allocation25_spill] sm:$0xff] }
 0x297   : > { %9360 = vst [vmem:[#allocation81_spill] sm:$0xff] %v5802_v40  ;;  %v9378_v40 = vld [vmem:[#allocation155_spill] sm:$0xff]  ;;  %v5876_v14 = vpop.permute.xlu2 %1418 }
 0x298   : > { %9361 = vst [vmem:[#allocation90_spill] sm:$0xff] %v5805_v33  ;;  %v715_v54 = vmul.f32 %v9378_v40, %v697_v22  ;;  %v1217_v33 = vadd.f32 %v1201_v53, %v9382_v56  ;;  %v5862_v22 = vld [vmem:[%s8679_s7 + $0x10] ss:$0 sm:$0xff]  ;;  %v1395_v56 = vsel %vm1392_vm7, %v5696_v58, %v9387_v31  ;;  %v705_v19 = vmul.f32 %v9378_v40, %v687_v7  ;;  %v1377_v53 = vpop.permute.xlu1 %1376  ;;  %v9390_v40 = vld [vmem:[#allocation153_spill] sm:$0xff]  ;;  %v9391_v58 = vld [vmem:[#allocation18_spill] sm:$0xff] }
 0x299   : > { %9362 = vst [vmem:[#allocation77_spill] sm:$0xff] %v5808_v44  ;;  %v1189_v44 = vmul.f32 %v9373_v12, %v1136_v30  ;;  %v9381_v30 = vld [vmem:[#allocation24_spill] sm:$0xff]  ;;  %v1328_v63 = vmul.f32 %v5830_v35, %v1310_v47  ;;  %v1401_v7 = vsel %vm1392_vm7, %v1377_v53, %v9389_v20  ;;  %v9393_v47 = vld [vmem:[#allocation2_spill] sm:$0xff] }
 0x29a   : > { %9364 = vst [vmem:[#allocation96_spill] sm:$0xff] %v5811_v24  ;;  %v1205_v24 = vmul.f32 %v5694_v51, %v1187_v52  ;;  %v1320_v15 = vmul.f32 %v9381_v30, %v1267_v29  ;;  %v9384_v52 = vld [vmem:[#allocation14_spill] sm:$0xff] }
 0x29b   : > { %9370 = vst [vmem:[#allocation74_spill] sm:$0xff] %v5830_v35  ;;  %v1451_v41 = vmul.f32 %v9384_v52, %v1398_v61  ;;  %v1207_v30 = vmul.f32 %v5694_v51, %v1189_v44  ;;  %v1092_v61 = vadd.f32 %v5628_v3, %v715_v54  ;;  %v1393_v52 = vsel %vm1392_vm7, %v9389_v20, %v1377_v53 }
 0x29c   : > { %9379 = vst [vmem:[#allocation93_spill] sm:$0xff] %v5850_v18  ;;  %v5867_v18 = vld [vmem:[%s4093_s27] sm:$0xff]  ;;  %v1338_v9 = vmul.f32 %v5830_v35, %v1320_v15  ;;  %v1441_v31 = vmul.f32 %v9390_v40, %v1393_v52  ;;  %v1348_v44 = vadd.f32 %v1332_v49, %v5533_v59  ;;  %v688_v3 = vmul.f32 %v5706_v10, %v9391_v58  ;;  %v9394_v49 = vld [vmem:[#allocation39_spill] sm:$0xff] }
 0x29d   : > { %9383 = vst [vmem:[#allocation99_spill] sm:$0xff] %v5862_v22  ;;  %v417_v29 = vmul.f32 %v5867_v18, %v9386_v48  ;;  %v1469_v54 = vmul.f32 %v5862_v22, %v1451_v41  ;;  %v1082_v15 = vadd.f32 %v5636_v42, %v705_v19  ;;  %v1180_v52 = vmul.f32 %v9369_v27, %v5739_v17  ;;  %v9395_v41 = vld [vmem:[#allocation51_spill] sm:$0xff]  ;;  %v5912_v17 = vld [vmem:[%s8679_s7 + $0x18] ss:$0 sm:$0xff] }
 0x29e   : > { %9385 = vst [vmem:[#allocation82_spill] sm:$0xff] %v5867_v18  ;;  %v1445_v18 = vmul.f32 %v5876_v14, %v1395_v56  ;;  %v9392_v56 = vld [vmem:[#allocation127_spill] sm:$0xff]  ;;  %v1459_v16 = vmul.f32 %v5862_v22, %v1441_v31  ;;  %v1442_v59 = vmul.f32 %v9390_v40, %v1401_v7  ;;  %v1213_v58 = vadd.f32 %v1197_v60, %v9394_v49  ;;  %v9397_v31 = vld [vmem:[#allocation157_spill] sm:$0xff] }
 0x29f   : > { %9388 = vst [vmem:[#allocation94_spill] sm:$0xff] %v5876_v14  ;;  %v1191_v14 = vmul.f32 %v9392_v56, %v1137_v57  ;;  %v473_v23 = vadd.f32 %v9393_v47, %v417_v29  ;;  %v1485_v53 = vadd.f32 %v1469_v54, %v1092_v61  ;;  %v1344_v57 = vadd.f32 %v1328_v63, %v5461_v38  ;;  %v9396_v42 = vld [vmem:[#allocation143_spill] sm:$0xff]  ;;  %v9399_v60 = vld [vmem:[#allocation33_spill] sm:$0xff] }
 0x2a0   : > { %v1463_v43 = vmul.f32 %v5862_v22, %v1445_v18  ;;  %v1223_v18 = vadd.f32 %v1207_v30, %v9395_v41  ;;  %v1475_v20 = vadd.f32 %v1459_v16, %v1082_v15  ;;  %v1354_v29 = vadd.f32 %v1338_v9, %v5515_v36  ;;  %v5921_v63 = vpop.permute.xlu1 %1382  ;;  %v9401_v7 = vld [vmem:[#allocation141_spill] sm:$0xff]  ;;  %v9407_v41 = vld [vmem:[#allocation15_spill] sm:$0xff] }
 0x2a1   : > { %v1495_v19 = vadd.f32 %v1348_v44, %v9396_v42  ;;  %v706_v22 = vmul.f32 %v9397_v31, %v688_v3  ;;  %v5919_v38 = vperm.slane %v4907_v21, 7  ;;  %v1491_v36 = vadd.f32 %v1344_v57, %v473_v23 }
 0x2a2   : > { %v1479_v10 = vadd.f32 %v1463_v43, %v5654_v2  ;;  %v1270_v2 = vsel %vm1261_vm6, %v9374_v45, %v9375_v8  ;;  %v1507_v9 = vadd.f32 %v1475_v20, %v1213_v58  ;;  %v1517_v40 = vadd.f32 %v1485_v53, %v1223_v18  ;;  %v5932_v8 = vld [vmem:[%s4093_s27 + $0x8] sm:$0xff]  ;;  %v9408_v20 = vld [vmem:[#allocation17_spill] sm:$0xff] }
 0x2a3   : > { %9398 = vst [vmem:[#allocation68_spill] sm:$0xff] %v5919_v38  ;;  %v1311_v16 = vmul.f32 %v9380_v62, %v1270_v2  ;;  %v1460_v27 = vmul.f32 %v5912_v17, %v1442_v59  ;;  %v1192_v61 = vmul.f32 %v9392_v56, %v5792_v26  ;;  %v1198_v45 = vmul.f32 %v5701_v0, %v1180_v52  ;;  %v9404_v58 = vld [vmem:[#allocation119_spill] sm:$0xff]  ;;  %v9409_v2 = vld [vmem:[#allocation10_spill] sm:$0xff] }
 0x2a4   : > { %v1511_v43 = vadd.f32 %v1479_v10, %v1217_v33  ;;  %v5926_v33 = vadd.f32 %v1205_v24, %v9399_v60  ;;  %v1523_v21 = vadd.f32 %v1507_v9, %v1491_v36  ;;  %9400 = vst [vmem:[#allocation100_spill] sm:$0xff] %v5932_v8  ;;  %v418_v23 = vmul.f32 %v5932_v8, %v9386_v48  ;;  %v9402_v24 = vld [vmem:[#allocation132_spill] sm:$0xff]  ;;  %v9410_v36 = vld [vmem:[#allocation130_spill] sm:$0xff] }
 0x2a5   : > { %v1501_v62 = vadd.f32 %v1354_v29, %v9401_v7  ;;  %v1083_v44 = vadd.f32 %v5639_v5, %v706_v22  ;;  %v1209_v54 = vmul.f32 %v5694_v51, %v1191_v14  ;;  %v1185_v15 = vmul.f32 %v9402_v24, %v5762_v11  ;;  %v9403_v48 = vld [vmem:[#allocation40_spill] sm:$0xff]  ;;  %v9405_v5 = vld [vmem:[#allocation151_spill] sm:$0xff]  ;;  %v9406_v22 = vld [vmem:[#allocation122_spill] sm:$0xff] }
 0x2a6   : > { %v1527_v30 = vadd.f32 %v1511_v43, %v1495_v19  ;;  %v1186_v26 = vmul.f32 %v9402_v24, %v5768_v4  ;;  %v1539_v56 = vmax.f32 %v1523_v21, 0.0  ;;  %v1329_v52 = vmul.f32 %v5919_v38, %v1311_v16  ;;  %v9412_v7 = vld [vmem:[#allocation125_spill] sm:$0xff] }
 0x2a7   : > { %v1533_v53 = vadd.f32 %v1517_v40, %v1501_v62  ;;  %v1476_v59 = vadd.f32 %v1460_v27, %v1083_v44  ;;  %v1214_v49 = vadd.f32 %v1198_v45, %v9403_v48  ;;  %v1265_v14 = vsel %vm1261_vm6, %v9405_v5, %v9404_v58  ;;  %v9411_v45 = vld [vmem:[#allocation36_spill] sm:$0xff]  ;;  %v9417_v48 = vld [vmem:[#allocation34_spill] sm:$0xff] }
 0x2a8   : > { %v1543_v3 = vmax.f32 %v1527_v30, 0.0  ;;  %v1273_v11 = vsel %vm1261_vm6, %v9404_v58, %v9405_v5  ;;  %v5955_v4 = vmin.f32 %v1539_v56, 6.0  ;;  %v1268_v18 = vsel %vm1261_vm6, %v9407_v41, %v9406_v22  ;;  %v5976_v40 = vpop.permute.xlu1 %1388  ;;  %v9418_v58 = vld [vmem:[#allocation131_spill] sm:$0xff] }
 0x2a9   : > { %v1276_v57 = vsel %vm1261_vm6, %v9406_v22, %v9407_v41  ;;  %v1316_v29 = vmul.f32 %v9408_v20, %v1265_v14  ;;  %v474_v42 = vadd.f32 %v9393_v47, %v418_v23  ;;  %v1210_v19 = vmul.f32 %v5701_v0, %v1192_v61  ;;  %v5982_v61 = vpop.permute.xlu2 %1426 }
 0x2aa   : > { %v5944_v10 = vmin.f32 %v1543_v3, 6.0  ;;  %v1203_v43 = vmul.f32 %v5694_v51, %v1185_v15  ;;  %v1263_v9 = vsel %vm1261_vm6, %v9410_v36, %v9409_v2  ;;  %v1317_v16 = vmul.f32 %v9408_v20, %v1273_v11  ;;  %1699 = vrot.lane.b32.xlu0 %v5955_v4, %s3979_s12  ;;  %v9413_v3 = vld [vmem:[#allocation123_spill] sm:$0xff] }
 0x2ab   : > { %v1204_v47 = vmul.f32 %v5701_v0, %v1186_v26  ;;  %v1345_v27 = vadd.f32 %v1329_v52, %v5474_v13  ;;  %v1549_v30 = vmax.f32 %v1533_v53, 0.0  ;;  %v1508_v60 = vadd.f32 %v1476_v59, %v1214_v49  ;;  %v9414_v26 = vld [vmem:[#allocation30_spill] sm:$0xff]  ;;  %v9415_v52 = vld [vmem:[#allocation13_spill] sm:$0xff] }
 0x2ac   : > { %1703 = vrot.lane.b32.xlu2 %v5944_v10, %s3979_s12  ;;  %v5986_v21 = vadd.f32 %v5855_v34, %v9411_v45  ;;  %v1144_v23 = vsel %vm1130_vm5, %v9367_v50, %v9368_v37  ;;  %v1322_v62 = vmul.f32 %v9412_v7, %v1268_v18  ;;  %v1323_v44 = vmul.f32 %v9412_v7, %v1276_v57  ;;  %v9416_v37 = vld [vmem:[#allocation42_spill] sm:$0xff]  ;;  %v9425_v45 = vld [vmem:[#allocation113_spill] sm:$0xff]  ;;  %v9426_v7 = vld [vmem:[#allocation152_spill] sm:$0xff] }
 0x2ad   : > { %v1271_v13 = vsel %vm1261_vm6, %v9409_v2, %v9410_v36  ;;  %v1312_v24 = vmul.f32 %v9413_v3, %v1263_v9  ;;  %v1334_v15 = vmul.f32 %v5830_v35, %v1316_v29  ;;  %v1492_v34 = vadd.f32 %v1345_v27, %v474_v42  ;;  %v9420_v29 = vld [vmem:[#allocation28_spill] sm:$0xff]  ;;  %v9421_v42 = vld [vmem:[#allocation133_spill] sm:$0xff]  ;;  %v9423_v2 = vld [vmem:[#allocation11_spill] sm:$0xff] }
 0x2ae   : > { %v6001_v56 = vadd.f32 %v1209_v54, %v9414_v26  ;;  %v6004_v50 = vadd.f32 %v1210_v19, %v9415_v52  ;;  %v6007_v53 = vadd.f32 %v1203_v43, %v9416_v37  ;;  %v1335_v59 = vmul.f32 %v5919_v38, %v1317_v16  ;;  %v6030_v43 = vld [vmem:[%s4093_s27 + $0x10] sm:$0xff]  ;;  %v9430_v26 = vld [vmem:[#allocation23_spill] sm:$0xff] }
 0x2af   : > { %v6011_v49 = vadd.f32 %v1204_v47, %v9417_v48  ;;  %v1397_v5 = vsel %vm1392_vm7, %v9418_v58, %v5698_v55  ;;  %v6017_v14 = vmin.f32 %v1549_v30, 6.0  ;;  %v1524_v54 = vadd.f32 %v1508_v60, %v1492_v34  ;;  %9422 = vst [vmem:[#allocation103_spill] sm:$0xff] %v6030_v43  ;;  %v9424_v47 = vld [vmem:[#allocation128_spill] sm:$0xff]  ;;  %v9432_v37 = vld [vmem:[#allocation3_spill] sm:$0xff] }
 0x2b0   : > { %v1340_v11 = vmul.f32 %v5830_v35, %v1322_v62  ;;  %v1341_v22 = vmul.f32 %v5919_v38, %v1323_v44  ;;  %v1313_v41 = vmul.f32 %v9413_v3, %v1271_v13  ;;  %v1449_v18 = vmul.f32 %v5982_v61, %v1397_v5  ;;  %v1415_v30 = vpop.permute.xlu1 %1414  ;;  %v9427_v62 = vld [vmem:[#allocation52_spill] sm:$0xff]  ;;  %v9428_v13 = vld [vmem:[#allocation43_spill] sm:$0xff] }
 0x2b1   : > { %9419 = vst [vmem:[#allocation83_spill] sm:$0xff] %v6017_v14  ;;  %v1330_v57 = vmul.f32 %v5830_v35, %v1312_v24  ;;  %v1350_v20 = vadd.f32 %v1334_v15, %v5501_v1  ;;  %v1266_v19 = vsel %vm1261_vm6, %v9421_v42, %v9420_v29  ;;  %v419_v36 = vmul.f32 %v6030_v43, %v9423_v2  ;;  %v9429_v15 = vld [vmem:[#allocation99_spill] sm:$0xff]  ;;  %v6064_v48 = vpop.permute.xlu2 %1438  ;;  %v9446_v43 = vld [vmem:[#allocation90_spill] sm:$0xff] }
 0x2b2   : > { %v6037_v9 = vmul.f32 %v9373_v12, %v1144_v23  ;;  %v1351_v16 = vadd.f32 %v1335_v59, %v5512_v6  ;;  %v1318_v1 = vmul.f32 %v5528_v28, %v1266_v19  ;;  %v1394_v27 = vsel %vm1392_vm7, %v9424_v47, %v5625_v39  ;;  %v9436_v19 = vld [vmem:[#allocation32_spill] sm:$0xff] }
 0x2b3   : > { %v1272_v60 = vsel %vm1261_vm6, %v4877_v25, %v9365_v46  ;;  %v1275_v12 = vsel %vm1261_vm6, %v9426_v7, %v9425_v45  ;;  %v1540_v6 = vmax.f32 %v1524_v54, 0.0  ;;  %v1443_v23 = vmul.f32 %v1415_v30, %v1394_v27  ;;  %v9431_v46 = vld [vmem:[#allocation140_spill] sm:$0xff]  ;;  %v9433_v54 = vld [vmem:[#allocation142_spill] sm:$0xff] }
 0x2b4   : > { %1709 = vrot.lane.b32.xlu2 %v6017_v14, %s3979_s12  ;;  %v1356_v44 = vadd.f32 %v1340_v11, %v9427_v62  ;;  %v1357_v3 = vadd.f32 %v1341_v22, %v9428_v13  ;;  %v6056_v24 = vmul.f32 %v5919_v38, %v1313_v41  ;;  %v1467_v34 = vmul.f32 %v9429_v15, %v1449_v18  ;;  %v9434_v41 = vld [vmem:[#allocation24_spill] sm:$0xff]  ;;  %v9438_v45 = vld [vmem:[#allocation134_spill] sm:$0xff] }
 0x2b5   : > { %v1346_v25 = vadd.f32 %v1330_v57, %v9430_v26  ;;  %v6061_v52 = vadd.f32 %v1350_v20, %v9431_v46  ;;  %v475_v59 = vadd.f32 %v9432_v37, %v419_v36  ;;  %v1461_v5 = vmul.f32 %v9429_v15, %v1443_v23  ;;  %v6079_v20 = vld [vmem:[%s4093_s27 + $0x60] sm:$0xff]  ;;  %v9437_v27 = vld [vmem:[#allocation64_spill] sm:$0xff]  ;;  %v9439_v23 = vld [vmem:[#allocation59_spill] sm:$0xff] }
 0x2b6   : > { %v1498_v11 = vadd.f32 %v1351_v16, %v9433_v54  ;;  %v6072_v22 = vsel %vm1261_vm6, %v9420_v29, %v9421_v42  ;;  %v6075_v18 = vmul.f32 %v9434_v41, %v1275_v12  ;;  %v1336_v57 = vmul.f32 %v5830_v35, %v1318_v1  ;;  %9435 = vst [vmem:[#allocation91_spill] sm:$0xff] %v6079_v20  ;;  %v9440_v42 = vld [vmem:[#allocation48_spill] sm:$0xff]  ;;  %v6095_v1 = vld [vmem:[%s4093_s27 + $0x68] sm:$0xff]  ;;  %v6102_v41 = vld [vmem:[%s4093_s27 + $0x18] sm:$0xff] }
 0x2b7   : > { %v429_v36 = vmul.f32 %v6079_v20, %v9436_v19  ;;  %v1400_v16 = vsel %vm1392_vm7, %v9438_v45, %v9437_v27  ;;  %v6087_v7 = vmin.f32 %v1540_v6, 6.0  ;;  %v1477_v29 = vadd.f32 %v1461_v5, %v9439_v23  ;;  %v9441_v62 = vld [vmem:[#allocation136_spill] sm:$0xff]  ;;  %9442 = vst [vmem:[#allocation65_spill] sm:$0xff] %v6095_v1  ;;  %v9443_v26 = vld [vmem:[#allocation75_spill] sm:$0xff]  ;;  %v9445_v23 = vld [vmem:[#allocation73_spill] sm:$0xff] }
 0x2b8   : > { %v1269_v12 = vsel %vm1261_vm6, %v9441_v62, %v9440_v42  ;;  %v430_v13 = vmul.f32 %v6095_v1, %v9436_v19  ;;  %v1483_v46 = vadd.f32 %v1467_v34, %v9443_v26  ;;  %v1455_v54 = vmul.f32 %v6064_v48, %v1400_v16  ;;  %9444 = vst [vmem:[#allocation80_spill] sm:$0xff] %v6102_v41  ;;  %v9447_v20 = vld [vmem:[#allocation45_spill] sm:$0xff]  ;;  %v9448_v19 = vld [vmem:[#allocation63_spill] sm:$0xff]  ;;  %v9449_v34 = vld [vmem:[#allocation38_spill] sm:$0xff] }
 0x2b9   : > { %v420_v6 = vmul.f32 %v6102_v41, %v9423_v2  ;;  %v1493_v5 = vadd.f32 %v1346_v25, %v475_v59  ;;  %v1324_v51 = vmul.f32 %v9445_v23, %v1269_v12  ;;  %v1509_v8 = vadd.f32 %v1477_v29, %v9446_v43  ;;  %v1423_v25 = vpop.permute.xlu1 %1422  ;;  %v9450_v59 = vld [vmem:[#allocation4_spill] sm:$0xff] }
 0x2ba   : > { %v1315_v14 = vmul.f32 %v9447_v20, %v1272_v60  ;;  %v1352_v1 = vadd.f32 %v1336_v57, %v9448_v19  ;;  %v1396_v16 = vsel %vm1392_vm7, %v9449_v34, %v5921_v63  ;;  %v1404_v2 = vsel %vm1392_vm7, %v5921_v63, %v9449_v34 }
 0x2bb   : > { %v485_v43 = vadd.f32 %v9450_v59, %v429_v36  ;;  %v1525_v29 = vadd.f32 %v1509_v8, %v1493_v5  ;;  %v1447_v12 = vmul.f32 %v1423_v25, %v1396_v16  ;;  %v1448_v26 = vmul.f32 %v1423_v25, %v1404_v2  ;;  %v9451_v5 = vld [vmem:[#allocation145_spill] sm:$0xff]  ;;  %v9455_v25 = vld [vmem:[#allocation67_spill] sm:$0xff] }
 0x2bc   : > { %1715 = vrot.lane.b32.xlu2 %v6087_v7, %s3979_s12  ;;  %v486_v60 = vadd.f32 %v9450_v59, %v430_v13  ;;  %v1402_v57 = vsel %vm1392_vm7, %v5625_v39, %v9424_v47  ;;  %v1515_v20 = vadd.f32 %v1483_v46, %v5926_v33  ;;  %v1473_v19 = vmul.f32 %v9429_v15, %v1455_v54  ;;  %v9452_v39 = vld [vmem:[#allocation70_spill] sm:$0xff]  ;;  %v9453_v47 = vld [vmem:[#allocation137_spill] sm:$0xff] }
 0x2bd   : > { %v1342_v41 = vmul.f32 %v5830_v35, %v1324_v51  ;;  %v1541_v63 = vmax.f32 %v1525_v29, 0.0  ;;  %v1465_v34 = vmul.f32 %v9429_v15, %v1447_v12  ;;  %v1466_v8 = vmul.f32 %v5912_v17, %v1448_v26  ;;  %v9454_v51 = vld [vmem:[#allocation44_spill] sm:$0xff]  ;;  %v9456_v12 = vld [vmem:[#allocation94_spill] sm:$0xff] }
 0x2be   : > { %v6132_v36 = vadd.f32 %v9432_v37, %v420_v6  ;;  %v1333_v13 = vmul.f32 %v5919_v38, %v1315_v14  ;;  %v1499_v16 = vadd.f32 %v1352_v1, %v9451_v5  ;;  %v1444_v2 = vmul.f32 %v1415_v30, %v1402_v57  ;;  %v9457_v26 = vld [vmem:[#allocation76_spill] sm:$0xff] }
 0x2bf   : > { %v1403_v33 = vsel %vm1392_vm7, %v9453_v47, %v9452_v39  ;;  %v6140_v46 = vmin.f32 %v1541_v63, 6.0  ;;  %v1481_v54 = vadd.f32 %v1465_v34, %v9454_v51  ;;  %v1482_v59 = vadd.f32 %v1466_v8, %v9455_v25  ;;  %v9458_v1 = vld [vmem:[#allocation56_spill] sm:$0xff]  ;;  %v9462_v39 = vld [vmem:[#allocation81_spill] sm:$0xff] }
 0x2c0   : > { %v1503_v29 = vadd.f32 %v1356_v44, %v485_v43  ;;  %v1446_v37 = vmul.f32 %v9456_v12, %v1403_v33  ;;  %v1531_v6 = vadd.f32 %v1515_v20, %v1499_v16  ;;  %v1489_v14 = vadd.f32 %v1473_v19, %v9457_v26  ;;  %v9459_v43 = vld [vmem:[#allocation57_spill] sm:$0xff]  ;;  %v9460_v34 = vld [vmem:[#allocation16_spill] sm:$0xff]  ;;  %v9466_v26 = vld [vmem:[#allocation79_spill] sm:$0xff] }
 0x2c1   : > { %v1504_v35 = vadd.f32 %v1357_v3, %v486_v60  ;;  %v1358_v30 = vadd.f32 %v1342_v41, %v9458_v1  ;;  %v1513_v57 = vadd.f32 %v1481_v54, %v6007_v53  ;;  %v1514_v5 = vadd.f32 %v1482_v59, %v6011_v49  ;;  %1701 = vrot.lane.b32.xlu1 %v6140_v46, %s3979_s12  ;;  %v1435_v3 = vpop.permute.xlu1 %1434  ;;  %v9463_v54 = vld [vmem:[#allocation148_spill] sm:$0xff] }
 0x2c2   : > { %v1405_v44 = vsel %vm1392_vm7, %v5698_v55, %v9418_v58  ;;  %v1399_v20 = vsel %vm1392_vm7, %v9459_v43, %v5976_v40  ;;  %v1407_v53 = vsel %vm1392_vm7, %v5976_v40, %v9459_v43  ;;  %v1462_v49 = vmul.f32 %v5912_v17, %v1444_v2  ;;  %v9461_v55 = vld [vmem:[#allocation96_spill] sm:$0xff] }
 0x2c3   : > { %v1529_v41 = vadd.f32 %v1513_v57, %v6061_v52  ;;  %v1530_v60 = vadd.f32 %v1514_v5, %v1498_v11  ;;  %v1453_v19 = vmul.f32 %v1435_v3, %v1399_v20  ;;  %v1454_v63 = vmul.f32 %v1435_v3, %v1407_v53  ;;  %v9464_v52 = vld [vmem:[#allocation87_spill] sm:$0xff]  ;;  %v9465_v11 = vld [vmem:[#allocation150_spill] sm:$0xff]  ;;  %v9469_v1 = vld [vmem:[#allocation84_spill] sm:$0xff] }
 0x2c4   : > { %v698_v58 = vmul.f32 %v9461_v55, %v9460_v34  ;;  %v1464_v8 = vmul.f32 %v5912_v17, %v1446_v37  ;;  %v1547_v16 = vmax.f32 %v1531_v6, 0.0  ;;  %v1521_v47 = vadd.f32 %v1489_v14, %v9462_v39 }
 0x2c5   : > { %v1545_v33 = vmax.f32 %v1529_v41, 0.0  ;;  %v1546_v51 = vmax.f32 %v1530_v60, 0.0  ;;  %v1471_v40 = vmul.f32 %v9429_v15, %v1453_v19  ;;  %v1472_v2 = vmul.f32 %v5912_v17, %v1454_v63  ;;  %v9470_v15 = vld [vmem:[#allocation61_spill] sm:$0xff]  ;;  %v9472_v60 = vld [vmem:[#allocation60_spill] sm:$0xff]  ;;  %v9473_v63 = vld [vmem:[#allocation14_spill] sm:$0xff] }
 0x2c6   : > { %v1505_v25 = vadd.f32 %v1358_v30, %v9463_v54  ;;  %v1406_v59 = vsel %vm1392_vm7, %v9465_v11, %v9464_v52  ;;  %v1450_v12 = vmul.f32 %v5982_v61, %v1405_v44  ;;  %v1478_v37 = vadd.f32 %v1462_v49, %v9466_v26  ;;  %v9471_v30 = vld [vmem:[#allocation69_spill] sm:$0xff]  ;;  %v9477_v54 = vld [vmem:[#allocation144_spill] sm:$0xff] }
 0x2c7   : > { %v6178_v6 = vmin.f32 %v1545_v33, 6.0  ;;  %v6180_v14 = vmin.f32 %v1546_v51, 6.0  ;;  %v1487_v57 = vadd.f32 %v1471_v40, %v9469_v1  ;;  %v1488_v5 = vadd.f32 %v1472_v2, %v9470_v15  ;;  %v9481_v1 = vld [vmem:[#allocation27_spill] sm:$0xff] }
 0x2c8   : > { %v716_v43 = vmul.f32 %v9397_v31, %v698_v58  ;;  %v1480_v20 = vadd.f32 %v1464_v8, %v9471_v30  ;;  %v6186_v53 = vmin.f32 %v1547_v16, 6.0  ;;  %v1537_v3 = vadd.f32 %v1521_v47, %v1505_v25 }
 0x2c9   : > { %9467 = vst [vmem:[#allocation97_spill] sm:$0xff] %v6178_v6  ;;  %v1319_v61 = vmul.f32 %v5528_v28, %v6072_v22  ;;  %v1519_v44 = vadd.f32 %v1487_v57, %v6001_v56  ;;  %v1520_v49 = vadd.f32 %v1488_v5, %v6004_v50  ;;  %1705 = vrot.lane.b32.xlu0 %v6178_v6, %s3979_s12  ;;  %v9474_v28 = vld [vmem:[#allocation46_spill] sm:$0xff]  ;;  %v9475_v50 = vld [vmem:[#allocation77_spill] sm:$0xff] }
 0x2ca   : > { %9468 = vst [vmem:[#allocation71_spill] sm:$0xff] %v6180_v14  ;;  %1721 = vrot.lane.b32.xlu2 %v6180_v14, %s3979_s12  ;;  %v1208_v41 = vmul.f32 %v5701_v0, %v6037_v9  ;;  %v1349_v19 = vadd.f32 %v1333_v13, %v9472_v60  ;;  %v1452_v34 = vmul.f32 %v9473_v63, %v1406_v59  ;;  %v9476_v9 = vld [vmem:[#allocation53_spill] sm:$0xff]  ;;  %v1553_v47 = vmax.f32 %v1537_v3, 0.0  ;;  %v9483_v57 = vld [vmem:[#allocation66_spill] sm:$0xff] }
 0x2cb   : > { %v1468_v55 = vmul.f32 %v5912_v17, %v1450_v12  ;;  %1707 = vrot.lane.b32.xlu1 %v6186_v53, %s3979_s12  ;;  %v1347_v56 = vadd.f32 %v6056_v24, %v9474_v28  ;;  %v1510_v22 = vadd.f32 %v1478_v37, %v9475_v50  ;;  %v1535_v58 = vadd.f32 %v1519_v44, %v1503_v29  ;;  %v9484_v5 = vld [vmem:[#allocation21_spill] sm:$0xff]  ;;  %v9493_v50 = vld [vmem:[#allocation156_spill] sm:$0xff] }
 0x2cc   : > { %v1536_v8 = vadd.f32 %v1520_v49, %v1504_v35  ;;  %v1339_v16 = vmul.f32 %v5919_v38, %v6075_v18  ;;  %v1093_v39 = vadd.f32 %v9476_v9, %v716_v43  ;;  %v1512_v13 = vadd.f32 %v1480_v20, %v5986_v21  ;;  %v9478_v18 = vld [vmem:[#allocation47_spill] sm:$0xff]  ;;  %v9486_v43 = vld [vmem:[#allocation41_spill] sm:$0xff] }
 0x2cd   : > { %v1494_v33 = vadd.f32 %v1347_v56, %v6132_v36  ;;  %v1337_v51 = vmul.f32 %v5919_v38, %v1319_v61  ;;  %v1551_v40 = vmax.f32 %v1535_v58, 0.0  ;;  %v1496_v24 = vadd.f32 %v1349_v19, %v9477_v54  ;;  %v9487_v20 = vld [vmem:[#allocation49_spill] sm:$0xff]  ;;  %v9488_v61 = vld [vmem:[#allocation55_spill] sm:$0xff] }
 0x2ce   : > { %v1552_v2 = vmax.f32 %v1536_v8, 0.0  ;;  %v1470_v25 = vmul.f32 %v5912_v17, %v1452_v34  ;;  %v1408_v35 = vsel %vm1392_vm7, %v9437_v27, %v9438_v45  ;;  %v1484_v29 = vadd.f32 %v1468_v55, %v9478_v18  ;;  %v9482_v27 = vld [vmem:[#allocation93_spill] sm:$0xff]  ;;  %v9491_v55 = vld [vmem:[#allocation139_spill] sm:$0xff] }
 0x2cf   : > { %v1456_v21 = vmul.f32 %v6064_v48, %v1408_v35  ;;  %v1526_v52 = vadd.f32 %v1510_v22, %v1494_v33  ;;  %v6220_v11 = vmin.f32 %v1551_v40, 6.0  ;;  %v1277_v59 = vsel %vm1261_vm6, %v9440_v42, %v9441_v62  ;;  %v9485_v62 = vld [vmem:[#allocation9_spill] sm:$0xff] }
 0x2d0   : > { %v6222_v36 = vmin.f32 %v1552_v2, 6.0  ;;  %v1486_v12 = vadd.f32 %v1470_v25, %v1093_v39  ;;  %v1528_v26 = vadd.f32 %v1512_v13, %v1496_v24  ;;  %v6228_v37 = vmin.f32 %v1553_v47, 6.0  ;;  %v9490_v49 = vld [vmem:[#allocation29_spill] sm:$0xff]  ;;  %v9496_v39 = vld [vmem:[#allocation78_spill] sm:$0xff] }
 0x2d1   : > { %9479 = vst [vmem:[#allocation102_spill] sm:$0xff] %v6220_v11  ;;  %v1222_v45 = vadd.f32 %v9482_v27, %v9481_v1  ;;  %v1353_v15 = vadd.f32 %v1337_v51, %v9483_v57  ;;  %v1325_v48 = vmul.f32 %v9445_v23, %v1277_v59  ;;  %1711 = vrot.lane.b32.xlu0 %v6220_v11, %s3979_s12  ;;  %v9489_v23 = vld [vmem:[#allocation50_spill] sm:$0xff]  ;;  %v1542_v34 = vmax.f32 %v1526_v52, 0.0  ;;  %v9492_v28 = vld [vmem:[#allocation5_spill] sm:$0xff]  ;;  %v6273_v1 = vld [vmem:[%s8675_s3 + $0x8] sm:$0xff] }
 0x2d2   : > { %9480 = vst [vmem:[#allocation85_spill] sm:$0xff] %v6222_v36  ;;  %1727 = vrot.lane.b32.xlu2 %v6222_v36, %s3979_s12  ;;  %v720_v42 = vmul.f32 %v9397_v31, %v9484_v5  ;;  %v817_v30 = vmul.f32 %v9486_v43, %v9485_v62  ;;  %v1224_v3 = vadd.f32 %v1208_v41, %v9487_v20  ;;  %v9494_v22 = vld [vmem:[#allocation149_spill] sm:$0xff]  ;;  %v1544_v8 = vmax.f32 %v1528_v26, 0.0  ;;  %v9497_v47 = vld [vmem:[#allocation146_spill] sm:$0xff]  ;;  %v9500_v27 = vld [vmem:[#allocation7_spill] sm:$0xff] }
 0x2d3   : > { %v1355_v44 = vadd.f32 %v1339_v16, %v9488_v61  ;;  %1713 = vrot.lane.b32.xlu1 %v6228_v37, %s3979_s12  ;;  %v950_v60 = vmul.f32 %v9490_v49, %v9489_v23  ;;  %v1516_v19 = vadd.f32 %v1484_v29, %v1222_v45  ;;  %v1474_v63 = vmul.f32 %v5912_v17, %v1456_v21  ;;  %v9495_v16 = vld [vmem:[#allocation62_spill] sm:$0xff]  ;;  %v9498_v17 = vld [vmem:[#allocation12_spill] sm:$0xff]  ;;  %v6264_v21 = vld [vmem:[%s4093_s27 + $0x78] sm:$0xff]  ;;  %v6309_v23 = vpop.permute.xlu2 %1599 }
 0x2d4   : > { %v484_v56 = vadd.f32 %v9492_v28, %v9491_v55  ;;  %v605_v58 = vmul.f32 %v9494_v22, %v9493_v50  ;;  %v1518_v41 = vadd.f32 %v1486_v12, %v1224_v3  ;;  %v1097_v9 = vadd.f32 %v9495_v16, %v720_v42  ;;  %v9499_v52 = vld [vmem:[#allocation6_spill] sm:$0xff]  ;;  %v6298_v61 = vld [vmem:[%s8675_s3 + $0x38] sm:$0xff]  ;;  %9501 = vst [vmem:[#allocation106_spill] sm:$0xff] %v6309_v23  ;;  %v6331_v55 = vld [vmem:[%s8675_s3 + $0x30] sm:$0xff]  ;;  %v6334_v28 = vpop.permute.xlu1 %1594 }
 0x2d5   : > { %v1212_v13 = vmul.f32 %v5701_v0, %v9496_v39  ;;  %v1500_v33 = vadd.f32 %v1353_v15, %v9497_v47  ;;  %v1343_v51 = vmul.f32 %v5919_v38, %v1325_v48  ;;  %v835_v40 = vmul.f32 %v9498_v17, %v817_v30  ;;  %v6286_v30 = vld [vmem:[%s8675_s3 + $0x20] sm:$0xff]  ;;  %9505 = vst [vmem:[#allocation111_spill] sm:$0xff] %v6334_v28  ;;  %v6378_v39 = vld [vmem:[%s8675_s3 + $0x10] sm:$0xff]  ;;  %v3919_v31 = vld [vmem:[%s4093_s27 + $0x58] sm:$0xff] }
 0x2d6   : > { %v1502_v2 = vadd.f32 %v1355_v44, %v484_v56  ;;  %v966_v54 = vadd.f32 %v950_v60, %v605_v58  ;;  %v1490_v25 = vadd.f32 %v1474_v63, %v1097_v9  ;;  %v6259_v35 = vmin.f32 %v1542_v34, 6.0  ;;  %v6306_v44 = vld [vmem:[%s8675_s3] sm:$0xff]  ;;  %v6318_v60 = vld [vmem:[%s8675_s3 + $0x18] sm:$0xff]  ;;  %v9504_v34 = vld [vmem:[#allocation83_spill] sm:$0xff] }
 0x2d7   : > { %v1532_v24 = vadd.f32 %v1516_v19, %v1500_v33  ;;  %v6261_v29 = vmin.f32 %v1544_v8, 6.0  ;;  %v432_v59 = vmul.f32 %v6264_v21, %v9499_v52  ;;  %v1228_v12 = vadd.f32 %v1212_v13, %v835_v40  ;;  %v3923_v28 = vld [vmem:[%s4093_s27 + $0x40] sm:$0xff] }
 0x2d8   : > { %v1534_v18 = vadd.f32 %v1518_v41, %v1502_v2  ;;  %v1359_v26 = vadd.f32 %v1343_v51, %v966_v54  ;;  %v9502_v19 = vmov 1   ;;  %v9515_v40 = vmov 2   ;;  %v6406_v54 = vld [vmem:[%s8675_s3 + $0x28] sm:$0xff]  ;;  %v3926_v23 = vld [vmem:[%s4093_s27 + $0x20] sm:$0xff] }
 0x2d9   : > { %1717 = vrot.lane.b32.xlu0 %v6259_v35, %s3979_s12  ;;  %v488_v45 = vadd.f32 %v9500_v27, %v432_v59  ;;  %v1548_v57 = vmax.f32 %v1532_v24, 0.0  ;;  %v1522_v15 = vadd.f32 %v1490_v25, %v1228_v12 }
 0x2da   : > { %1752 = vperm.xlu2 %3834, %v6273_v1   ;;  %v1550_v48 = vmax.f32 %v1534_v18, 0.0 }
 0x2db   : > { %1719 = vrot.lane.b32.xlu1 %v6261_v29, %s3979_s12  ;;  %v1506_v5 = vadd.f32 %v1359_v26, %v488_v45  ;;  %v6279_v42 = vmin.f32 %v1548_v57, 6.0  ;;  %v6322_v63 = vpop.permute.xlu2 %1609  ;;  %v3918_v57 = vld [vmem:[%s4093_s27 + $0x70] sm:$0xff] }
 0x2dc   : > { %v6281_v43 = vmin.f32 %v1550_v48, 6.0  ;;  %9503 = vst [vmem:[#allocation108_spill] sm:$0xff] %v6322_v63  ;;  %v6345_v50 = vpop.permute.xlu1 %1604 }
 0x2dd   : > { %v1538_v62 = vadd.f32 %v1522_v15, %v1506_v5  ;;  %9507 = vst [vmem:[#allocation88_spill] sm:$0xff] %v6345_v50  ;;  %v2800_v15 = vadd.f32 %v3918_v57, %v6264_v21  ;;  %v2776_v5 = vmax.f32 %v3918_v57, %v6264_v21 }
 0x2df   : > { %v1554_v20 = vmax.f32 %v1538_v62, 0.0 }
 0x2e1   : > { %1723 = vrot.lane.b32.xlu0 %v6279_v42, %s3979_s12  ;;  %v6293_v3 = vmin.f32 %v1554_v20, 6.0 }
 0x2e2   : > { %1764 = vperm.xlu2 %3834, %v6286_v30  }
 0x2e3   : > { %1725 = vrot.lane.b32.xlu1 %v6281_v43, %s3979_s12  ;;  %v6336_v56 = vpop.permute.xlu2 %1624 }
 0x2e4   : > { %9506 = vst [vmem:[#allocation105_spill] sm:$0xff] %v6336_v56  ;;  %v6355_v41 = vpop.permute.xlu1 %1619  ;;  %v3924_v56 = vld [vmem:[%s4093_s27 + $0x48] sm:$0xff] }
 0x2e5   : > { %9509 = vst [vmem:[#allocation101_spill] sm:$0xff] %v6355_v41  ;;  %v3922_v41 = vld [vmem:[%s4093_s27 + $0x38] sm:$0xff]  ;;  %v2767_v63 = vmax.f32 %v3923_v28, %v3924_v56 }
 0x2e9   : > { %1729 = vrot.lane.b32.xlu0 %v6293_v3, %s3979_s12 }
 0x2ea   : > { %1776 = vperm.xlu2 %3834, %v6298_v61  }
 0x2eb   : > { %1748 = vperm.xlu1 %3833, %v6306_v44   ;;  %v6353_v58 = vpop.permute.xlu2 %1655 }
 0x2ec   : > { %9508 = vst [vmem:[#allocation114_spill] sm:$0xff] %v6353_v58  ;;  %v6365_v16 = vpop.permute.xlu1 %1650 }
 0x2ed   : > { %9511 = vst [vmem:[#allocation117_spill] sm:$0xff] %v6365_v16 }
 0x2f1   : > { %1811 = vrot.lane.b32.xlu0 %v5955_v4, %s3980_s10 }
 0x2f2   : > { %1815 = vrot.lane.b32.xlu2 %v5944_v10, %s3980_s10 }
 0x2f3   : > { %1760 = vperm.xlu1 %3833, %v6318_v60   ;;  %3836 = vset.pattern.permute.xlu2 %v9502_v19  ;;  %v6363_v8 = vpop.permute.xlu2 %1665 }
 0x2f4   : > { %9510 = vst [vmem:[#allocation95_spill] sm:$0xff] %v6363_v8  ;;  %v6383_v13 = vpop.permute.xlu1 %1660 }
 0x2f5   : > { %9513 = vst [vmem:[#allocation115_spill] sm:$0xff] %v6383_v13 }
 0x2f9   : > { %1817 = vrot.lane.b32.xlu0 %v6178_v6, %s3980_s10 }
 0x2fa   : > { %1821 = vrot.lane.b32.xlu2 %v9504_v34, %s3980_s10 }
 0x2fb   : > { %1772 = vperm.xlu1 %3833, %v6331_v55   ;;  %v6372_v9 = vpop.permute.xlu2 %1680 }
 0x2fc   : > { %9512 = vst [vmem:[#allocation107_spill] sm:$0xff] %v6372_v9  ;;  %v6390_v33 = vpop.permute.xlu1 %1675 }
 0x2fd   : > { %9514 = vst [vmem:[#allocation86_spill] sm:$0xff] %v6390_v33  ;;  %v3920_v33 = vld [vmem:[%s4093_s27 + $0x50] sm:$0xff] }
 0x2fe   : > { %v2770_v16 = vmax.f32 %v3920_v33, %v3919_v31  ;;  %v2794_v57 = vadd.f32 %v3920_v33, %v3919_v31 }
 0x301   : > { %1823 = vrot.lane.b32.xlu0 %v6220_v11, %s3980_s10 }
 0x302   : > { %1827 = vrot.lane.b32.xlu2 %v6087_v7, %s3980_s10 }
 0x303   : > { %1813 = vrot.lane.b32.xlu1 %v6140_v46, %s3980_s10 }
 0x304   : > { %3835 = vset.pattern.permute.xlu1 %v9502_v19  ;;  %v9527_v19 = vld [vmem:[#allocation65_spill] sm:$0xff] }
 0x306   : > { %v6385_v47 = vpop.permute.xlu2 %1703 }
 0x309   : > { %1829 = vrot.lane.b32.xlu0 %v6259_v35, %s3980_s10 }
 0x30a   : > { %1833 = vrot.lane.b32.xlu2 %v6180_v14, %s3980_s10 }
 0x30b   : > { %1819 = vrot.lane.b32.xlu1 %v6186_v53, %s3980_s10 }
 0x30e   : > { %v6392_v51 = vpop.permute.xlu2 %1709 }
 0x311   : > { %1835 = vrot.lane.b32.xlu0 %v6279_v42, %s3980_s10 }
 0x312   : > { %1839 = vrot.lane.b32.xlu2 %v6222_v36, %s3980_s10 }
 0x313   : > { %1825 = vrot.lane.b32.xlu1 %v6228_v37, %s3980_s10 }
 0x316   : > { %v6409_v24 = vpop.permute.xlu2 %1715 }
 0x317   : > { %9517 = vst [vmem:[#allocation118_spill] sm:$0xff] %v6409_v24 }
 0x319   : > { %1841 = vrot.lane.b32.xlu0 %v6293_v3, %s3980_s10 }
 0x31a   : > { %1864 = vperm.xlu2 %3836, %v6273_v1  }
 0x31b   : > { %1831 = vrot.lane.b32.xlu1 %v6261_v29, %s3980_s10 }
 0x31c   : > { %v6411_v25 = vpop.permute.xlu0 %1699 }
 0x31d   : > { %9518 = vst [vmem:[#allocation89_spill] sm:$0xff] %v6411_v25 }
 0x321   : > { %1868 = vperm.xlu0 %3832, %v6378_v39  }
 0x322   : > { %1876 = vperm.xlu2 %3836, %v6286_v30  }
 0x323   : > { %1837 = vrot.lane.b32.xlu1 %v6281_v43, %s3980_s10 }
 0x324   : > { %v6417_v52 = vpop.permute.xlu2 %1721 }
 0x325   : > { %9520 = vst [vmem:[#allocation120_spill] sm:$0xff] %v6417_v52 }
 0x329   : > { %1888 = vperm.xlu0 %3832, %v6298_v61  }
 0x32a   : > { %1884 = vperm.xlu2 %3836, %v6331_v55  }
 0x32b   : > { %1860 = vperm.xlu1 %3835, %v6306_v44  }
 0x32c   : > { %v6426_v26 = vpop.permute.xlu2 %1727 }
 0x32d   : > { %9523 = vst [vmem:[#allocation92_spill] sm:$0xff] %v6426_v26  ;;  %v2791_v26 = vadd.f32 %v3924_v56, %v3923_v28 }
 0x331   : > { %1927 = vrot.lane.b32.xlu0 %v5944_v10, %s3982_s14 }
 0x332   : > { %1925 = vrot.lane.b32.xlu2 %v6140_v46, %s3982_s14  ;;  %3837 = vset.pattern.permute.xlu0 %v9515_v40 }
 0x333   : > { %1872 = vperm.xlu1 %3835, %v6318_v60   ;;  %3838 = vset.pattern.permute.xlu2 %v9515_v40  ;;  %v6401_v2 = vpop.permute.xlu1 %1701 }
 0x334   : > { %9516 = vst [vmem:[#allocation109_spill] sm:$0xff] %v6401_v2  ;;  %v6434_v48 = vpop.permute.xlu2 %1752 }
 0x335   : > { %9525 = vst [vmem:[#allocation110_spill] sm:$0xff] %v6434_v48 }
 0x33b   : > { %1880 = vperm.xlu1 %3835, %v6406_v54   ;;  %v6420_v59 = vpop.permute.xlu0 %1705 }
 0x33c   : > { %9521 = vst [vmem:[#allocation104_spill] sm:$0xff] %v6420_v59  ;;  %v6445_v9 = vpop.permute.xlu2 %1764 }
 0x33d   : > { %v6413_v18 = vpop.permute.xlu1 %1707  ;;  %9529 = vst [vmem:[#allocation126_spill] sm:$0xff] %v6445_v9 }
 0x33e   : > { %9519 = vst [vmem:[#allocation98_spill] sm:$0xff] %v6413_v18 }
 0x343   : > { %1923 = vrot.lane.b32.xlu1 %v5955_v4, %s3982_s14  ;;  %v6428_v27 = vpop.permute.xlu0 %1711 }
 0x344   : > { %3839 = vset.pattern.permute.xlu1 %v9515_v40  ;;  %9524 = vst [vmem:[#allocation124_spill] sm:$0xff] %v6428_v27  ;;  %v9528_v40 = vld [vmem:[#allocation91_spill] sm:$0xff]  ;;  %v6453_v50 = vpop.permute.xlu2 %1776 }
 0x345   : > { %v6422_v12 = vpop.permute.xlu1 %1713  ;;  %v2773_v13 = vmax.f32 %v9528_v40, %v9527_v19  ;;  %9532 = vst [vmem:[#allocation19_spill] sm:$0xff] %v6453_v50  ;;  %v2797_v31 = vadd.f32 %v9527_v19, %v9528_v40  ;;  %v9537_v50 = vld [vmem:[#allocation82_spill] sm:$0xff]  ;;  %v9540_v19 = vld [vmem:[#allocation80_spill] sm:$0xff]  ;;  %v9541_v40 = vld [vmem:[#allocation103_spill] sm:$0xff] }
 0x346   : > { %9522 = vst [vmem:[#allocation121_spill] sm:$0xff] %v6422_v12  ;;  %v2758_v18 = vmax.f32 %v9541_v40, %v9540_v19  ;;  %v2782_v28 = vadd.f32 %v9540_v19, %v9541_v40 }
 0x34b   : > { %1929 = vrot.lane.b32.xlu1 %v6178_v6, %s3982_s14  ;;  %v6437_v62 = vpop.permute.xlu0 %1717 }
 0x34c   : > { %9526 = vst [vmem:[#allocation8_spill] sm:$0xff] %v6437_v62  ;;  %v6465_v33 = vpop.permute.xlu2 %1815 }
 0x34d   : > { %v6430_v45 = vpop.permute.xlu1 %1719  ;;  %9535 = vst [vmem:[#allocation138_spill] sm:$0xff] %v6465_v33 }
 0x353   : > { %v6447_v21 = vpop.permute.xlu0 %1723 }
 0x354   : > { %9530 = vst [vmem:[#allocation112_spill] sm:$0xff] %v6447_v21 }
 0x355   : > { %v6439_v20 = vpop.permute.xlu1 %1725 }
 0x35b   : > { %2801 = vadd.xlane.f32.xlu2 %v2800_v15  ;;  %2777 = vmax.xlane.f32.xlu0 %v2776_v5  ;;  %v3921_v5 = vld [vmem:[%s4093_s27 + $0x30] sm:$0xff]  ;;  %v6455_v58 = vpop.permute.xlu0 %1729 }
 0x35c   : > { %v2788_v8 = vadd.f32 %v3922_v41, %v3921_v5  ;;  %9533 = vst [vmem:[#allocation135_spill] sm:$0xff] %v6455_v58  ;;  %v9538_v58 = vld [vmem:[#allocation100_spill] sm:$0xff] }
 0x35d   : > { %v6449_v15 = vpop.permute.xlu1 %1748  ;;  %v2779_v27 = vadd.f32 %v9538_v58, %v9537_v50 }
 0x35e   : > { %9531 = vst [vmem:[#allocation129_spill] sm:$0xff] %v6449_v15 }
 0x363   : > { %2774 = vmax.xlane.f32.xlu2 %v2773_v13  ;;  %2771 = vmax.xlane.f32.xlu0 %v2770_v16  ;;  %v3925_v13 = vld [vmem:[%s4093_s27 + $0x28] sm:$0xff] }
 0x364   : > { %v2761_v12 = vmax.f32 %v3926_v23, %v3925_v13 }
 0x365   : > { %v6463_v16 = vpop.permute.xlu1 %1760 }
 0x366   : > { %9534 = vst [vmem:[#allocation116_spill] sm:$0xff] %v6463_v16 }
 0x36b   : > { %2795 = vadd.xlane.f32.xlu2 %v2794_v57  ;;  %2789 = vadd.xlane.f32.xlu0 %v2788_v8  ;;  %v2785_v57 = vadd.f32 %v3926_v23, %v3925_v13  ;;  %v6467_v8 = vpop.permute.xlu0 %1811 }
 0x36c   : > { %9536 = vst [vmem:[#allocation154_spill] sm:$0xff] %v6467_v8 }
 0x36d   : > { %v6471_v9 = vpop.permute.xlu1 %1772 }
 0x36e   : > { %9539 = vst [vmem:[#allocation31_spill] sm:$0xff] %v6471_v9 }
 0x373   : > { %2768 = vmax.xlane.f32.xlu2 %v2767_v63  ;;  %2762 = vmax.xlane.f32.xlu0 %v2761_v12  ;;  %v6475_v63 = vpop.permute.xlu2 %1821  ;;  %v2764_v12 = vmax.f32 %v3921_v5, %v3922_v41  ;;  %v2755_v41 = vmax.f32 %v9537_v50, %v9538_v58 }
 0x374   : > { %9542 = vst [vmem:[#allocation25_spill] sm:$0xff] %v6475_v63 }
 0x375   : > { %2798 = vadd.xlane.f32.xlu1 %v2797_v31  ;;  %v6477_v31 = vpop.permute.xlu0 %1817  ;;  %v6479_v23 = vpop.permute.xlu1 %1813 }
 0x376   : > { %9543 = vst [vmem:[#allocation35_spill] sm:$0xff] %v6477_v31 }
 0x377   : > { %9544 = vst [vmem:[#allocation153_spill] sm:$0xff] %v6479_v23 }
 0x37b   : > { %2786 = vadd.xlane.f32.xlu2 %v2785_v57  ;;  %2780 = vadd.xlane.f32.xlu0 %v2779_v27  ;;  %v6483_v56 = vpop.permute.xlu2 %1827 }
 0x37c   : > { %9545 = vst [vmem:[#allocation18_spill] sm:$0xff] %v6483_v56 }
 0x37d   : > { %2792 = vadd.xlane.f32.xlu1 %v2791_v26  ;;  %v6485_v13 = vpop.permute.xlu0 %1823  ;;  %v6487_v26 = vpop.permute.xlu1 %1819 }
 0x37e   : > { %9546 = vst [vmem:[#allocation127_spill] sm:$0xff] %v6485_v13 }
 0x37f   : > { %9547 = vst [vmem:[#allocation2_spill] sm:$0xff] %v6487_v26 }
 0x383   : > { %2759 = vmax.xlane.f32.xlu2 %v2758_v18  ;;  %v6493_v18 = vpop.permute.xlu2 %1833 }
 0x384   : > { %9548 = vst [vmem:[#allocation39_spill] sm:$0xff] %v6493_v18 }
 0x385   : > { %2765 = vmax.xlane.f32.xlu1 %v2764_v12  ;;  %v6495_v27 = vpop.permute.xlu0 %1829  ;;  %v6499_v5 = vpop.permute.xlu1 %1825 }
 0x386   : > { %9549 = vst [vmem:[#allocation51_spill] sm:$0xff] %v6495_v27 }
 0x387   : > { %9550 = vst [vmem:[#allocation143_spill] sm:$0xff] %v6499_v5 }
 0x38b   : > { %v6503_v57 = vpop.permute.xlu2 %1839 }
 0x38c   : > { %9551 = vst [vmem:[#allocation33_spill] sm:$0xff] %v6503_v57 }
 0x38d   : > { %2783 = vadd.xlane.f32.xlu1 %v2782_v28  ;;  %v6505_v19 = vpop.permute.xlu0 %1835  ;;  %v6511_v50 = vpop.permute.xlu1 %1831 }
 0x38e   : > { %9552 = vst [vmem:[#allocation141_spill] sm:$0xff] %v6505_v19 }
 0x38f   : > { %1933 = vrot.lane.b32.xlu0 %v9504_v34, %s3982_s14  ;;  %9553 = vst [vmem:[#allocation132_spill] sm:$0xff] %v6511_v50 }
 0x393   : > { %v6513_v58 = vpop.permute.xlu2 %1864 }
 0x394   : > { %9554 = vst [vmem:[#allocation40_spill] sm:$0xff] %v6513_v58 }
 0x395   : > { %2756 = vmax.xlane.f32.xlu1 %v2755_v41  ;;  %v6517_v40 = vpop.permute.xlu0 %1841  ;;  %v6521_v12 = vpop.permute.xlu1 %1837 }
 0x396   : > { %9555 = vst [vmem:[#allocation119_spill] sm:$0xff] %v6517_v40 }
 0x397   : > { %1937 = vrot.lane.b32.xlu0 %v6228_v37, %s3982_s14  ;;  %9556 = vst [vmem:[#allocation151_spill] sm:$0xff] %v6521_v12 }
 0x39b   : > { %1931 = vrot.lane.b32.xlu2 %v6186_v53, %s3982_s14  ;;  %v6526_v28 = vpop.permute.xlu2 %1876 }
 0x39c   : > { %9557 = vst [vmem:[#allocation122_spill] sm:$0xff] %v6526_v28 }
 0x39d   : > { %v6530_v41 = vpop.permute.xlu0 %1868  ;;  %v6534_v63 = vpop.permute.xlu1 %1860 }
 0x39e   : > { %9558 = vst [vmem:[#allocation15_spill] sm:$0xff] %v6530_v41  ;;  %v9562_v41 = vmov 3  }
 0x39f   : > { %1943 = vrot.lane.b32.xlu0 %v6261_v29, %s3982_s14  ;;  %9559 = vst [vmem:[#allocation17_spill] sm:$0xff] %v6534_v63 }
 0x3a3   : > { %1939 = vrot.lane.b32.xlu2 %v6087_v7, %s3982_s14  ;;  %v6538_v12 = vpop.permute.xlu2 %1884 }
 0x3a4   : > { %9560 = vst [vmem:[#allocation10_spill] sm:$0xff] %v6538_v12 }
 0x3a5   : > { %v6540_v5 = vpop.permute.xlu0 %1888  ;;  %v6547_v40 = vpop.permute.xlu1 %1872 }
 0x3a6   : > { %9561 = vst [vmem:[#allocation130_spill] sm:$0xff] %v6540_v5 }
 0x3a7   : > { %1949 = vrot.lane.b32.xlu0 %v6281_v43, %s3982_s14  ;;  %9563 = vst [vmem:[#allocation36_spill] sm:$0xff] %v6547_v40 }
 0x3ab   : > { %1945 = vrot.lane.b32.xlu2 %v6180_v14, %s3982_s14  ;;  %v6550_v63 = vpop.permute.xlu2 %1925 }
 0x3ac   : > { %9564 = vst [vmem:[#allocation125_spill] sm:$0xff] %v6550_v63 }
 0x3ad   : > { %v6554_v33 = vpop.permute.xlu0 %1927  ;;  %v6559_v5 = vpop.permute.xlu1 %1880 }
 0x3ae   : > { %1935 = vrot.lane.b32.xlu1 %v6220_v11, %s3982_s14  ;;  %9565 = vst [vmem:[#allocation123_spill] sm:$0xff] %v6559_v5 }
 0x3af   : > { %1972 = vperm.xlu0 %3837, %v6306_v44  }
 0x3b3   : > { %1951 = vrot.lane.b32.xlu2 %v6222_v36, %s3982_s14 }
 0x3b5   : > { %v6568_v12 = vpop.permute.xlu1 %1923 }
 0x3b6   : > { %1941 = vrot.lane.b32.xlu1 %v6259_v35, %s3982_s14 }
 0x3b7   : > { %1992 = vperm.xlu0 %3837, %v6406_v54  }
 0x3bb   : > { %1976 = vperm.xlu2 %3838, %v6273_v1  }
 0x3be   : > { %1947 = vrot.lane.b32.xlu1 %v6279_v42, %s3982_s14 }
 0x3bf   : > { %2035 = vrot.lane.b32.xlu0 %v5955_v4, %s3984_s15 }
 0x3c0   : > { %3842 = vset.pattern.permute.xlu0 %v9562_v41 }
 0x3c3   : > { %1984 = vperm.xlu2 %3838, %v6318_v60  }
 0x3c6   : > { %1953 = vrot.lane.b32.xlu1 %v6293_v3, %s3982_s14  ;;  %s8633_s14 = scalar_lea.vmem %s8681_s9, %s3777_s24 }
 0x3c7   : > { %2041 = vrot.lane.b32.xlu0 %v6178_v6, %s3984_s15 }
 0x3cb   : > { %1996 = vperm.xlu2 %3838, %v6331_v55  }
 0x3ce   : > { %1980 = vperm.xlu1 %3839, %v6378_v39   ;;  %v2802_v50 = vpop.xlane.xlu2 %2801  ;;  %v2778_v63 = vpop.xlane.xlu0 %2777 }
 0x3cf   : > { %v2810_v40 = vmul.f32 0.00390625, %v2802_v50  ;;  %2047 = vrot.lane.b32.xlu0 %v6220_v11, %s3984_s15 }
 0x3d1   : > { %v2819_v28 = vsel %vm2811_vm8, %v2778_v63, %v2810_v40  ;;  %v6576_v40 = vpop.permute.xlu1 %1929 }
 0x3d2   : > { %2833 = vmatpush.msra.mxu0 %v2819_v28  ;;  %9566 = vst [vmem:[#allocation30_spill] sm:$0xff] %v6576_v40 }
 0x3d3   : > { %2037 = vrot.lane.b32.xlu2 %v6140_v46, %s3984_s15 }
 0x3d4   : > { %3840 = vset.pattern.permute.xlu2 %v9562_v41 }
 0x3d6   : > { %1988 = vperm.xlu1 %3839, %v6286_v30   ;;  %v2775_v5 = vpop.xlane.xlu2 %2774  ;;  %v2772_v50 = vpop.xlane.xlu0 %2771 }
 0x3d7   : > { %2053 = vrot.lane.b32.xlu0 %v6259_v35, %s3984_s15 }
 0x3db   : > { %2043 = vrot.lane.b32.xlu2 %v6186_v53, %s3984_s15 }
 0x3de   : > { %2000 = vperm.xlu1 %3839, %v6298_v61   ;;  %v2796_v63 = vpop.xlane.xlu2 %2795  ;;  %v2790_v28 = vpop.xlane.xlu0 %2789 }
 0x3df   : > { %2059 = vrot.lane.b32.xlu0 %v6279_v42, %s3984_s15  ;;  %v2808_v57 = vmul.f32 0.00390625, %v2796_v63 }
 0x3e1   : > { %v2817_v26 = vsel %vm2811_vm8, %v2772_v50, %v2808_v57 }
 0x3e3   : > { %2049 = vrot.lane.b32.xlu2 %v6228_v37, %s3984_s15 }
 0x3e6   : > { %2039 = vrot.lane.b32.xlu1 %v5944_v10, %s3984_s15  ;;  %v2769_v13 = vpop.xlane.xlu2 %2768  ;;  %v2763_v63 = vpop.xlane.xlu0 %2762 }
 0x3e7   : > { %3841 = vset.pattern.permute.xlu1 %v9562_v41  ;;  %2065 = vrot.lane.b32.xlu0 %v6293_v3, %s3984_s15 }
 0x3e8   : > { %v2799_v31 = vpop.xlane.xlu1 %2798 }
 0x3e9   : > { %v2809_v18 = vmul.f32 0.00390625, %v2799_v31 }
 0x3eb   : > { %2055 = vrot.lane.b32.xlu2 %v6261_v29, %s3984_s15  ;;  %v2818_v40 = vsel %vm2811_vm8, %v2775_v5, %v2809_v18  ;;  %v2806_v18 = vmul.f32 0.00390625, %v2790_v28  ;;  %v9567_v28 = vmov 5  }
 0x3ec   : > { %2834 = vmatpush.msra.mxu0 %v2818_v40 }
 0x3ee   : > { %2045 = vrot.lane.b32.xlu1 %v9504_v34, %s3984_s15  ;;  %v2787_v19 = vpop.xlane.xlu2 %2786  ;;  %2835 = vmatpush.msra.mxu0 %v2817_v26  ;;  %v2781_v26 = vpop.xlane.xlu0 %2780 }
 0x3ef   : > { %2092 = vperm.xlu0 %3842, %v6378_v39   ;;  %v2805_v5 = vmul.f32 0.00390625, %v2787_v19 }
 0x3f0   : > { %v2793_v41 = vpop.xlane.xlu1 %2792 }
 0x3f1   : > { %v2807_v8 = vmul.f32 0.00390625, %v2793_v41  ;;  %v2814_v41 = vsel %vm2811_vm8, %v2763_v63, %v2805_v5 }
 0x3f3   : > { %2061 = vrot.lane.b32.xlu2 %v6281_v43, %s3984_s15  ;;  %v2816_v31 = vsel %vm2811_vm8, %v2769_v13, %v2807_v8 }
 0x3f4   : > { %2836 = vmatpush.msra.mxu0 %v2816_v31 }
 0x3f6   : > { %2051 = vrot.lane.b32.xlu1 %v6087_v7, %s3984_s15  ;;  %v2760_v57 = vpop.xlane.xlu2 %2759 }
 0x3f7   : > { %2112 = vperm.xlu0 %3842, %v6298_v61  }
 0x3f8   : > { %v2766_v50 = vpop.xlane.xlu1 %2765 }
 0x3f9   : > { %v2815_v40 = vsel %vm2811_vm8, %v2766_v50, %v2806_v18  ;;  %v2803_v18 = vmul.f32 0.00390625, %v2781_v26 }
 0x3fa   : > { %2837 = vmatpush.msra.mxu0 %v2815_v40  ;;  %v2820_v40 = vld [vmem:[%s8677_s5] sm:$0xf] }
 0x3fb   : > { %2084 = vperm.xlu2 %3840, %v6306_v44  }
 0x3fc   : > { %2838 = vmatpush.msra.mxu0 %v2814_v41 }
 0x3fe   : > { %2057 = vrot.lane.b32.xlu1 %v6180_v14, %s3984_s15  ;;  %v6605_v8 = vpop.permute.xlu2 %1931 }
 0x3ff   : > { %2167 = vrot.lane.b32.xlu0 %v5944_v10, %s3986_s16 }
 0x400   : > { %v2784_v13 = vpop.xlane.xlu1 %2783  ;;  %3844 = vset.pattern.permute.xlu0 %v9567_v28 }
 0x401   : > { %v2804_v19 = vmul.f32 0.00390625, %v2784_v13  ;;  %v1934_v31 = vpop.permute.xlu0 %1933 }
 0x403   : > { %2096 = vperm.xlu2 %3840, %v6318_v60   ;;  %v2813_v63 = vsel %vm2811_vm8, %v2760_v57, %v2804_v19 }
 0x404   : > { %2839 = vmatpush.msra.mxu0 %v2813_v63 }
 0x406   : > { %2063 = vrot.lane.b32.xlu1 %v6222_v36, %s3984_s15  ;;  %v6614_v5 = vpop.permute.xlu2 %1939 }
 0x407   : > { %2173 = vrot.lane.b32.xlu0 %v9504_v34, %s3986_s16 }
 0x408   : > { %v2757_v50 = vpop.xlane.xlu1 %2756 }
 0x409   : > { %v2812_v41 = vsel %vm2811_vm8, %v2757_v50, %v2803_v18  ;;  %v6622_v57 = vpop.permute.xlu0 %1937 }
 0x40a   : > { %2840 = vmatpush.msra.mxu0 %v2812_v41  ;;  %9568 = vst [vmem:[#allocation13_spill] sm:$0xff] %v6622_v57 }
 0x40b   : > { %3755 = vmatmul.msk.f32.vlgmr.msra.gmra.mxu0 %vm2821_vm9, %v2820_v40  ;;  %2104 = vperm.xlu2 %3840, %v6406_v54  }
 0x40e   : > { %2088 = vperm.xlu1 %3841, %v6273_v1   ;;  %v6626_v26 = vpop.permute.xlu2 %1945 }
 0x40f   : > { %9569 = vst [vmem:[#allocation42_spill] sm:$0xff] %v6626_v26  ;;  %2179 = vrot.lane.b32.xlu0 %v6087_v7, %s3986_s16 }
 0x411   : > { %v6630_v13 = vpop.permute.xlu0 %1943 }
 0x413   : > { %2163 = vrot.lane.b32.xlu2 %v5955_v4, %s3986_s16 }
 0x414   : > { %3845 = vset.pattern.permute.xlu2 %v9567_v28 }
 0x416   : > { %2100 = vperm.xlu1 %3841, %v6286_v30   ;;  %v6636_v19 = vpop.permute.xlu2 %1951 }
 0x417   : > { %9570 = vst [vmem:[#allocation34_spill] sm:$0xff] %v6636_v19  ;;  %2185 = vrot.lane.b32.xlu0 %v6180_v14, %s3986_s16 }
 0x419   : > { %v1950_v63 = vpop.permute.xlu0 %1949 }
 0x41a   : > { %v1968_v56 = vsel %vm753_vm2, %v1950_v63, %v1934_v31 }
 0x41b   : > { %2169 = vrot.lane.b32.xlu2 %v6178_v6, %s3986_s16 }
 0x41e   : > { %2108 = vperm.xlu1 %3841, %v6331_v55   ;;  %v6643_v18 = vpop.permute.xlu2 %1976 }
 0x41f   : > { %9571 = vst [vmem:[#allocation131_spill] sm:$0xff] %v6643_v18  ;;  %2191 = vrot.lane.b32.xlu0 %v6222_v36, %s3986_s16  ;;  %v1960_v18 = vsel %vm753_vm2, %v1934_v31, %v1950_v63  ;;  %v9579_v63 = vmov 0  }
 0x420   : > { %v6645_v50 = vpop.permute.xlu1 %1935 }
 0x421   : > { %9572 = vst [vmem:[#allocation28_spill] sm:$0xff] %v6645_v50  ;;  %v6649_v40 = vpop.permute.xlu0 %1972 }
 0x423   : > { %2175 = vrot.lane.b32.xlu2 %v6220_v11, %s3986_s16 }
 0x426   : > { %2165 = vrot.lane.b32.xlu1 %v6140_v46, %s3986_s16  ;;  %v6655_v41 = vpop.permute.xlu2 %1984 }
 0x427   : > { %9573 = vst [vmem:[#allocation133_spill] sm:$0xff] %v6655_v41  ;;  %3843 = vset.pattern.permute.xlu1 %v9567_v28  ;;  %2216 = vperm.xlu0 %3844, %v6273_v1  }
 0x428   : > { %v6658_v26 = vpop.permute.xlu1 %1941 }
 0x429   : > { %9574 = vst [vmem:[#allocation11_spill] sm:$0xff] %v6658_v26  ;;  %v1993_v58 = vpop.permute.xlu0 %1992  ;;  %v1584_v26 = vld [vmem:[%s8676_s4 + $0x28] sm:$0xff] }
 0x42a   : > { %v6665_v23 = vmul.f32 %v1993_v58, %v1968_v56  ;;  %v6667_v27 = vmul.f32 %v1993_v58, %v1960_v18  ;;  %v1579_v58 = vld [vmem:[%s8676_s4] sm:$0xff] }
 0x42b   : > { %2181 = vrot.lane.b32.xlu2 %v6259_v35, %s3986_s16 }
 0x42c   : > { %9575 = vst [vmem:[#allocation128_spill] sm:$0xff] %v6665_v23 }
 0x42d   : > { %9576 = vst [vmem:[#allocation113_spill] sm:$0xff] %v6667_v27 }
 0x42e   : > { %2171 = vrot.lane.b32.xlu1 %v6186_v53, %s3986_s16  ;;  %v6673_v28 = vpop.permute.xlu2 %1996 }
 0x42f   : > { %9577 = vst [vmem:[#allocation152_spill] sm:$0xff] %v6673_v28  ;;  %2236 = vperm.xlu0 %3844, %v6331_v55  }
 0x430   : > { %v6675_v1 = vpop.permute.xlu1 %1947 }
 0x431   : > { %v2036_v41 = vpop.permute.xlu0 %2035 }
 0x433   : > { %2187 = vrot.lane.b32.xlu2 %v6279_v42, %s3986_s16 }
 0x436   : > { %2177 = vrot.lane.b32.xlu1 %v6228_v37, %s3986_s16  ;;  %v2038_v56 = vpop.permute.xlu2 %2037 }
 0x437   : > { %3846 = vset.pattern.permute.xlu0 %v9579_v63 }
 0x438   : > { %v6685_v31 = vpop.permute.xlu1 %1953  ;;  %1645 = vperm.xlu0 %3846, %v1579_v58  }
 0x439   : > { %9578 = vst [vmem:[#allocation52_spill] sm:$0xff] %v6685_v31  ;;  %v6688_v18 = vpop.permute.xlu0 %2041 }
 0x43b   : > { %2193 = vrot.lane.b32.xlu2 %v6293_v3, %s3986_s16 }
 0x43e   : > { %2183 = vrot.lane.b32.xlu1 %v6261_v29, %s3986_s16  ;;  %v2044_v55 = vpop.permute.xlu2 %2043 }
 0x440   : > { %v6697_v9 = vpop.permute.xlu1 %1980  ;;  %1670 = vperm.xlu0 %3846, %v1584_v26  }
 0x441   : > { %v6699_v21 = vpop.permute.xlu0 %2047 }
 0x443   : > { %2220 = vperm.xlu2 %3845, %v6378_v39  }
 0x446   : > { %2189 = vrot.lane.b32.xlu1 %v6281_v43, %s3986_s16  ;;  %v2050_v58 = vpop.permute.xlu2 %2049 }
 0x448   : > { %v6704_v48 = vpop.permute.xlu1 %1988  ;;  %1756 = vperm.xlu0 %3846, %v6378_v39  }
 0x449   : > { %9580 = vst [vmem:[#allocation43_spill] sm:$0xff] %v6704_v48  ;;  %v2054_v2 = vpop.permute.xlu0 %2053 }
 0x44a   : > { %v6709_v62 = vsel %vm868_vm3, %v2038_v56, %v2054_v2  ;;  %v2076_v26 = vsel %vm868_vm3, %v2054_v2, %v2038_v56 }
 0x44b   : > { %2228 = vperm.xlu2 %3845, %v6286_v30  }
 0x44e   : > { %2212 = vperm.xlu1 %3843, %v6306_v44   ;;  %v2056_v16 = vpop.permute.xlu2 %2055 }
 0x450   : > { %v6715_v38 = vpop.permute.xlu1 %2000  ;;  %1768 = vperm.xlu0 %3846, %v6406_v54  }
 0x451   : > { %9581 = vst [vmem:[#allocation99_spill] sm:$0xff] %v6715_v38  ;;  %v2060_v59 = vpop.permute.xlu0 %2059 }
 0x452   : > { %v6720_v52 = vsel %vm868_vm3, %v2044_v55, %v2060_v59  ;;  %v6724_v15 = vsel %vm868_vm3, %v2060_v59, %v2044_v55  ;;  %v9582_v55 = vmov 6  }
 0x453   : > { %2240 = vperm.xlu2 %3845, %v6298_v61  }
 0x456   : > { %2224 = vperm.xlu1 %3843, %v6318_v60   ;;  %v2062_v30 = vpop.permute.xlu2 %2061 }
 0x458   : > { %v2040_v2 = vpop.permute.xlu1 %2039  ;;  %2293 = vrot.lane.b32.xlu0 %v6140_v46, %s3988_s18 }
 0x459   : > { %v2069_v56 = vsel %vm868_vm3, %v2040_v2, %v2056_v16  ;;  %v2077_v25 = vsel %vm868_vm3, %v2056_v16, %v2040_v2  ;;  %v2066_v24 = vpop.permute.xlu0 %2065 }
 0x45a   : > { %v2074_v59 = vsel %vm868_vm3, %v2050_v58, %v2066_v24  ;;  %v2082_v61 = vsel %vm868_vm3, %v2066_v24, %v2050_v58 }
 0x45b   : > { %2295 = vrot.lane.b32.xlu2 %v5944_v10, %s3988_s18 }
 0x45c   : > { %3848 = vset.pattern.permute.xlu2 %v9582_v55 }
 0x45e   : > { %2232 = vperm.xlu1 %3843, %v6406_v54   ;;  %v2085_v28 = vpop.permute.xlu2 %2084 }
 0x460   : > { %v2046_v50 = vpop.permute.xlu1 %2045  ;;  %2299 = vrot.lane.b32.xlu0 %v6186_v53, %s3988_s18 }
 0x461   : > { %v2072_v16 = vsel %vm868_vm3, %v2046_v50, %v2062_v30  ;;  %v2080_v2 = vsel %vm868_vm3, %v2062_v30, %v2046_v50  ;;  %v2093_v19 = vpop.permute.xlu0 %2092 }
 0x462   : > { %v6748_v24 = vmul.f32 %v2093_v19, %v2077_v25  ;;  %v6750_v58 = vmul.f32 %v2093_v19, %v2069_v56 }
 0x463   : > { %2301 = vrot.lane.b32.xlu2 %v9504_v34, %s3988_s18 }
 0x466   : > { %2291 = vrot.lane.b32.xlu1 %v5955_v4, %s3988_s18  ;;  %v2097_v54 = vpop.permute.xlu2 %2096 }
 0x467   : > { %3847 = vset.pattern.permute.xlu1 %v9582_v55 }
 0x468   : > { %v2052_v27 = vpop.permute.xlu1 %2051  ;;  %2305 = vrot.lane.b32.xlu0 %v6228_v37, %s3988_s18 }
 0x469   : > { %v2067_v50 = vsel %vm868_vm3, %v2036_v41, %v2052_v27  ;;  %v2075_v30 = vsel %vm868_vm3, %v2052_v27, %v2036_v41  ;;  %v2113_v56 = vpop.permute.xlu0 %2112 }
 0x46a   : > { %v6763_v25 = vmul.f32 %v2085_v28, %v2075_v30  ;;  %v6765_v19 = vmul.f32 %v2085_v28, %v2067_v50  ;;  %v6767_v23 = vmul.f32 %v2113_v56, %v2082_v61  ;;  %v6769_v38 = vmul.f32 %v2113_v56, %v2074_v59 }
 0x46b   : > { %2307 = vrot.lane.b32.xlu2 %v6087_v7, %s3988_s18 }
 0x46c   : > { %9583 = vst [vmem:[#allocation23_spill] sm:$0xff] %v6763_v25 }
 0x46d   : > { %9584 = vst [vmem:[#allocation140_spill] sm:$0xff] %v6765_v19 }
 0x46e   : > { %9585 = vst [vmem:[#allocation3_spill] sm:$0xff] %v6767_v23  ;;  %2297 = vrot.lane.b32.xlu1 %v6178_v6, %s3988_s18  ;;  %v2105_v31 = vpop.permute.xlu2 %2104 }
 0x46f   : > { %9586 = vst [vmem:[#allocation142_spill] sm:$0xff] %v6769_v38  ;;  %v6775_v27 = vmul.f32 %v2105_v31, %v2080_v2  ;;  %v6777_v41 = vmul.f32 %v2105_v31, %v2072_v16 }
 0x470   : > { %v2058_v30 = vpop.permute.xlu1 %2057 }
 0x471   : > { %v2070_v28 = vsel %vm868_vm3, %v6688_v18, %v2058_v30  ;;  %v2078_v59 = vsel %vm868_vm3, %v2058_v30, %v6688_v18  ;;  %v6789_v56 = vpop.permute.xlu0 %2167 }
 0x472   : > { %v6785_v61 = vmul.f32 %v2097_v54, %v2078_v59  ;;  %v6787_v50 = vmul.f32 %v2097_v54, %v2070_v28 }
 0x474   : > { %9587 = vst [vmem:[#allocation24_spill] sm:$0xff] %v6785_v61 }
 0x475   : > { %9588 = vst [vmem:[#allocation32_spill] sm:$0xff] %v6787_v50 }
 0x476   : > { %2303 = vrot.lane.b32.xlu1 %v6220_v11, %s3988_s18  ;;  %v2164_v31 = vpop.permute.xlu2 %2163 }
 0x478   : > { %v2064_v16 = vpop.permute.xlu1 %2063 }
 0x479   : > { %v2073_v2 = vsel %vm868_vm3, %v6699_v21, %v2064_v16  ;;  %v2081_v38 = vsel %vm868_vm3, %v2064_v16, %v6699_v21  ;;  %v6799_v18 = vpop.permute.xlu0 %2173 }
 0x47e   : > { %v2170_v30 = vpop.permute.xlu2 %2169 }
 0x480   : > { %v2089_v54 = vpop.permute.xlu1 %2088 }
 0x481   : > { %v6801_v28 = vmul.f32 %v2089_v54, %v2076_v26  ;;  %v6804_v59 = vmul.f32 %v2089_v54, %v6709_v62  ;;  %v2180_v23 = vpop.permute.xlu0 %2179  ;;  %v2846_v54 = vld [vmem:[%s8678_s6] sm:$0xff] }
 0x482   : > { %v6808_v50 = vsel %vm999_vm4, %v2164_v31, %v2180_v23  ;;  %v6812_v61 = vsel %vm999_vm4, %v2180_v23, %v2164_v31 }
 0x483   : > { %9589 = vst [vmem:[#allocation64_spill] sm:$0xff] %v6801_v28 }
 0x484   : > { %9590 = vst [vmem:[#allocation134_spill] sm:$0xff] %v6804_v59 }
 0x486   : > { %v2176_v19 = vpop.permute.xlu2 %2175 }
 0x488   : > { %v2842_v21 = vpop.f32.mrf.mxu0  ;;  %v2101_v16 = vpop.permute.xlu1 %2100 }
 0x489   : > { %v2845_v25 = vmax.f32 %v2842_v21, 0.0  ;;  %v6815_v26 = vmul.f32 %v2101_v16, %v6724_v15  ;;  %v6818_v62 = vmul.f32 %v2101_v16, %v6720_v52  ;;  %v2186_v59 = vpop.permute.xlu0 %2185 }
 0x48a   : > { %v6825_v23 = vsel %vm999_vm4, %v2170_v30, %v2186_v59  ;;  %v6829_v31 = vsel %vm999_vm4, %v2186_v59, %v2170_v30 }
 0x48b   : > { %9591 = vst [vmem:[#allocation59_spill] sm:$0xff] %v6815_v26  ;;  %3756 = vmatpush.msk.msra.mxu1 %vm2879_vm10, %v2845_v25 }
 0x48c   : > { %9592 = vst [vmem:[#allocation48_spill] sm:$0xff] %v6818_v62  ;;  %3757 = vmatmul.msk.f32.vlgmr.msra.gmra.mxu1 %vm2854_vm11, %v2846_v54  ;;  %v2847_v62 = vld [vmem:[%s8678_s6 + $0x8] sm:$0xff]  ;;  %v2848_v54 = vld [vmem:[%s8678_s6 + $0x10] sm:$0xff] }
 0x48e   : > { %v2182_v15 = vpop.permute.xlu2 %2181 }
 0x490   : > { %v2109_v52 = vpop.permute.xlu1 %2108 }
 0x491   : > { %v6832_v21 = vmul.f32 %v2109_v52, %v2081_v38  ;;  %v6834_v16 = vmul.f32 %v2109_v52, %v2073_v2  ;;  %v2192_v26 = vpop.permute.xlu0 %2191 }
 0x492   : > { %v2201_v28 = vsel %vm999_vm4, %v2176_v19, %v2192_v26  ;;  %v2209_v30 = vsel %vm999_vm4, %v2192_v26, %v2176_v19 }
 0x493   : > { %9593 = vst [vmem:[#allocation136_spill] sm:$0xff] %v6832_v21 }
 0x494   : > { %9594 = vst [vmem:[#allocation75_spill] sm:$0xff] %v6834_v16  ;;  %3758 = vmatmul.msk.f32.gmra.mxu1 %vm2854_vm11, %v2847_v62 }
 0x496   : > { %v2188_v25 = vpop.permute.xlu2 %2187 }
 0x498   : > { %v2166_v59 = vpop.permute.xlu1 %2165 }
 0x499   : > { %v2196_v38 = vsel %vm999_vm4, %v2166_v59, %v2182_v15  ;;  %v2204_v2 = vsel %vm999_vm4, %v2182_v15, %v2166_v59  ;;  %v2217_v52 = vpop.permute.xlu0 %2216  ;;  %v2849_v15 = vld [vmem:[%s8678_s6 + $0x18] sm:$0xff] }
 0x49a   : > { %v6851_v16 = vmul.f32 %v2217_v52, %v2196_v38  ;;  %v6853_v21 = vmul.f32 %v2217_v52, %v2204_v2 }
 0x49c   : > { %9595 = vst [vmem:[#allocation73_spill] sm:$0xff] %v6851_v16  ;;  %3759 = vmatmul.msk.f32.gmra.mxu1 %vm2854_vm11, %v2848_v54 }
 0x49d   : > { %9596 = vst [vmem:[#allocation90_spill] sm:$0xff] %v6853_v21 }
 0x49e   : > { %v2194_v19 = vpop.permute.xlu2 %2193 }
 0x4a0   : > { %v2172_v26 = vpop.permute.xlu1 %2171 }
 0x4a1   : > { %v2199_v62 = vsel %vm999_vm4, %v2172_v26, %v2188_v25  ;;  %v2207_v57 = vsel %vm999_vm4, %v2188_v25, %v2172_v26  ;;  %v2237_v59 = vpop.permute.xlu0 %2236  ;;  %v2850_v25 = vld [vmem:[%s8678_s6 + $0x20] sm:$0xff] }
 0x4a2   : > { %v6863_v48 = vmul.f32 %v2237_v59, %v2201_v28  ;;  %v6865_v38 = vmul.f32 %v2237_v59, %v2209_v30 }
 0x4a4   : > { %9597 = vst [vmem:[#allocation45_spill] sm:$0xff] %v6863_v48  ;;  %3760 = vmatmul.msk.f32.gmra.mxu1 %vm2854_vm11, %v2849_v15 }
 0x4a5   : > { %9598 = vst [vmem:[#allocation63_spill] sm:$0xff] %v6865_v38 }
 0x4a6   : > { %v2221_v2 = vpop.permute.xlu2 %2220 }
 0x4a8   : > { %v2178_v54 = vpop.permute.xlu1 %2177 }
 0x4a9   : > { %v2202_v52 = vsel %vm999_vm4, %v2178_v54, %v2194_v19  ;;  %v2210_v21 = vsel %vm999_vm4, %v2194_v19, %v2178_v54  ;;  %v2851_v54 = vld [vmem:[%s8678_s6 + $0x28] sm:$0xff] }
 0x4aa   : > { %v6875_v26 = vpop.permute.xlu0 %1645 }
 0x4ab   : > { %9599 = vst [vmem:[#allocation38_spill] sm:$0xff] %v6875_v26 }
 0x4ac   : > { %3761 = vmatmul.msk.f32.gmra.mxu1 %vm2854_vm11, %v2850_v25 }
 0x4ae   : > { %v2229_v28 = vpop.permute.xlu2 %2228 }
 0x4af   : > { %v6878_v30 = vmul.f32 %v2229_v28, %v2199_v62  ;;  %v6880_v15 = vmul.f32 %v2229_v28, %v2207_v57 }
 0x4b0   : > { %v2184_v59 = vpop.permute.xlu1 %2183 }
 0x4b1   : > { %9600 = vst [vmem:[#allocation4_spill] sm:$0xff] %v6878_v30  ;;  %v2197_v38 = vsel %vm999_vm4, %v6789_v56, %v2184_v59  ;;  %v2205_v19 = vsel %vm999_vm4, %v2184_v59, %v6789_v56 }
 0x4b2   : > { %9601 = vst [vmem:[#allocation145_spill] sm:$0xff] %v6880_v15  ;;  %v6891_v48 = vmul.f32 %v2221_v2, %v2197_v38  ;;  %v6893_v25 = vmul.f32 %v2221_v2, %v2205_v19  ;;  %v6895_v62 = vpop.permute.xlu0 %1670  ;;  %v2852_v2 = vld [vmem:[%s8678_s6 + $0x30] sm:$0xff] }
 0x4b3   : > { %9604 = vst [vmem:[#allocation44_spill] sm:$0xff] %v6895_v62 }
 0x4b4   : > { %9602 = vst [vmem:[#allocation70_spill] sm:$0xff] %v6891_v48  ;;  %3762 = vmatmul.msk.f32.gmra.mxu1 %vm2854_vm11, %v2851_v54 }
 0x4b5   : > { %9603 = vst [vmem:[#allocation137_spill] sm:$0xff] %v6893_v25 }
 0x4b6   : > { %v2241_v57 = vpop.permute.xlu2 %2240 }
 0x4b7   : > { %v6898_v28 = vmul.f32 %v2241_v57, %v2202_v52  ;;  %v6900_v15 = vmul.f32 %v2241_v57, %v2210_v21  ;;  %v1733_v52 = vsel %vm523_vm0, %v6385_v47, %v6430_v45  ;;  %v1741_v21 = vsel %vm523_vm0, %v6430_v45, %v6385_v47 }
 0x4b8   : > { %v2190_v30 = vpop.permute.xlu1 %2189  ;;  %v2136_v57 = vmul.f32 %v6750_v58, %v9490_v49  ;;  %v1736_v58 = vsel %vm523_vm0, %v6392_v51, %v6439_v20 }
 0x4b9   : > { %9605 = vst [vmem:[#allocation67_spill] sm:$0xff] %v6898_v28  ;;  %v2200_v56 = vsel %vm999_vm4, %v6799_v18, %v2190_v30  ;;  %v2208_v38 = vsel %vm999_vm4, %v2190_v30, %v6799_v18  ;;  %v9607_v18 = vld [vmem:[#allocation20_spill] sm:$0xff] }
 0x4ba   : > { %9606 = vst [vmem:[#allocation94_spill] sm:$0xff] %v6900_v15  ;;  %v1757_v59 = vpop.permute.xlu0 %1756  ;;  %v2135_v30 = vmul.f32 %v6748_v24, %v9607_v18  ;;  %v9608_v15 = vld [vmem:[#allocation147_spill] sm:$0xff]  ;;  %v2853_v24 = vld [vmem:[%s8678_s6 + $0x38] sm:$0xff] }
 0x4bb   : > { %v1783_v19 = vmul.f32 %v1757_v59, %v1741_v21  ;;  %v1784_v54 = vmul.f32 %v1757_v59, %v1733_v52  ;;  %v2142_v21 = vmul.f32 %v6777_v41, %v9490_v49 }
 0x4bc   : > { %3763 = vmatmul.msk.f32.gmra.mxu1 %vm2854_vm11, %v2852_v2 }
 0x4bd   : > { %v1799_v28 = vmul.f32 %v1783_v19, %v9608_v15  ;;  %v1800_v16 = vmul.f32 %v1784_v54, %v9494_v22 }
 0x4bf   : > { %v6926_v25 = vadd.f32 %v2135_v30, %v1799_v28  ;;  %v6928_v48 = vadd.f32 %v2136_v57, %v1800_v16  ;;  %v1744_v16 = vsel %vm523_vm0, %v6439_v20, %v6392_v51 }
 0x4c0   : > { %v2213_v47 = vpop.permute.xlu1 %2212 }
 0x4c1   : > { %9609 = vst [vmem:[#allocation76_spill] sm:$0xff] %v6926_v25  ;;  %v6931_v45 = vmul.f32 %v2213_v47, %v6808_v50  ;;  %v6934_v2 = vmul.f32 %v2213_v47, %v6812_v61  ;;  %v2141_v61 = vmul.f32 %v6775_v27, %v9607_v18 }
 0x4c2   : > { %9610 = vst [vmem:[#allocation56_spill] sm:$0xff] %v6928_v48  ;;  %v1769_v28 = vpop.permute.xlu0 %1768 }
 0x4c3   : > { %9611 = vst [vmem:[#allocation57_spill] sm:$0xff] %v6931_v45  ;;  %v1789_v50 = vmul.f32 %v1769_v28, %v1744_v16  ;;  %v1790_v52 = vmul.f32 %v1769_v28, %v1736_v58 }
 0x4c4   : > { %9612 = vst [vmem:[#allocation16_spill] sm:$0xff] %v6934_v2  ;;  %3764 = vmatmul.msk.f32.gmra.mxu1 %vm2854_vm11, %v2853_v24 }
 0x4c5   : > { %v1805_v59 = vmul.f32 %v1789_v50, %v9608_v15  ;;  %v1806_v19 = vmul.f32 %v1790_v52, %v9494_v22  ;;  %v7009_v52 = vpop.permute.xlu2 %2295 }
 0x4c7   : > { %v6954_v54 = vadd.f32 %v2141_v61, %v1805_v59  ;;  %v6956_v30 = vadd.f32 %v2142_v21, %v1806_v19 }
 0x4c8   : > { %v2225_v51 = vpop.permute.xlu1 %2224 }
 0x4c9   : > { %9613 = vst [vmem:[#allocation96_spill] sm:$0xff] %v6954_v54  ;;  %v6959_v20 = vmul.f32 %v2225_v51, %v6825_v23  ;;  %v6962_v57 = vmul.f32 %v2225_v51, %v6829_v31 }
 0x4ca   : > { %9614 = vst [vmem:[#allocation81_spill] sm:$0xff] %v6956_v30  ;;  %v7011_v61 = vpop.permute.xlu0 %2293 }
 0x4cb   : > { %9615 = vst [vmem:[#allocation148_spill] sm:$0xff] %v6959_v20 }
 0x4cc   : > { %9616 = vst [vmem:[#allocation87_spill] sm:$0xff] %v6962_v57 }
 0x4cd   : > { %v7015_v21 = vpop.permute.xlu2 %2301 }
 0x4d0   : > { %v2233_v47 = vpop.permute.xlu1 %2232 }
 0x4d1   : > { %v6964_v27 = vmul.f32 %v2233_v47, %v2200_v56  ;;  %v6966_v24 = vmul.f32 %v2233_v47, %v2208_v38 }
 0x4d2   : > { %v7017_v59 = vpop.permute.xlu0 %2299 }
 0x4d3   : > { %9617 = vst [vmem:[#allocation150_spill] sm:$0xff] %v6964_v27 }
 0x4d4   : > { %9618 = vst [vmem:[#allocation79_spill] sm:$0xff] %v6966_v24 }
 0x4d8   : > { %v7005_v50 = vpop.permute.xlu1 %2291 }
 0x509   : > { %v2900_v41 = vpop.f32.mrf.mxu1 }
 0x50a   : > { %2932 = vrot.lane.b32.xlu1 %v2900_v41, %s3986_s16 }
 0x511   : > { %v2903_v58 = vpop.f32.mrf.mxu1 }
 0x512   : > { %2934 = vrot.lane.b32.xlu0 %v2903_v58, %s3986_s16 }
 0x519   : > { %v2906_v16 = vpop.f32.mrf.mxu1 }
 0x51a   : > { %2936 = vrot.lane.b32.xlu0 %v2906_v16, %s3986_s16 }
 0x521   : > { %v6971_v28 = vpop.f32.mrf.mxu1 }
 0x529   : > { %v2912_v23 = vpop.f32.mrf.mxu1 }
 0x52a   : > { %2940 = vrot.lane.b32.xlu2 %v2912_v23, %s3986_s16 }
 0x531   : > { %v6974_v31 = vpop.f32.mrf.mxu1 }
 0x532   : > { %2942 = vrot.lane.b32.xlu1 %v6974_v31, %s3986_s16 }
 0x539   : > { %v6978_v56 = vpop.f32.mrf.mxu1 }
 0x53a   : > { %2938 = vrot.lane.b32.xlu1 %v6971_v28, %s3986_s16  ;;  %2944 = vrot.lane.b32.xlu2 %v6978_v56, %s3986_s16 }
 0x541   : > { %v6984_v38 = vpop.f32.mrf.mxu1 }
 0x542   : > { %2311 = vrot.lane.b32.xlu1 %v6261_v29, %s3988_s18  ;;  %2309 = vrot.lane.b32.xlu2 %v6259_v35, %s3988_s18 }
 0x543   : > { %2946 = vrot.lane.b32.xlu0 %v6984_v38, %s3986_s16 }
 0x54a   : > { %2317 = vrot.lane.b32.xlu1 %v6281_v43, %s3988_s18  ;;  %2315 = vrot.lane.b32.xlu2 %v6279_v42, %s3988_s18 }
 0x54b   : > { %2313 = vrot.lane.b32.xlu0 %v6180_v14, %s3988_s18 }
 0x552   : > { %2340 = vperm.xlu1 %3847, %v6306_v44   ;;  %2321 = vrot.lane.b32.xlu2 %v6293_v3, %s3988_s18  ;;  %v7013_v44 = vpop.permute.xlu1 %2297 }
 0x553   : > { %2319 = vrot.lane.b32.xlu0 %v6222_v36, %s3988_s18  ;;  %9619 = vst [vmem:[#allocation84_spill] sm:$0xff] %v7013_v44 }
 0x55a   : > { %2352 = vperm.xlu1 %3847, %v6318_v60   ;;  %2348 = vperm.xlu2 %3848, %v6378_v39   ;;  %v7019_v19 = vpop.permute.xlu1 %2303  ;;  %v7021_v60 = vpop.permute.xlu2 %2307 }
 0x55b   : > { %v7023_v39 = vpop.permute.xlu0 %2305 }
 0x562   : > { %3849 = vset.pattern.permute.xlu2 %v9579_v63  ;;  %3850 = vset.pattern.permute.xlu1 %v9579_v63 }
 0x57c   : > { %v2933_v51 = vpop.permute.xlu1 %2932 }
 0x57d   : > { %v2956_v47 = vadd.f32 %v2933_v51, %v2900_v41 }
 0x57f   : > { %v3765_v24 = vmul.f32 -1.442695, %v2956_v47 }
 0x581   : > { %3863 = vpow2.f32 %v3765_v24 }
 0x584   : > { %v2935_v27 = vpop.permute.xlu0 %2934  ;;  %v2941_v57 = vpop.permute.xlu2 %2940 }
 0x585   : > { %v2957_v20 = vadd.f32 %v2935_v27, %v2903_v58  ;;  %v2960_v2 = vadd.f32 %v2941_v57, %v2912_v23 }
 0x587   : > { %v3864_v45 = vpop.eup %3863  ;;  %v3766_v44 = vmul.f32 -1.442695, %v2957_v20  ;;  %v3769_v48 = vmul.f32 -1.442695, %v2960_v2 }
 0x588   : > { %v2988_v25 = vadd.f32 1.0, %v3864_v45 }
 0x589   : > { %3865 = vpow2.f32 %v3766_v44 }
 0x58a   : > { %3867 = vrcp.f32 %v2988_v25  ;;  %v3007_v20 = vand.u32 2147483648, %v2988_v25  ;;  %v3005_v45 = vand.u32 2147483647, %v2988_v25  ;;  %vm3001_vm13 = vweird.f32 %v2988_v25 }
 0x58b   : > { %3869 = vpow2.f32 %v3769_v48 }
 0x58c   : > { %v2937_v30 = vpop.permute.xlu0 %2936  ;;  %vm3006_vm15 = vcmp.eq.f32.partialorder %v3005_v45, 8.507059e+37 }
 0x58d   : > { %v2958_v54 = vadd.f32 %v2937_v30, %v2906_v16 }
 0x58f   : > { %v3866_v62 = vpop.eup %3865  ;;  %v3767_v26 = vmul.f32 -1.442695, %v2958_v54 }
 0x590   : > { %v3868_v22 = vpop.eup %3867  ;;  %v2989_v15 = vadd.f32 1.0, %v3866_v62  ;;  %v3008_v62 = vor.u32 1.1754944e-38, %v3007_v20 }
 0x591   : > { %v3870_v41 = vpop.eup %3869  ;;  %3871 = vpow2.f32 %v3767_v26  ;;  %v2997_v24 = vmul.f32 %v3868_v22, %v2988_v25  ;;  %vm3002_vm12 = vweird.f32 %v3868_v22 }
 0x592   : > { %3873 = vrcp.f32 %v2989_v15  ;;  %v2992_v51 = vadd.f32 1.0, %v3870_v41  ;;  %vm3003_vm14 = vmor %vm3001_vm13, %vm3002_vm12  ;;  %v3022_v25 = vand.u32 2147483648, %v2989_v15  ;;  %vm3016_vm4 = vweird.f32 %v2989_v15 }
 0x593   : > { %v2998_v27 = vsub.f32 1.0, %v2997_v24 }
 0x594   : > { %3875 = vrcp.f32 %v2992_v51  ;;  %v2945_v57 = vpop.permute.xlu2 %2944  ;;  %v3065_v20 = vand.u32 2147483647, %v2992_v51  ;;  %vm3061_vm11 = vweird.f32 %v2992_v51 }
 0x595   : > { %v2999_v2 = vmul.f32 %v3868_v22, %v2998_v27  ;;  %v2962_v54 = vadd.f32 %v2945_v57, %v6978_v56  ;;  %v3067_v56 = vand.u32 2147483648, %v2992_v51 }
 0x596   : > { %vm3066_vm13 = vcmp.eq.f32.partialorder %v3065_v20, 8.507059e+37 }
 0x597   : > { %v3872_v58 = vpop.eup %3871  ;;  %v3000_v48 = vadd.f32 %v3868_v22, %v2999_v2  ;;  %v3771_v27 = vmul.f32 -1.442695, %v2962_v54  ;;  %v3020_v2 = vand.u32 2147483647, %v2989_v15 }
 0x598   : > { %v3874_v30 = vpop.eup %3873  ;;  %v2990_v16 = vadd.f32 1.0, %v3872_v58 }
 0x599   : > { %v3004_v26 = vsel %vm3003_vm14, %v3868_v22, %v3000_v48  ;;  %v3012_v23 = vmul.f32 %v3874_v30, %v2989_v15  ;;  %vm3017_vm3 = vweird.f32 %v3874_v30  ;;  %vm3021_vm10 = vcmp.eq.f32.partialorder %v3020_v2, 8.507059e+37 }
 0x59a   : > { %v3876_v44 = vpop.eup %3875  ;;  %3877 = vrcp.f32 %v2990_v16  ;;  %v3009_v47 = vsel %vm3006_vm15, %v3008_v62, %v3004_v26  ;;  %vm3018_vm9 = vmor %vm3016_vm4, %vm3017_vm3  ;;  %v3023_v48 = vor.u32 1.1754944e-38, %v3022_v25  ;;  %v3037_v63 = vand.u32 2147483648, %v2990_v16 }
 0x59b   : > { %3118 = vperm.xlu2 %3849, %v3009_v47   ;;  %v3013_v41 = vsub.f32 1.0, %v3012_v23  ;;  %v3057_v24 = vmul.f32 %v3876_v44, %v2992_v51  ;;  %vm3062_vm8 = vweird.f32 %v3876_v44  ;;  %3879 = vpow2.f32 %v3771_v27 }
 0x59c   : > { %v7026_v49 = vpop.permute.xlu2 %2309  ;;  %vm3063_vm12 = vmor %vm3061_vm11, %vm3062_vm8  ;;  %v3068_v47 = vor.u32 1.1754944e-38, %v3067_v56  ;;  %vm3031_vm15 = vweird.f32 %v2990_v16  ;;  %v3038_v56 = vor.u32 1.1754944e-38, %v3037_v63 }
 0x59d   : > { %v3014_v18 = vmul.f32 %v3874_v30, %v3013_v41  ;;  %v3058_v58 = vsub.f32 1.0, %v3057_v24 }
 0x59f   : > { %v3015_v57 = vadd.f32 %v3874_v30, %v3014_v18  ;;  %v3059_v22 = vmul.f32 %v3876_v44, %v3058_v58 }
 0x5a0   : > { %v3878_v45 = vpop.eup %3877 }
 0x5a1   : > { %v3019_v62 = vsel %vm3018_vm9, %v3874_v30, %v3015_v57  ;;  %v3060_v54 = vadd.f32 %v3876_v44, %v3059_v22  ;;  %v3027_v26 = vmul.f32 %v3878_v45, %v2990_v16  ;;  %vm3032_vm14 = vweird.f32 %v3878_v45  ;;  %v3880_v51 = vpop.eup %3879 }
 0x5a2   : > { %v3024_v23 = vsel %vm3021_vm10, %v3023_v48, %v3019_v62  ;;  %v3035_v30 = vand.u32 2147483647, %v2990_v16  ;;  %vm3033_vm3 = vmor %vm3031_vm15, %vm3032_vm14 }
 0x5a3   : > { %3123 = vperm.xlu1 %3850, %v3024_v23   ;;  %v3064_v41 = vsel %vm3063_vm12, %v3876_v44, %v3060_v54  ;;  %v3028_v15 = vsub.f32 1.0, %v3027_v26  ;;  %v7031_v44 = vadd.f32 1.0, %v3880_v51  ;;  %v1957_v23 = vsel %vm753_vm2, %v6554_v33, %v6630_v13 }
 0x5a4   : > { %v3069_v18 = vsel %vm3066_vm13, %v3068_v47, %v3064_v41  ;;  %v7028_v24 = vpop.permute.xlu2 %2315  ;;  %v2943_v58 = vpop.permute.xlu1 %2942  ;;  %vm3036_vm4 = vcmp.eq.f32.partialorder %v3035_v30, 8.507059e+37  ;;  %v1965_v47 = vsel %vm753_vm2, %v6630_v13, %v6554_v33 }
 0x5a5   : > { %3138 = vperm.xlu0 %3846, %v3069_v18   ;;  %v2961_v27 = vadd.f32 %v2943_v58, %v6974_v31  ;;  %v3029_v2 = vmul.f32 %v3878_v45, %v3028_v15  ;;  %vm3091_vm13 = vweird.f32 %v7031_v44 }
 0x5a7   : > { %v3770_v25 = vmul.f32 -1.442695, %v2961_v27  ;;  %v3030_v57 = vadd.f32 %v3878_v45, %v3029_v2 }
 0x5a9   : > { %3881 = vpow2.f32 %v3770_v25  ;;  %v3034_v22 = vsel %vm3033_vm3, %v3878_v45, %v3030_v57 }
 0x5aa   : > { %v3039_v20 = vsel %vm3036_vm4, %v3038_v56, %v3034_v22  ;;  %3883 = vrcp.f32 %v7031_v44 }
 0x5ab   : > { %3128 = vperm.xlu1 %3850, %v3039_v20  }
 0x5ac   : > { %v2322_v48 = vpop.permute.xlu2 %2321  ;;  %v2939_v62 = vpop.permute.xlu1 %2938 }
 0x5ad   : > { %v7037_v31 = vsel %vm1130_vm5, %v7023_v39, %v2322_v48  ;;  %v7042_v63 = vsel %vm1130_vm5, %v2322_v48, %v7023_v39  ;;  %v2959_v16 = vadd.f32 %v2939_v62, %v6971_v28  ;;  %v2007_v39 = vmul.f32 %v6697_v9, %v1965_v47  ;;  %v9621_v62 = vld [vmem:[#allocation58_spill] sm:$0xff] }
 0x5ae   : > { %v2008_v28 = vmul.f32 %v6697_v9, %v1957_v23  ;;  %v9620_v9 = vld [vmem:[#allocation22_spill] sm:$0xff] }
 0x5af   : > { %v3882_v45 = vpop.eup %3881  ;;  %v3768_v54 = vmul.f32 -1.442695, %v2959_v16  ;;  %v2023_v57 = vmul.f32 %v2007_v39, %v9620_v9 }
 0x5b0   : > { %v2993_v26 = vadd.f32 1.0, %v3882_v45  ;;  %v7053_v41 = vpop.eup %3883  ;;  %v2024_v56 = vmul.f32 %v2008_v28, %v9498_v17 }
 0x5b1   : > { %3885 = vpow2.f32 %v3768_v54  ;;  %v3087_v51 = vmul.f32 %v7053_v41, %v7031_v44  ;;  %vm3092_vm12 = vweird.f32 %v7053_v41 }
 0x5b2   : > { %3887 = vrcp.f32 %v2993_v26  ;;  %v3082_v28 = vand.u32 2147483648, %v2993_v26  ;;  %vm3076_vm9 = vweird.f32 %v2993_v26  ;;  %vm7106_vm14 = vmor %vm3091_vm13, %vm3092_vm12 }
 0x5b3   : > { %v3088_v23 = vsub.f32 1.0, %v3087_v51 }
 0x5b4   : > { %v2312_v15 = vpop.permute.xlu1 %2311  ;;  %v2349_v18 = vpop.permute.xlu2 %2348 }
 0x5b5   : > { %v2947_v58 = vpop.permute.xlu0 %2946  ;;  %v2325_v27 = vsel %vm1130_vm5, %v7009_v52, %v2312_v15  ;;  %v2333_v2 = vsel %vm1130_vm5, %v2312_v15, %v7009_v52 }
 0x5b6   : > { %v2963_v33 = vadd.f32 %v2947_v58, %v6984_v38  ;;  %v2375_v13 = vmul.f32 %v2349_v18, %v2325_v27  ;;  %v2376_v30 = vmul.f32 %v2349_v18, %v2333_v2  ;;  %v3080_v18 = vand.u32 2147483647, %v2993_v26 }
 0x5b7   : > { %v3886_v25 = vpop.eup %3885  ;;  %v3089_v58 = vmul.f32 %v7053_v41, %v3088_v23  ;;  %v1955_v27 = vsel %vm753_vm2, %v6568_v12, %v6614_v5  ;;  %v1963_v2 = vsel %vm753_vm2, %v6614_v5, %v6568_v12  ;;  %v3097_v23 = vand.u32 2147483648, %v7031_v44 }
 0x5b8   : > { %v3888_v22 = vpop.eup %3887  ;;  %v7068_v20 = vadd.f32 1.0, %v3886_v25  ;;  %v3772_v48 = vmul.f32 -1.442695, %v2963_v33  ;;  %v2391_v16 = vmul.f32 %v2375_v13, %v9621_v62  ;;  %v2392_v52 = vmul.f32 %v2376_v30, %v5701_v0 }
 0x5b9   : > { %v3072_v45 = vmul.f32 %v3888_v22, %v2993_v26  ;;  %vm3077_vm8 = vweird.f32 %v3888_v22  ;;  %v2003_v30 = vmul.f32 %v6649_v40, %v1963_v2  ;;  %v2004_v51 = vmul.f32 %v6649_v40, %v1955_v27 }
 0x5ba   : > { %3889 = vrcp.f32 %v7068_v20  ;;  %v7073_v38 = vadd.f32 %v2391_v16, %v2023_v57  ;;  %v7075_v54 = vadd.f32 %v2392_v52, %v2024_v56  ;;  %vm3078_vm10 = vmor %vm3076_vm9, %vm3077_vm8  ;;  %v3083_v25 = vor.u32 1.1754944e-38, %v3082_v28 }
 0x5bb   : > { %3891 = vpow2.f32 %v3772_v48  ;;  %v3073_v47 = vsub.f32 1.0, %v3072_v45  ;;  %v2323_v56 = vsel %vm1130_vm5, %v7005_v50, %v7021_v60  ;;  %vm3081_vm11 = vcmp.eq.f32.partialorder %v3080_v18, 8.507059e+37 }
 0x5bc   : > { %9622 = vst [vmem:[#allocation61_spill] sm:$0xff] %v7073_v38  ;;  %v7077_v39 = vpop.permute.xlu1 %2317  ;;  %v3090_v26 = vadd.f32 %v7053_v41, %v3089_v58  ;;  %v2331_v40 = vsel %vm1130_vm5, %v7021_v60, %v7005_v50  ;;  %v3095_v52 = vand.u32 2147483647, %v7031_v44  ;;  %v3052_v28 = vand.u32 2147483648, %v7068_v20  ;;  %v7149_v58 = vld [vmem:[%s8675_s3 + $0x8] sm:$0xff]  ;;  %v3947_v38 = vld [vmem:[%s4093_s27 + $0x60] sm:$0xff] }
 0x5bd   : > { %9623 = vst [vmem:[#allocation69_spill] sm:$0xff] %v7075_v54  ;;  %v3074_v15 = vmul.f32 %v3888_v22, %v3073_v47  ;;  %v3050_v47 = vand.u32 2147483647, %v7068_v20  ;;  %v2019_v60 = vmul.f32 %v2003_v30, %v9620_v9  ;;  %v2020_v27 = vmul.f32 %v2004_v51, %v9498_v17 }
 0x5be   : > { %v3094_v44 = vsel %vm7106_vm14, %v7053_v41, %v3090_v26  ;;  %vm3046_vm3 = vweird.f32 %v7068_v20  ;;  %vm3096_vm4 = vcmp.eq.f32.partialorder %v3095_v52, 8.507059e+37  ;;  %vm3252_vm14 = vcmask 1041409  }
 0x5bf   : > { %v3075_v33 = vadd.f32 %v3888_v22, %v3074_v15  ;;  %vm3051_vm9 = vcmp.eq.f32.partialorder %v3050_v47, 8.507059e+37  ;;  %v7127_v47 = vld [vmem:[%s8675_s3 + $0x20] sm:$0xff] }
 0x5c0   : > { %v3890_v13 = vpop.eup %3889 }
 0x5c1   : > { %v3892_v57 = vpop.eup %3891  ;;  %v3079_v48 = vsel %vm3078_vm10, %v3888_v22, %v3075_v33  ;;  %v3042_v16 = vmul.f32 %v3890_v13, %v7068_v20  ;;  %vm3047_vm15 = vweird.f32 %v3890_v13 }
 0x5c2   : > { %v2995_v12 = vadd.f32 1.0, %v3892_v57  ;;  %v3084_v5 = vsel %vm3081_vm11, %v3083_v25, %v3079_v48  ;;  %v3098_v57 = vor.u32 1.1754944e-38, %v3097_v23  ;;  %vm3048_vm8 = vmor %vm3046_vm3, %vm3047_vm15  ;;  %vm3594_vm3 = vcmask 1040384  }
 0x5c3   : > { %3143 = vperm.xlu2 %3849, %v3084_v5   ;;  %v3043_v22 = vsub.f32 1.0, %v3042_v16 }
 0x5c4   : > { %3893 = vrcp.f32 %v2995_v12  ;;  %v2341_v45 = vpop.permute.xlu1 %2340  ;;  %v3099_v5 = vsel %vm3096_vm4, %v3098_v57, %v3094_v44  ;;  %v3110_v20 = vand.u32 2147483647, %v2995_v12  ;;  %vm3106_vm11 = vweird.f32 %v2995_v12  ;;  %v3289_v44 = vld [vmem:[%s8680_s8 + $0xc0] sm:$0xff]  ;;  %v3359_v57 = vld [vmem:[%s8680_s8 + $0x2f0] sm:$0xff] }
 0x5c5   : > { %v2371_v15 = vmul.f32 %v2341_v45, %v2323_v56  ;;  %v2372_v18 = vmul.f32 %v2341_v45, %v2331_v40  ;;  %v3044_v50 = vmul.f32 %v3890_v13, %v3043_v22  ;;  %v3053_v56 = vor.u32 1.1754944e-38, %v3052_v28  ;;  %3433 = vmatpush.msrb.mxu0 %v3359_v57  ;;  %v3345_v57 = vld [vmem:[%s8680_s8 + $0x280] sm:$0xff] }
 0x5c6   : > { %v3112_v22 = vand.u32 2147483648, %v2995_v12  ;;  %vm3111_vm13 = vcmp.eq.f32.partialorder %v3110_v20, 8.507059e+37  ;;  %v3353_v20 = vld [vmem:[%s8680_s8 + $0x2c0] sm:$0xff] }
 0x5c7   : > { %v2387_v2 = vmul.f32 %v2371_v15, %v9621_v62  ;;  %v2388_v33 = vmul.f32 %v2372_v18, %v5701_v0  ;;  %v3045_v25 = vadd.f32 %v3890_v13, %v3044_v50  ;;  %v7139_v15 = vld [vmem:[%s8675_s3 + $0x38] sm:$0xff]  ;;  %v9628_v18 = vmov 7   ;;  %v3295_v50 = vld [vmem:[%s8680_s8 + $0xf0] sm:$0xff] }
 0x5c8   : > { %v3113_v23 = vor.u32 1.1754944e-38, %v3112_v22  ;;  %3393 = vmatpush.msra.mxu2 %v3295_v50  ;;  %v3319_v22 = vld [vmem:[%s8680_s8 + $0x1b0] sm:$0xff] }
 0x5c9   : > { %v7118_v48 = vadd.f32 %v2387_v2, %v2019_v60  ;;  %v7120_v30 = vadd.f32 %v2388_v33, %v2020_v27  ;;  %v3049_v51 = vsel %vm3048_vm8, %v3890_v13, %v3045_v25  ;;  %v3293_v60 = vld [vmem:[%s8680_s8 + $0xe0] sm:$0xff]  ;;  %v3291_v27 = vld [vmem:[%s8680_s8 + $0xd0] sm:$0xff] }
 0x5ca   : > { %v3894_v16 = vpop.eup %3893  ;;  %v3054_v41 = vsel %vm3051_vm9, %v3053_v56, %v3049_v51  ;;  %3394 = vmatpush.msra.mxu2 %v3293_v60  ;;  %v3327_v2 = vld [vmem:[%s8680_s8 + $0x1f0] sm:$0xff]  ;;  %v3325_v25 = vld [vmem:[%s8680_s8 + $0x1e0] sm:$0xff] }
 0x5cb   : > { %9626 = vst [vmem:[#allocation60_spill] sm:$0xff] %v7118_v48  ;;  %3148 = vperm.xlu2 %3849, %v3099_v5   ;;  %3133 = vperm.xlu1 %3850, %v3054_v41   ;;  %v3102_v26 = vmul.f32 %v3894_v16, %v2995_v12  ;;  %vm3107_vm10 = vweird.f32 %v3894_v16  ;;  %v7133_v12 = vld [vmem:[%s8675_s3 + $0x28] sm:$0xff]  ;;  %v3287_v33 = vld [vmem:[%s8680_s8 + $0xb0] sm:$0xff]  ;;  %v3285_v56 = vld [vmem:[%s8680_s8 + $0xa0] sm:$0xff] }
 0x5cc   : > { %9627 = vst [vmem:[#allocation14_spill] sm:$0xff] %v7120_v30  ;;  %vm3108_vm12 = vmor %vm3106_vm11, %vm3107_vm10  ;;  %3395 = vmatpush.msra.mxu2 %v3291_v27  ;;  %3413 = vmatpush.msra.mxu3 %v3327_v2  ;;  %v3283_v51 = vld [vmem:[%s8680_s8 + $0x90] sm:$0xff]  ;;  %v3357_v5 = vld [vmem:[%s8680_s8 + $0x2e0] sm:$0xff] }
 0x5cd   : > { %v3103_v40 = vsub.f32 1.0, %v3102_v26  ;;  %3434 = vmatpush.msrb.mxu0 %v3357_v5  ;;  %v3281_v41 = vld [vmem:[%s8680_s8 + $0x80] sm:$0xff]  ;;  %v3315_v50 = vld [vmem:[%s8680_s8 + $0x190] sm:$0xff]  ;;  %v3312_v48 = vld [vmem:[%s8680_s8 + $0x178] sm:$0xff] }
 0x5ce   : > { %3396 = vmatpush.msra.mxu2 %v3289_v44  ;;  %3414 = vmatpush.msra.mxu3 %v3325_v25  ;;  %v3321_v26 = vld [vmem:[%s8680_s8 + $0x1c0] sm:$0xff]  ;;  %v3347_v2 = vld [vmem:[%s8680_s8 + $0x290] sm:$0xff] }
 0x5cf   : > { %v3104_v45 = vmul.f32 %v3894_v16, %v3103_v40  ;;  %v3355_v40 = vld [vmem:[%s8680_s8 + $0x2d0] sm:$0xff]  ;;  %v3349_v60 = vld [vmem:[%s8680_s8 + $0x2a0] sm:$0xff] }
 0x5d0   : > { %3397 = vmatpush.msra.mxu2 %v3287_v33  ;;  %3435 = vmatpush.msrb.mxu0 %v3355_v40  ;;  %v3273_v27 = vld [vmem:[%s8680_s8 + $0x40] sm:$0xff]  ;;  %v3271_v33 = vld [vmem:[%s8680_s8 + $0x30] sm:$0xff] }
 0x5d1   : > { %v3105_v52 = vadd.f32 %v3894_v16, %v3104_v45  ;;  %v3279_v45 = vld [vmem:[%s8680_s8 + $0x70] sm:$0xff]  ;;  %v3313_v44 = vld [vmem:[%s8680_s8 + $0x180] sm:$0xff] }
 0x5d2   : > { %3398 = vmatpush.msra.mxu2 %v3285_v56  ;;  %3436 = vmatpush.msrb.mxu0 %v3353_v20  ;;  %v3311_v25 = vld [vmem:[%s8680_s8 + $0x170] sm:$0xff]  ;;  %v7290_v56 = vld [vmem:[%s8675_s3 + $0x18] sm:$0xff]  ;;  %v3265_v20 = vld [vmem:[%s8680_s8] sm:$0xff] }
 0x5d3   : > { %v3109_v28 = vsel %vm3108_vm12, %v3894_v16, %v3105_v52  ;;  %3852 = vset.pattern.permute.xlu2 %v9582_v55  ;;  %3853 = vset.pattern.permute.xlu1 %v9582_v55  ;;  %v3323_v16 = vld [vmem:[%s8680_s8 + $0x1d0] sm:$0xff]  ;;  %v3317_v52 = vld [vmem:[%s8680_s8 + $0x1a0] sm:$0xff] }
 0x5d4   : > { %v3114_v13 = vsel %vm3111_vm13, %v3113_v23, %v3109_v28  ;;  %2356 = vperm.xlu2 %3852, %v7127_v47   ;;  %2360 = vperm.xlu1 %3853, %v7133_v12   ;;  %v7248_v23 = vld [vmem:[%s8675_s3] sm:$0xff]  ;;  %v3267_v40 = vld [vmem:[%s8680_s8 + $0x10] sm:$0xff] }
 0x5d5   : > { %3153 = vperm.xlu0 %3846, %v3114_v13   ;;  %3415 = vmatpush.msra.mxu3 %v3323_v16  ;;  %v3277_v28 = vld [vmem:[%s8680_s8 + $0x60] sm:$0xff]  ;;  %v3351_v13 = vld [vmem:[%s8680_s8 + $0x2b0] sm:$0xff] }
 0x5d6   : > { %3399 = vmatpush.msra.mxu2 %v3283_v51  ;;  %3437 = vmatpush.msrb.mxu0 %v3351_v13  ;;  %v3269_v51 = vld [vmem:[%s8680_s8 + $0x20] sm:$0xff]  ;;  %v3391_v13 = vld [vmem:[%s8680_s8 + $0x3f0] sm:$0xff] }
 0x5d7   : > { %3416 = vmatpush.msra.mxu3 %v3321_v26  ;;  %v3309_v16 = vld [vmem:[%s8680_s8 + $0x160] sm:$0xff]  ;;  %v7308_v26 = vld [vmem:[%s8675_s3 + $0x10] sm:$0xff] }
 0x5d8   : > { %3400 = vmatpush.msra.mxu2 %v3281_v41  ;;  %3438 = vmatpush.msrb.mxu0 %v3349_v60  ;;  %v3343_v41 = vld [vmem:[%s8680_s8 + $0x270] sm:$0xff] }
 0x5d9   : > { %3417 = vmatpush.msra.mxu3 %v3319_v22  ;;  %v3307_v22 = vld [vmem:[%s8680_s8 + $0x150] sm:$0xff] }
 0x5da   : > { %3401 = vmatpush.msra.mxu2 %v3279_v45  ;;  %3439 = vmatpush.msrb.mxu0 %v3347_v2  ;;  %v3341_v45 = vld [vmem:[%s8680_s8 + $0x260] sm:$0xff]  ;;  %v3326_v2 = vld [vmem:[%s8680_s8 + $0x1e8] sm:$0xff] }
 0x5db   : > { %3418 = vmatpush.msra.mxu3 %v3317_v52  ;;  %v3305_v52 = vld [vmem:[%s8680_s8 + $0x140] sm:$0xff] }
 0x5dc   : > { %2368 = vperm.xlu2 %3852, %v7139_v15   ;;  %2419 = vrot.lane.b32.xlu1 %v5955_v4, %s3990_s19 }
 0x5dd   : > { %3851 = vset.pattern.permute.xlu0 %v9582_v55  ;;  %3855 = vset.pattern.permute.xlu1 %v9628_v18  ;;  %v7160_v55 = vld [vmem:[%s8675_s3 + $0x30] sm:$0xff] }
 0x5de   : > { %2344 = vperm.xlu0 %3851, %v7149_v58   ;;  %3402 = vmatpush.msra.mxu2 %v3277_v28  ;;  %v3339_v28 = vld [vmem:[%s8680_s8 + $0x250] sm:$0xff] }
 0x5df   : > { %3419 = vmatpush.msra.mxu3 %v3315_v50  ;;  %3440 = vmatpush.msrb.mxu0 %v3345_v57  ;;  %v3303_v50 = vld [vmem:[%s8680_s8 + $0x130] sm:$0xff] }
 0x5e0   : > { %v3387_v57 = vld [vmem:[%s8680_s8 + $0x3d0] sm:$0xff] }
 0x5e1   : > { %3420 = vmatpush.msra.mxu3 %v3313_v44  ;;  %3441 = vmatpush.msrb.mxu0 %v3343_v41  ;;  %v3389_v44 = vld [vmem:[%s8680_s8 + $0x3e0] sm:$0xff]  ;;  %v7367_v41 = vpop.permute.xlu1 %2352 }
 0x5e2   : > { %9629 = vst [vmem:[#allocation46_spill] sm:$0xff] %v7367_v41 }
 0x5e3   : > { %3421 = vmatpush.msra.mxu3 %v3311_v25  ;;  %3442 = vmatpush.msrb.mxu0 %v3341_v45  ;;  %v3335_v25 = vld [vmem:[%s8680_s8 + $0x230] sm:$0xff]  ;;  %v3322_v45 = vld [vmem:[%s8680_s8 + $0x1c8] sm:$0xff] }
 0x5e4   : > { %2421 = vrot.lane.b32.xlu2 %v6140_v46, %s3990_s19  ;;  %2423 = vrot.lane.b32.xlu1 %v5944_v10, %s3990_s19 }
 0x5e5   : > { %3854 = vset.pattern.permute.xlu2 %v9628_v18  ;;  %3422 = vmatpush.msra.mxu3 %v3309_v16  ;;  %v3299_v16 = vld [vmem:[%s8680_s8 + $0x110] sm:$0xff] }
 0x5e6   : > { %2364 = vperm.xlu0 %3851, %v7160_v55   ;;  %3443 = vmatpush.msrb.mxu0 %v3339_v28  ;;  %v3331_v28 = vld [vmem:[%s8680_s8 + $0x210] sm:$0xff] }
 0x5e7   : > { %3423 = vmatpush.msra.mxu3 %v3307_v22  ;;  %v3385_v22 = vld [vmem:[%s8680_s8 + $0x3c0] sm:$0xff] }
 0x5e9   : > { %3424 = vmatpush.msra.mxu3 %v3305_v52  ;;  %v3297_v52 = vld [vmem:[%s8680_s8 + $0x100] sm:$0xff] }
 0x5eb   : > { %3425 = vmatpush.msra.mxu3 %v3303_v50  ;;  %v3320_v50 = vld [vmem:[%s8680_s8 + $0x1b8] sm:$0xff] }
 0x5ec   : > { %2427 = vrot.lane.b32.xlu2 %v6186_v53, %s3990_s19  ;;  %2429 = vrot.lane.b32.xlu1 %v9504_v34, %s3990_s19 }
 0x5ee   : > { %2425 = vrot.lane.b32.xlu0 %v6178_v6, %s3990_s19 }
 0x5ef   : > { %3856 = vset.pattern.permute.xlu0 %v9628_v18  ;;  %v3275_v18 = vld [vmem:[%s8680_s8 + $0x50] sm:$0xff] }
 0x5f0   : > { %3403 = vmatpush.msra.mxu2 %v3275_v18  ;;  %v3328_v18 = vld [vmem:[%s8680_s8 + $0x1f8] sm:$0xff] }
 0x5f1   : > { %3493 = vmatpush.msrb.mxu1 %v3328_v18  ;;  %v3296_v18 = vld [vmem:[%s8680_s8 + $0xf8] sm:$0xff] }
 0x5f2   : > { %3404 = vmatpush.msra.mxu2 %v3273_v27  ;;  %v3337_v27 = vld [vmem:[%s8680_s8 + $0x240] sm:$0xff] }
 0x5f3   : > { %3444 = vmatpush.msrb.mxu0 %v3337_v27  ;;  %3494 = vmatpush.msrb.mxu1 %v3326_v2  ;;  %v3329_v27 = vld [vmem:[%s8680_s8 + $0x200] sm:$0xff]  ;;  %v3294_v2 = vld [vmem:[%s8680_s8 + $0xe8] sm:$0xff] }
 0x5f4   : > { %2433 = vrot.lane.b32.xlu2 %v6228_v37, %s3990_s19  ;;  %2435 = vrot.lane.b32.xlu1 %v6087_v7, %s3990_s19 }
 0x5f5   : > { %v7300_v5 = vpop.permute.xlu2 %3118  ;;  %3405 = vmatpush.msra.mxu2 %v3271_v33  ;;  %v3301_v33 = vld [vmem:[%s8680_s8 + $0x120] sm:$0xff]  ;;  %3445 = vmatpush.msrb.mxu0 %v3335_v25  ;;  %v1967_v25 = vsel %vm753_vm2, %v6675_v1, %v6605_v8 }
 0x5f6   : > { %2431 = vrot.lane.b32.xlu0 %v6220_v11, %s3990_s19  ;;  %3426 = vmatpush.msra.mxu3 %v3301_v33  ;;  %v3318_v33 = vld [vmem:[%s8680_s8 + $0x1a8] sm:$0xff] }
 0x5f7   : > { %3406 = vmatpush.msra.mxu2 %v3269_v51  ;;  %v3324_v51 = vld [vmem:[%s8680_s8 + $0x1d8] sm:$0xff] }
 0x5f8   : > { %3495 = vmatpush.msrb.mxu1 %v3324_v51  ;;  %3427 = vmatpush.msra.mxu3 %v3299_v16  ;;  %v3360_v51 = vld [vmem:[%s8680_s8 + $0x2f8] sm:$0xff]  ;;  %v1959_v16 = vsel %vm753_vm2, %v6605_v8, %v6675_v1 }
 0x5f9   : > { %3407 = vmatpush.msra.mxu2 %v3267_v40  ;;  %v3333_v40 = vld [vmem:[%s8680_s8 + $0x220] sm:$0xff]  ;;  %v3316_v1 = vld [vmem:[%s8680_s8 + $0x198] sm:$0xff] }
 0x5fa   : > { %3446 = vmatpush.msrb.mxu0 %v3333_v40  ;;  %3496 = vmatpush.msrb.mxu1 %v3322_v45  ;;  %v9630_v40 = vld [vmem:[#allocation43_spill] sm:$0xff]  ;;  %v7427_v45 = vpop.permute.xlu0 %2313 }
 0x5fb   : > { %3408 = vmatpush.msra.mxu2 %v3265_v20  ;;  %3428 = vmatpush.msra.mxu3 %v3297_v52  ;;  %9631 = vst [vmem:[#allocation77_spill] sm:$0xff] %v7427_v45  ;;  %v3379_v52 = vld [vmem:[%s8680_s8 + $0x390] sm:$0xff]  ;;  %v2012_v8 = vmul.f32 %v9630_v40, %v1959_v16  ;;  %v9632_v16 = vld [vmem:[#allocation13_spill] sm:$0xff]  ;;  %v3946_v45 = vld [vmem:[%s4093_s27 + $0x48] sm:$0xff] }
 0x5fc   : > { %2439 = vrot.lane.b32.xlu2 %v6261_v29, %s3990_s19  ;;  %2441 = vrot.lane.b32.xlu1 %v6180_v14, %s3990_s19 }
 0x5fd   : > { %3453 = vmatpush.msrb.mxu2 %v3391_v13  ;;  %v3383_v13 = vld [vmem:[%s8680_s8 + $0x3b0] sm:$0xff]  ;;  %3447 = vmatpush.msrb.mxu0 %v3331_v28  ;;  %v3292_v28 = vld [vmem:[%s8680_s8 + $0xd8] sm:$0xff] }
 0x5fe   : > { %2437 = vrot.lane.b32.xlu0 %v6259_v35, %s3990_s19  ;;  %3473 = vmatpush.msrb.mxu3 %v3296_v18  ;;  %v2327_v18 = vsel %vm1130_vm5, %v7017_v59, %v7028_v24 }
 0x5ff   : > { %3454 = vmatpush.msrb.mxu2 %v3389_v44  ;;  %v3381_v44 = vld [vmem:[%s8680_s8 + $0x3a0] sm:$0xff]  ;;  %3497 = vmatpush.msrb.mxu1 %v3320_v50  ;;  %v2335_v50 = vsel %vm1130_vm5, %v7028_v24, %v7017_v59  ;;  %v3314_v59 = vld [vmem:[%s8680_s8 + $0x188] sm:$0xff]  ;;  %v3356_v24 = vld [vmem:[%s8680_s8 + $0x2d8] sm:$0xff] }
 0x600   : > { %3448 = vmatpush.msrb.mxu0 %v3329_v27  ;;  %3474 = vmatpush.msrb.mxu3 %v3294_v2  ;;  %v3290_v2 = vld [vmem:[%s8680_s8 + $0xc8] sm:$0xff] }
 0x601   : > { %3455 = vmatpush.msrb.mxu2 %v3387_v57  ;;  %3498 = vmatpush.msrb.mxu1 %v3318_v33 }
 0x602   : > { %3513 = vmatpush.msra.mxu0 %v3360_v51  ;;  %3475 = vmatpush.msrb.mxu3 %v3292_v28  ;;  %v3288_v28 = vld [vmem:[%s8680_s8 + $0xb8] sm:$0xff] }
 0x603   : > { %3456 = vmatpush.msrb.mxu2 %v3385_v22  ;;  %v2011_v22 = vmul.f32 %v9630_v40, %v1967_v25  ;;  %v9633_v40 = vld [vmem:[#allocation52_spill] sm:$0xff]  ;;  %3499 = vmatpush.msrb.mxu1 %v3316_v1 }
 0x604   : > { %2445 = vrot.lane.b32.xlu2 %v6281_v43, %s3990_s19  ;;  %2447 = vrot.lane.b32.xlu1 %v6222_v36, %s3990_s19  ;;  %v1970_v30 = vsel %vm753_vm2, %v9633_v40, %v9632_v16  ;;  %v1962_v1 = vsel %vm753_vm2, %v9632_v16, %v9633_v40  ;;  %v7515_v40 = vpop.permute.xlu0 %2319 }
 0x605   : > { %3457 = vmatpush.msrb.mxu2 %v3383_v13  ;;  %v3358_v13 = vld [vmem:[%s8680_s8 + $0x2e8] sm:$0xff]  ;;  %v2027_v51 = vmul.f32 %v2011_v22, %v9620_v9  ;;  %3476 = vmatpush.msrb.mxu3 %v3290_v2 }
 0x606   : > { %2443 = vrot.lane.b32.xlu0 %v6279_v42, %s3990_s19  ;;  %3514 = vmatpush.msra.mxu0 %v3358_v13  ;;  %v9634_v13 = vld [vmem:[#allocation99_spill] sm:$0xff] }
 0x607   : > { %3458 = vmatpush.msrb.mxu2 %v3381_v44  ;;  %v3377_v44 = vld [vmem:[%s8680_s8 + $0x380] sm:$0xff]  ;;  %3500 = vmatpush.msrb.mxu1 %v3314_v59  ;;  %v3310_v59 = vld [vmem:[%s8680_s8 + $0x168] sm:$0xff] }
 0x608   : > { %3515 = vmatpush.msra.mxu0 %v3356_v24  ;;  %3477 = vmatpush.msrb.mxu3 %v3288_v28 }
 0x609   : > { %3459 = vmatpush.msrb.mxu2 %v3379_v52  ;;  %v3375_v52 = vld [vmem:[%s8680_s8 + $0x370] sm:$0xff]  ;;  %3501 = vmatpush.msrb.mxu1 %v3312_v48 }
 0x60b   : > { %3460 = vmatpush.msrb.mxu2 %v3377_v44  ;;  %v2018_v44 = vmul.f32 %v9634_v13, %v1962_v1  ;;  %3502 = vmatpush.msrb.mxu1 %v3310_v59  ;;  %v3350_v59 = vld [vmem:[%s8680_s8 + $0x2a8] sm:$0xff] }
 0x60c   : > { %2468 = vperm.xlu2 %3854, %v7248_v23   ;;  %2472 = vperm.xlu1 %3855, %v7149_v58  }
 0x60d   : > { %3461 = vmatpush.msrb.mxu2 %v3375_v52  ;;  %v3935_v52 = vld [vmem:[%s4093_s27 + $0x10] sm:$0xff]  ;;  %v2034_v1 = vmul.f32 %v2018_v44, %v9498_v17  ;;  %v3938_v44 = vld [vmem:[%s4093_s27 + $0x8] sm:$0xff] }
 0x60e   : > { %2449 = vrot.lane.b32.xlu0 %v6293_v3, %s3990_s19 }
 0x614   : > { %2480 = vperm.xlu2 %3854, %v7290_v56   ;;  %2484 = vperm.xlu1 %3855, %v7127_v47  }
 0x615   : > { %v7417_v57 = vpop.permute.xlu1 %3123 }
 0x616   : > { %2476 = vperm.xlu0 %3856, %v7308_v26   ;;  %v7519_v28 = vmul.f32 %v3935_v52, %v7417_v57 }
 0x618   : > { %9637 = vst [vmem:[#allocation47_spill] sm:$0xff] %v7519_v28 }
 0x61c   : > { %2488 = vperm.xlu2 %3854, %v7133_v12   ;;  %2492 = vperm.xlu1 %3855, %v7160_v55  }
 0x61d   : > { %v7340_v60 = vpop.permute.xlu2 %3143  ;;  %v3129_v24 = vpop.permute.xlu1 %3128 }
 0x61e   : > { %2496 = vperm.xlu0 %3856, %v7139_v15  }
 0x624   : > { %2547 = vrot.lane.b32.xlu2 %v5955_v4, %s3992_s20  ;;  %2549 = vrot.lane.b32.xlu1 %v6140_v46, %s3992_s20 }
 0x625   : > { %v7382_v20 = vpop.permute.xlu2 %3148 }
 0x626   : > { %2551 = vrot.lane.b32.xlu0 %v5944_v10, %s3992_s20 }
 0x62c   : > { %2553 = vrot.lane.b32.xlu2 %v6178_v6, %s3992_s20  ;;  %2555 = vrot.lane.b32.xlu1 %v6186_v53, %s3992_s20 }
 0x62e   : > { %2557 = vrot.lane.b32.xlu0 %v9504_v34, %s3992_s20  ;;  %v2357_v27 = vpop.permute.xlu2 %2356 }
 0x62f   : > { %v2379_v33 = vmul.f32 %v2357_v27, %v2327_v18  ;;  %v2380_v25 = vmul.f32 %v2357_v27, %v2335_v50  ;;  %v2028_v18 = vmul.f32 %v2012_v8, %v9498_v17  ;;  %v2017_v27 = vmul.f32 %v9634_v13, %v1970_v30  ;;  %v3354_v8 = vld [vmem:[%s8680_s8 + $0x2c8] sm:$0xff]  ;;  %v3373_v30 = vld [vmem:[%s8680_s8 + $0x360] sm:$0xff] }
 0x630   : > { %3516 = vmatpush.msra.mxu0 %v3354_v8  ;;  %3462 = vmatpush.msrb.mxu2 %v3373_v30  ;;  %v3308_v8 = vld [vmem:[%s8680_s8 + $0x158] sm:$0xff]  ;;  %v3937_v30 = vld [vmem:[%s4093_s27] sm:$0xff] }
 0x631   : > { %v2395_v50 = vmul.f32 %v2379_v33, %v9621_v62  ;;  %v2396_v22 = vmul.f32 %v2380_v25, %v5701_v0  ;;  %v3286_v25 = vld [vmem:[%s8680_s8 + $0xa8] sm:$0xff]  ;;  %v2033_v16 = vmul.f32 %v2017_v27, %v9620_v9  ;;  %v7541_v52 = vmul.f32 %v3937_v30, %v7300_v5  ;;  %3503 = vmatpush.msrb.mxu1 %v3308_v8  ;;  %v9646_v8 = vld [vmem:[#allocation128_spill] sm:$0xff] }
 0x632   : > { %3478 = vmatpush.msrb.mxu3 %v3286_v25  ;;  %v9642_v25 = vmov 8   ;;  %v3940_v30 = vld [vmem:[%s4093_s27 + $0x28] sm:$0xff] }
 0x633   : > { %v7494_v2 = vadd.f32 %v2395_v50, %v2027_v51  ;;  %v7496_v33 = vadd.f32 %v2396_v22, %v2028_v18  ;;  %v3352_v51 = vld [vmem:[%s8680_s8 + $0x2b8] sm:$0xff]  ;;  %v3371_v22 = vld [vmem:[%s8680_s8 + $0x350] sm:$0xff]  ;;  %9639 = vst [vmem:[#allocation93_spill] sm:$0xff] %v7541_v52  ;;  %3858 = vset.pattern.permute.xlu0 %v9642_v25  ;;  %3857 = vset.pattern.permute.xlu1 %v9642_v25 }
 0x634   : > { %2559 = vrot.lane.b32.xlu2 %v6220_v11, %s3992_s20  ;;  %2561 = vrot.lane.b32.xlu1 %v6228_v37, %s3992_s20  ;;  %v3936_v18 = vld [vmem:[%s4093_s27 + $0x18] sm:$0xff] }
 0x635   : > { %9635 = vst [vmem:[#allocation53_spill] sm:$0xff] %v7494_v2  ;;  %v7523_v50 = vmul.f32 %v3936_v18, %v7417_v57  ;;  %v3284_v57 = vld [vmem:[%s8680_s8 + $0x98] sm:$0xff]  ;;  %v3939_v18 = vld [vmem:[%s4093_s27 + $0x20] sm:$0xff]  ;;  %3517 = vmatpush.msra.mxu0 %v3352_v51  ;;  %3463 = vmatpush.msrb.mxu2 %v3371_v22  ;;  %v3172_v51 = vmax.f32 %v7541_v52, %v7519_v28 }
 0x636   : > { %9636 = vst [vmem:[#allocation144_spill] sm:$0xff] %v7496_v33  ;;  %2563 = vrot.lane.b32.xlu0 %v6087_v7, %s3992_s20  ;;  %v2369_v48 = vpop.permute.xlu2 %2368  ;;  %v7558_v33 = vmul.f32 %v3940_v30, %v3129_v24  ;;  %3479 = vmatpush.msrb.mxu3 %v3284_v57  ;;  %v3348_v57 = vld [vmem:[%s8680_s8 + $0x298] sm:$0xff]  ;;  %v7584_v2 = vmul.f32 %v9646_v8, %v9620_v9 }
 0x637   : > { %9638 = vst [vmem:[#allocation27_spill] sm:$0xff] %v7523_v50  ;;  %v2385_v13 = vmul.f32 %v2369_v48, %v7037_v31  ;;  %v2386_v27 = vmul.f32 %v2369_v48, %v7042_v63  ;;  %v7545_v31 = vmul.f32 %v3938_v44, %v7300_v5  ;;  %v7548_v63 = vmul.f32 %v3939_v18, %v3129_v24  ;;  %v3369_v48 = vld [vmem:[%s8680_s8 + $0x340] sm:$0xff]  ;;  %v3282_v24 = vld [vmem:[%s8680_s8 + $0x88] sm:$0xff]  ;;  %v3304_v8 = vld [vmem:[%s8680_s8 + $0x138] sm:$0xff] }
 0x638   : > { %9643 = vst [vmem:[#allocation9_spill] sm:$0xff] %v7558_v33  ;;  %3518 = vmatpush.msra.mxu0 %v3350_v59  ;;  %3464 = vmatpush.msrb.mxu2 %v3369_v48  ;;  %v3950_v11 = vld [vmem:[%s4093_s27 + $0x78] sm:$0xff] }
 0x639   : > { %9640 = vst [vmem:[#allocation66_spill] sm:$0xff] %v7545_v31  ;;  %v2401_v5 = vmul.f32 %v2385_v13, %v9621_v62  ;;  %v2402_v44 = vmul.f32 %v2386_v27, %v5701_v0  ;;  %v3181_v18 = vmax.f32 %v7545_v31, %v7523_v50  ;;  %v3306_v13 = vld [vmem:[%s8680_s8 + $0x148] sm:$0xff]  ;;  %v3208_v27 = vadd.f32 %v7519_v28, %v7541_v52 }
 0x63a   : > { %9641 = vst [vmem:[#allocation21_spill] sm:$0xff] %v7548_v63  ;;  %v3217_v41 = vadd.f32 %v7523_v50, %v7545_v31  ;;  %v3173_v59 = vmax.f32 %v3172_v51, %v7548_v63  ;;  %3480 = vmatpush.msrb.mxu3 %v3282_v24  ;;  %3504 = vmatpush.msrb.mxu1 %v3306_v13  ;;  %v3139_v50 = vpop.permute.xlu0 %3138  ;;  %v3941_v51 = vld [vmem:[%s4093_s27 + $0x30] sm:$0xff]  ;;  %v3346_v24 = vld [vmem:[%s8680_s8 + $0x288] sm:$0xff]  ;;  %v9649_v13 = vld [vmem:[#allocation113_spill] sm:$0xff] }
 0x63b   : > { %v7575_v22 = vadd.f32 %v2401_v5, %v2033_v16  ;;  %v7577_v30 = vadd.f32 %v2402_v44, %v2034_v1  ;;  %v3367_v16 = vld [vmem:[%s8680_s8 + $0x330] sm:$0xff]  ;;  %v3280_v1 = vld [vmem:[%s8680_s8 + $0x78] sm:$0xff]  ;;  %v3182_v48 = vmax.f32 %v3181_v18, %v7558_v33  ;;  %v3209_v5 = vadd.f32 %v3208_v27, %v7548_v63  ;;  %3519 = vmatpush.msra.mxu0 %v3348_v57  ;;  %v3278_v52 = vld [vmem:[%s8680_s8 + $0x68] sm:$0xff] }
 0x63c   : > { %2565 = vrot.lane.b32.xlu2 %v6259_v35, %s3992_s20  ;;  %2567 = vrot.lane.b32.xlu1 %v6261_v29, %s3992_s20  ;;  %v3218_v28 = vadd.f32 %v3217_v41, %v7558_v33  ;;  %v3942_v18 = vld [vmem:[%s4093_s27 + $0x38] sm:$0xff]  ;;  %v3365_v41 = vld [vmem:[%s8680_s8 + $0x320] sm:$0xff]  ;;  %v7623_v33 = vmul.f32 %v9649_v13, %v9498_v17  ;;  %v7650_v54 = vmul.f32 %v3946_v45, %v3139_v50 }
 0x63d   : > { %9644 = vst [vmem:[#allocation41_spill] sm:$0xff] %v7575_v22  ;;  %v3134_v44 = vpop.permute.xlu1 %3133  ;;  %3465 = vmatpush.msrb.mxu2 %v3367_v16  ;;  %3481 = vmatpush.msrb.mxu3 %v3280_v1  ;;  %v3302_v13 = vld [vmem:[%s8680_s8 + $0x128] sm:$0xff]  ;;  %v3344_v16 = vld [vmem:[%s8680_s8 + $0x278] sm:$0xff]  ;;  %v3945_v1 = vld [vmem:[%s4093_s27 + $0x40] sm:$0xff] }
 0x63e   : > { %9645 = vst [vmem:[#allocation49_spill] sm:$0xff] %v7577_v30  ;;  %2569 = vrot.lane.b32.xlu0 %v6180_v14, %s3992_s20  ;;  %v7608_v31 = vmul.f32 %v3941_v51, %v3134_v44  ;;  %v7611_v27 = vmul.f32 %v3942_v18, %v3134_v44  ;;  %v7613_v63 = vpop.permute.xlu2 %2421  ;;  %v3943_v51 = vld [vmem:[%s4093_s27 + $0x50] sm:$0xff]  ;;  %v3944_v18 = vld [vmem:[%s4093_s27 + $0x58] sm:$0xff]  ;;  %3505 = vmatpush.msrb.mxu1 %v3304_v8 }
 0x63f   : > { %v7627_v44 = vmul.f32 %v3943_v51, %v7340_v60  ;;  %v7631_v57 = vmul.f32 %v3944_v18, %v7340_v60  ;;  %v7647_v18 = vmul.f32 %v3945_v1, %v3139_v50  ;;  %9653 = vst [vmem:[#allocation62_spill] sm:$0xff] %v7650_v54  ;;  %3520 = vmatpush.msra.mxu0 %v3346_v24  ;;  %v3363_v45 = vld [vmem:[%s8680_s8 + $0x310] sm:$0xff] }
 0x640   : > { %9647 = vst [vmem:[#allocation55_spill] sm:$0xff] %v7608_v31  ;;  %v3174_v30 = vmax.f32 %v3173_v59, %v7608_v31  ;;  %v3183_v51 = vmax.f32 %v3182_v48, %v7611_v27  ;;  %v3210_v22 = vadd.f32 %v3209_v5, %v7608_v31  ;;  %v3219_v60 = vadd.f32 %v3218_v28, %v7611_v27  ;;  %v3948_v48 = vld [vmem:[%s4093_s27 + $0x68] sm:$0xff]  ;;  %v3949_v31 = vld [vmem:[%s4093_s27 + $0x70] sm:$0xff] }
 0x641   : > { %9648 = vst [vmem:[#allocation50_spill] sm:$0xff] %v7611_v27  ;;  %v7654_v59 = vmul.f32 %v3947_v38, %v7382_v20  ;;  %3466 = vmatpush.msrb.mxu2 %v3365_v41  ;;  %v7658_v28 = vmul.f32 %v3948_v48, %v7382_v20  ;;  %3482 = vmatpush.msrb.mxu3 %v3278_v52  ;;  %v3276_v52 = vld [vmem:[%s8680_s8 + $0x58] sm:$0xff] }
 0x642   : > { %9650 = vst [vmem:[#allocation139_spill] sm:$0xff] %v7627_v44  ;;  %v3175_v5 = vrot.slane %v3174_v30, 4  ;;  %v3184_v8 = vrot.slane %v3183_v51, 4  ;;  %v3211_v27 = vrot.slane %v3210_v22, 4  ;;  %3506 = vmatpush.msrb.mxu1 %v3302_v13  ;;  %v2328_v38 = vsel %vm1130_vm5, %v7015_v21, %v7077_v39  ;;  %3521 = vmatpush.msra.mxu0 %v3344_v16 }
 0x643   : > { %9651 = vst [vmem:[#allocation5_spill] sm:$0xff] %v7631_v57  ;;  %v2336_v20 = vsel %vm1130_vm5, %v7077_v39, %v7015_v21  ;;  %v3190_v50 = vmax.f32 %v7647_v18, %v7627_v44  ;;  %3859 = vset.pattern.permute.xlu2 %v9642_v25  ;;  %v3199_v24 = vmax.f32 %v7650_v54, %v7631_v57  ;;  %v3220_v1 = vrot.slane %v3219_v60, 4  ;;  %v3300_v21 = vld [vmem:[%s8680_s8 + $0x118] sm:$0xff]  ;;  %v3342_v39 = vld [vmem:[%s8680_s8 + $0x268] sm:$0xff] }
 0x644   : > { %9652 = vst [vmem:[#allocation156_spill] sm:$0xff] %v7647_v18  ;;  %v3226_v41 = vadd.f32 %v7627_v44, %v7647_v18  ;;  %v3176_v13 = vmax.f32 %v3174_v30, %v3175_v5  ;;  %2571 = vrot.lane.b32.xlu2 %v6279_v42, %s3992_s20  ;;  %v3235_v25 = vadd.f32 %v7631_v57, %v7650_v54  ;;  %v3361_v30 = vld [vmem:[%s8680_s8 + $0x300] sm:$0xff]  ;;  %v3274_v5 = vld [vmem:[%s8680_s8 + $0x48] sm:$0xff] }
 0x645   : > { %9654 = vst [vmem:[#allocation78_spill] sm:$0xff] %v7654_v59  ;;  %v3185_v16 = vmax.f32 %v3183_v51, %v3184_v8  ;;  %v3212_v48 = vadd.f32 %v3211_v27, %v3210_v22  ;;  %2573 = vrot.lane.b32.xlu1 %v6281_v43, %s3992_s20  ;;  %3467 = vmatpush.msrb.mxu2 %v3363_v45  ;;  %v3298_v51 = vld [vmem:[%s8680_s8 + $0x108] sm:$0xff]  ;;  %v3340_v8 = vld [vmem:[%s8680_s8 + $0x258] sm:$0xff] }
 0x646   : > { %9655 = vst [vmem:[#allocation146_spill] sm:$0xff] %v7658_v28  ;;  %v3191_v44 = vmax.f32 %v3190_v50, %v7654_v59  ;;  %v3200_v18 = vmax.f32 %v3199_v24, %v7658_v28  ;;  %v3227_v57 = vadd.f32 %v3226_v41, %v7654_v59  ;;  %2575 = vrot.lane.b32.xlu0 %v6222_v36, %s3992_s20  ;;  %v7704_v22 = vpop.permute.xlu2 %2427  ;;  %v2361_v27 = vpop.permute.xlu1 %2360  ;;  %v3177_v59 = vrot.slane %v3176_v13, 2 }
 0x647   : > { %3483 = vmatpush.msrb.mxu3 %v3276_v52  ;;  %v3236_v45 = vadd.f32 %v3235_v25, %v7658_v28  ;;  %v3154_v50 = vpop.permute.xlu0 %3153  ;;  %v2381_v24 = vmul.f32 %v2361_v27, %v2328_v38  ;;  %v2382_v41 = vmul.f32 %v2361_v27, %v2336_v20  ;;  %3507 = vmatpush.msrb.mxu1 %v3300_v21  ;;  %v3272_v52 = vld [vmem:[%s8680_s8 + $0x38] sm:$0xff]  ;;  %v3338_v38 = vld [vmem:[%s8680_s8 + $0x248] sm:$0xff]  ;;  %v3213_v20 = vrot.slane %v3212_v48, 2  ;;  %v9658_v27 = vld [vmem:[#allocation34_spill] sm:$0xff] }
 0x648   : > { %3522 = vmatpush.msra.mxu0 %v3342_v39  ;;  %v7716_v54 = vadd.f32 %v3220_v1, %v3219_v60  ;;  %v7719_v36 = vmul.f32 %v3949_v31, %v3154_v50  ;;  %v7722_v14 = vmul.f32 %v3950_v11, %v3154_v50  ;;  %3468 = vmatpush.msrb.mxu2 %v3361_v30  ;;  %v3186_v60 = vrot.slane %v3185_v16, 2  ;;  %v3270_v31 = vld [vmem:[%s8680_s8 + $0x28] sm:$0xff] }
 0x649   : > { %3484 = vmatpush.msrb.mxu3 %v3274_v5  ;;  %v2397_v21 = vmul.f32 %v2381_v24, %v9621_v62  ;;  %v2398_v39 = vmul.f32 %v2382_v41, %v5701_v0  ;;  %3508 = vmatpush.msrb.mxu1 %v3298_v51  ;;  %v3336_v5 = vld [vmem:[%s8680_s8 + $0x238] sm:$0xff]  ;;  %v9659_v51 = vld [vmem:[#allocation28_spill] sm:$0xff] }
 0x64a   : > { %9656 = vst [vmem:[#allocation6_spill] sm:$0xff] %v7719_v36  ;;  %3523 = vmatpush.msra.mxu0 %v3340_v8  ;;  %v3192_v11 = vmax.f32 %v3191_v44, %v7719_v36  ;;  %v3201_v1 = vmax.f32 %v3200_v18, %v7722_v14  ;;  %v3228_v25 = vadd.f32 %v3227_v57, %v7719_v36 }
 0x64b   : > { %9657 = vst [vmem:[#allocation7_spill] sm:$0xff] %v7722_v14  ;;  %v3237_v30 = vadd.f32 %v3236_v45, %v7722_v14  ;;  %3485 = vmatpush.msrb.mxu3 %v3272_v52  ;;  %v1961_v8 = vsel %vm753_vm2, %v9659_v51, %v9658_v27  ;;  %v7744_v50 = vadd.f32 %v2397_v21, %v7584_v2  ;;  %v3268_v52 = vld [vmem:[%s8680_s8 + $0x18] sm:$0xff]  ;;  %v3334_v2 = vld [vmem:[%s8680_s8 + $0x228] sm:$0xff] }
 0x64c   : > { %v7747_v44 = vadd.f32 %v2398_v39, %v7623_v33  ;;  %v3178_v18 = vmax.f32 %v3176_v13, %v3177_v59  ;;  %3524 = vmatpush.msra.mxu0 %v3338_v38  ;;  %v3193_v57 = vrot.slane %v3192_v11, 4  ;;  %v3202_v45 = vrot.slane %v3201_v1, 4  ;;  %2577 = vrot.lane.b32.xlu2 %v6293_v3, %s3992_s20 }
 0x64d   : > { %9660 = vst [vmem:[#allocation83_spill] sm:$0xff] %v7744_v50  ;;  %v3229_v24 = vrot.slane %v3228_v25, 4  ;;  %v3238_v41 = vrot.slane %v3237_v30, 4  ;;  %3486 = vmatpush.msrb.mxu3 %v3270_v31  ;;  %v1969_v33 = vsel %vm753_vm2, %v9658_v27, %v9659_v51  ;;  %v3222_v59 = vrot.slane %v7716_v54, 2  ;;  %2596 = vperm.xlu1 %3857, %v7248_v23   ;;  %v3266_v27 = vld [vmem:[%s8680_s8 + $0x8] sm:$0xff]  ;;  %v3332_v23 = vld [vmem:[%s8680_s8 + $0x218] sm:$0xff] }
 0x64e   : > { %9661 = vst [vmem:[#allocation65_spill] sm:$0xff] %v7747_v44  ;;  %v3187_v13 = vmax.f32 %v3185_v16, %v3186_v60  ;;  %v3214_v38 = vadd.f32 %v3213_v20, %v3212_v48  ;;  %3525 = vmatpush.msra.mxu0 %v3336_v5  ;;  %v3194_v21 = vmax.f32 %v3192_v11, %v3193_v57  ;;  %v7764_v36 = vpop.permute.xlu2 %2433  ;;  %v7766_v28 = vpop.permute.xlu1 %2419  ;;  %v3179_v48 = vrot.slane %v3178_v18, 1  ;;  %v3330_v5 = vld [vmem:[%s8680_s8 + $0x208] sm:$0xff] }
 0x64f   : > { %v3203_v39 = vmax.f32 %v3201_v1, %v3202_v45  ;;  %v3230_v31 = vadd.f32 %v3229_v24, %v3228_v25  ;;  %v3239_v14 = vadd.f32 %v3238_v41, %v3237_v30  ;;  %2600 = vperm.xlu0 %3858, %v7149_v58   ;;  %v2324_v16 = vsel %vm1130_vm5, %v7011_v61, %v7026_v49 }
 0x650   : > { %v2332_v58 = vsel %vm1130_vm5, %v7026_v49, %v7011_v61  ;;  %v3215_v20 = vrot.slane %v3214_v38, 1  ;;  %3487 = vmatpush.msrb.mxu3 %v3268_v52  ;;  %3526 = vmatpush.msra.mxu0 %v3334_v2  ;;  %v2345_v1 = vpop.permute.xlu0 %2344  ;;  %v3195_v25 = vrot.slane %v3194_v21, 2  ;;  %v3188_v45 = vrot.slane %v3187_v13, 1  ;;  %v9663_v2 = vld [vmem:[#allocation152_spill] sm:$0xff] }
 0x651   : > { %v3231_v60 = vrot.slane %v3230_v31, 2  ;;  %v3240_v11 = vrot.slane %v3239_v14, 2  ;;  %v3204_v30 = vrot.slane %v3203_v39, 2  ;;  %v7785_v51 = vmul.f32 %v2345_v1, %v2324_v16 }
 0x652   : > { %v7787_v57 = vmul.f32 %v2345_v1, %v2332_v58  ;;  %3488 = vmatpush.msrb.mxu3 %v3266_v27  ;;  %3527 = vmatpush.msra.mxu0 %v3332_v23  ;;  %v3223_v49 = vadd.f32 %v3222_v59, %v7716_v54  ;;  %v3196_v61 = vmax.f32 %v3194_v21, %v3195_v25 }
 0x653   : > { %v3205_v24 = vmax.f32 %v3203_v39, %v3204_v30  ;;  %v3232_v41 = vadd.f32 %v3231_v60, %v3230_v31  ;;  %v3241_v52 = vadd.f32 %v3240_v11, %v3239_v14  ;;  %v2015_v44 = vmul.f32 %v9663_v2, %v1969_v33  ;;  %v3390_v11 = vld [vmem:[%s8680_s8 + $0x3e8] sm:$0xff] }
 0x654   : > { %9662 = vst [vmem:[#allocation91_spill] sm:$0xff] %v7787_v57  ;;  %v2016_v50 = vmul.f32 %v9663_v2, %v1961_v8  ;;  %v3216_v6 = vadd.f32 %v3215_v20, %v3214_v38  ;;  %3528 = vmatpush.msra.mxu0 %v3330_v5  ;;  %2604 = vperm.xlu2 %3859, %v7308_v26   ;;  %v3197_v16 = vrot.slane %v3196_v61, 1  ;;  %v3224_v39 = vrot.slane %v3223_v49, 1 }
 0x655   : > { %v3206_v58 = vrot.slane %v3205_v24, 1  ;;  %v3233_v1 = vrot.slane %v3232_v41, 1  ;;  %v3242_v57 = vrot.slane %v3241_v52, 1  ;;  %v2329_v54 = vsel %vm1130_vm5, %v7019_v19, %v7515_v40  ;;  %2608 = vperm.xlu1 %3857, %v7290_v56  }
 0x656   : > { %v3180_v14 = vmax.f32 %v3178_v18, %v3179_v48  ;;  %v3189_v33 = vmax.f32 %v3187_v13, %v3188_v45  ;;  %v2440_v8 = vpop.permute.xlu2 %2439  ;;  %v2424_v59 = vpop.permute.xlu1 %2423  ;;  %v3198_v38 = vmax.f32 %v3196_v61, %v3197_v16  ;;  %v2337_v31 = vsel %vm1130_vm5, %v7515_v40, %v7019_v19  ;;  %v3388_v61 = vld [vmem:[%s8680_s8 + $0x3d8] sm:$0xff] }
 0x657   : > { %2620 = vperm.xlu0 %3858, %v7160_v55   ;;  %v3207_v26 = vmax.f32 %v3205_v24, %v3206_v58  ;;  %v3234_v21 = vadd.f32 %v3233_v1, %v3232_v41  ;;  %v7805_v27 = vsel %vm1261_vm6, %v2424_v59, %v2440_v8  ;;  %v7809_v56 = vsel %vm1261_vm6, %v2440_v8, %v2424_v59  ;;  %v3392_v55 = vld [vmem:[%s8680_s8 + $0x3f8] sm:$0xff] }
 0x658   : > { %v3244_v18 = vmul.f32 0.03125, %v3216_v6  ;;  %v2365_v13 = vpop.permute.xlu0 %2364  ;;  %v3253_v23 = vsel %vm3252_vm14, %v3198_v38, %v3180_v14  ;;  %v3243_v19 = vadd.f32 %v3242_v57, %v3241_v52  ;;  %v3225_v6 = vadd.f32 %v3224_v39, %v3223_v49  ;;  %v3382_v14 = vld [vmem:[%s8680_s8 + $0x3a8] sm:$0xff]  ;;  %v9668_v8 = vld [vmem:[#allocation89_spill] sm:$0xff] }
 0x659   : > { %v3254_v48 = vsel %vm3252_vm14, %v3207_v26, %v3189_v33  ;;  %v3246_v20 = vmul.f32 0.03125, %v3234_v21  ;;  %v2383_v40 = vmul.f32 %v2365_v13, %v2329_v54  ;;  %v2384_v60 = vmul.f32 %v2365_v13, %v2337_v31  ;;  %3409 = vmatmul.f32.vlgmr.msra.gmra.mxu2 %v3253_v23  ;;  %v9667_v33 = vld [vmem:[#allocation118_spill] sm:$0xff]  ;;  %v3380_v26 = vld [vmem:[%s8680_s8 + $0x398] sm:$0xff]  ;;  %v9671_v13 = vld [vmem:[#allocation23_spill] sm:$0xff] }
 0x65a   : > { %3429 = vmatmul.f32.vlgmr.msra.gmra.mxu3 %v3254_v48  ;;  %3509 = vmatmul.f32.vlgmr.msrb.gmra.mxu1 %v3254_v48  ;;  %v2031_v30 = vmul.f32 %v2015_v44, %v9620_v9  ;;  %v2032_v5 = vmul.f32 %v2016_v50, %v9498_v17  ;;  %v3247_v24 = vmul.f32 0.03125, %v3243_v19  ;;  %v3386_v50 = vld [vmem:[%s8680_s8 + $0x3c8] sm:$0xff]  ;;  %v3245_v2 = vmul.f32 0.03125, %v3225_v6  ;;  %v9669_v21 = vld [vmem:[#allocation129_spill] sm:$0xff] }
 0x65b   : > { %3533 = vmatpush.msra.mxu2 %v3392_v55  ;;  %v3261_v25 = vsel %vm3252_vm14, %v3246_v20, %v3244_v18  ;;  %v2399_v45 = vmul.f32 %v2383_v40, %v9621_v62  ;;  %v2400_v57 = vmul.f32 %v2384_v60, %v5701_v0  ;;  %v9666_v16 = vmov 0   ;;  %v3378_v55 = vld [vmem:[%s8680_s8 + $0x388] sm:$0xff]  ;;  %v9670_v18 = vld [vmem:[#allocation20_spill] sm:$0xff]  ;;  %v9672_v48 = vld [vmem:[#allocation29_spill] sm:$0xff] }
 0x65c   : > { %3449 = vmatmul.f32.vlgmr.msrb.gmra.mxu0 %v3261_v25  ;;  %2612 = vperm.xlu2 %3859, %v7127_v47   ;;  %v7849_v54 = vsel %vm3252_vm14, %v3247_v24, %v3245_v2  ;;  %v1731_v59 = vsel %vm523_vm0, %v9668_v8, %v9667_v33  ;;  %v1739_v38 = vsel %vm523_vm0, %v9667_v33, %v9668_v8  ;;  %v9673_v20 = vld [vmem:[#allocation140_spill] sm:$0xff]  ;;  %v9674_v6 = vld [vmem:[#allocation147_spill] sm:$0xff]  ;;  %v9678_v2 = vld [vmem:[#allocation26_spill] sm:$0xff] }
 0x65d   : > { %3534 = vmatpush.msra.mxu2 %v3390_v11  ;;  %v7828_v41 = vadd.f32 %v2399_v45, %v2031_v30  ;;  %v7830_v49 = vadd.f32 %v2400_v57, %v2032_v5  ;;  %2616 = vperm.xlu1 %3857, %v7133_v12   ;;  %v3384_v12 = vld [vmem:[%s8680_s8 + $0x3b8] sm:$0xff]  ;;  %v1779_v39 = vmul.f32 %v9669_v21, %v1739_v38 }
 0x65e   : > { %v2446_v44 = vpop.permute.xlu2 %2445  ;;  %v2430_v52 = vpop.permute.xlu1 %2429  ;;  %v1780_v31 = vmul.f32 %v9669_v21, %v1731_v59  ;;  %v2132_v19 = vmul.f32 %v9673_v20, %v9672_v48  ;;  %v9675_v5 = vld [vmem:[#allocation149_spill] sm:$0xff]  ;;  %v9679_v59 = vld [vmem:[#allocation74_spill] sm:$0xff] }
 0x65f   : > { %9664 = vst [vmem:[#allocation82_spill] sm:$0xff] %v7828_v41  ;;  %3535 = vmatpush.msra.mxu2 %v3388_v61  ;;  %3860 = vset.pattern.permute.xlu0 %v9666_v16  ;;  %v7839_v47 = vsel %vm1261_vm6, %v2430_v52, %v2446_v44  ;;  %v7843_v58 = vsel %vm1261_vm6, %v2446_v44, %v2430_v52  ;;  %v9677_v44 = vld [vmem:[#allocation104_spill] sm:$0xff] }
 0x660   : > { %9665 = vst [vmem:[#allocation100_spill] sm:$0xff] %v7830_v49  ;;  %v2426_v1 = vpop.permute.xlu0 %2425  ;;  %v1795_v30 = vmul.f32 %v1779_v39, %v9674_v6  ;;  %v1796_v45 = vmul.f32 %v1780_v31, %v9675_v5  ;;  %v1627_v16 = vmul.f32 %v9678_v2, %v5955_v4  ;;  %v9681_v39 = vld [vmem:[#allocation116_spill] sm:$0xff]  ;;  %v3372_v4 = vld [vmem:[%s8680_s8 + $0x358] sm:$0xff] }
 0x661   : > { %3536 = vmatpush.msra.mxu2 %v3386_v50  ;;  %v9676_v50 = vld [vmem:[#allocation120_spill] sm:$0xff]  ;;  %v9763_v49 = vld [vmem:[#allocation17_spill] sm:$0xff] }
 0x662   : > { %3469 = vmatmul.f32.vlgmr.msrb.gmra.mxu2 %v7849_v54  ;;  %3489 = vmatmul.f32.vlgmr.msrb.gmra.mxu3 %v3253_v23  ;;  %v2131_v23 = vmul.f32 %v9671_v13, %v9670_v18  ;;  %v1734_v52 = vsel %vm523_vm0, %v9677_v44, %v9676_v50  ;;  %v2148_v8 = vadd.f32 %v2132_v19, %v1796_v45  ;;  %v3370_v19 = vld [vmem:[%s8680_s8 + $0x348] sm:$0xff] }
 0x663   : > { %3537 = vmatpush.msra.mxu2 %v3384_v12  ;;  %v1628_v12 = vmul.f32 %v9678_v2, %v6087_v7  ;;  %v9682_v7 = vld [vmem:[#allocation38_spill] sm:$0xff] }
 0x664   : > { %3529 = vmatmul.f32.vlgmr.msra.gmra.mxu0 %v3261_v25  ;;  %2624 = vperm.xlu2 %3859, %v7139_v15   ;;  %v3376_v25 = vld [vmem:[%s8680_s8 + $0x378] sm:$0xff]  ;;  %v2147_v33 = vadd.f32 %v2131_v23, %v1795_v30  ;;  %v1683_v13 = vadd.f32 %v9682_v7, %v1627_v16 }
 0x665   : > { %3538 = vmatpush.msra.mxu2 %v3382_v14  ;;  %v3374_v14 = vld [vmem:[%s8680_s8 + $0x368] sm:$0xff]  ;;  %v1684_v20 = vadd.f32 %v9682_v7, %v1628_v12 }
 0x666   : > { %v2469_v40 = vpop.permute.xlu2 %2468  ;;  %v2436_v60 = vpop.permute.xlu1 %2435 }
 0x667   : > { %3539 = vmatpush.msra.mxu2 %v3380_v26  ;;  %v2451_v11 = vsel %vm1261_vm6, %v7766_v28, %v2436_v60  ;;  %v2459_v15 = vsel %vm1261_vm6, %v2436_v60, %v7766_v28  ;;  %v1742_v28 = vsel %vm523_vm0, %v9676_v50, %v9677_v44  ;;  %v9680_v26 = vld [vmem:[#allocation68_spill] sm:$0xff] }
 0x668   : > { %v2432_v57 = vpop.permute.xlu0 %2431  ;;  %v2499_v61 = vmul.f32 %v2469_v40, %v2451_v11  ;;  %v2500_v24 = vmul.f32 %v2469_v40, %v2459_v15  ;;  %v1785_v31 = vmul.f32 %v9681_v39, %v1742_v28  ;;  %v9683_v60 = vld [vmem:[#allocation24_spill] sm:$0xff] }
 0x669   : > { %3540 = vmatpush.msra.mxu2 %v3378_v55  ;;  %v1786_v55 = vmul.f32 %v9681_v39, %v1734_v52  ;;  %v2137_v11 = vmul.f32 %v9683_v60, %v9670_v18  ;;  %v9684_v15 = vld [vmem:[#allocation32_spill] sm:$0xff]  ;;  %v3368_v52 = vld [vmem:[%s8680_s8 + $0x338] sm:$0xff] }
 0x66a   : > { %v2515_v38 = vmul.f32 %v2499_v61, %v9679_v59  ;;  %v2516_v21 = vmul.f32 %v2500_v24, %v9680_v26  ;;  %v1801_v28 = vmul.f32 %v1785_v31, %v9674_v6 }
 0x66b   : > { %3541 = vmatpush.msra.mxu2 %v3376_v25  ;;  %v2138_v25 = vmul.f32 %v9684_v15, %v9672_v48  ;;  %v1802_v2 = vmul.f32 %v1786_v55, %v9675_v5  ;;  %v3364_v55 = vld [vmem:[%s8680_s8 + $0x318] sm:$0xff] }
 0x66c   : > { %v2531_v40 = vadd.f32 %v2515_v38, %v2147_v33  ;;  %v2532_v23 = vadd.f32 %v2516_v21, %v2148_v8  ;;  %v3366_v8 = vld [vmem:[%s8680_s8 + $0x328] sm:$0xff]  ;;  %v2153_v38 = vadd.f32 %v2137_v11, %v1801_v28 }
 0x66d   : > { %3542 = vmatpush.msra.mxu2 %v3374_v14  ;;  %v2154_v21 = vadd.f32 %v2138_v25, %v1802_v2 }
 0x66e   : > { %v7918_v30 = vadd.f32 %v2531_v40, %v1683_v13  ;;  %v7920_v45 = vadd.f32 %v2532_v23, %v1684_v20  ;;  %v2481_v61 = vpop.permute.xlu2 %2480  ;;  %v2442_v24 = vpop.permute.xlu1 %2441  ;;  %v9689_v13 = vld [vmem:[#allocation8_spill] sm:$0xff]  ;;  %v9690_v20 = vld [vmem:[#allocation109_spill] sm:$0xff] }
 0x66f   : > { %3543 = vmatpush.msra.mxu2 %v3372_v4  ;;  %v2454_v50 = vsel %vm1261_vm6, %v2426_v1, %v2442_v24  ;;  %v2462_v44 = vsel %vm1261_vm6, %v2442_v24, %v2426_v1  ;;  %v1732_v40 = vsel %vm523_vm0, %v9690_v20, %v9689_v13  ;;  %v1740_v23 = vsel %vm523_vm0, %v9689_v13, %v9690_v20  ;;  %v9691_v24 = vld [vmem:[#allocation72_spill] sm:$0xff] }
 0x670   : > { %9685 = vst [vmem:[#allocation80_spill] sm:$0xff] %v7918_v30  ;;  %v2438_v16 = vpop.permute.xlu0 %2437  ;;  %v2505_v12 = vmul.f32 %v2481_v61, %v2454_v50  ;;  %v2506_v14 = vmul.f32 %v2481_v61, %v2462_v44  ;;  %v1637_v50 = vmul.f32 %v9691_v24, %v9504_v34  ;;  %v1638_v44 = vmul.f32 %v9691_v24, %v6281_v43  ;;  %v9692_v34 = vld [vmem:[#allocation110_spill] sm:$0xff] }
 0x671   : > { %9686 = vst [vmem:[#allocation103_spill] sm:$0xff] %v7920_v45  ;;  %3544 = vmatpush.msra.mxu2 %v3370_v19  ;;  %v2452_v33 = vsel %vm1261_vm6, %v7613_v63, %v2438_v16  ;;  %v2460_v1 = vsel %vm1261_vm6, %v2438_v16, %v7613_v63  ;;  %v3362_v63 = vld [vmem:[%s8680_s8 + $0x308] sm:$0xff]  ;;  %v1781_v2 = vmul.f32 %v9692_v34, %v1740_v23  ;;  %v9693_v16 = vld [vmem:[#allocation44_spill] sm:$0xff]  ;;  %v9780_v45 = vld [vmem:[#allocation137_spill] sm:$0xff] }
 0x672   : > { %v2521_v39 = vmul.f32 %v2505_v12, %v9679_v59  ;;  %v2522_v31 = vmul.f32 %v2506_v14, %v9680_v26  ;;  %v1782_v43 = vmul.f32 %v9692_v34, %v1732_v40  ;;  %v1693_v12 = vadd.f32 %v9693_v16, %v1637_v50 }
 0x673   : > { %3545 = vmatpush.msra.mxu2 %v3368_v52  ;;  %v1694_v14 = vadd.f32 %v9693_v16, %v1638_v44  ;;  %v1797_v20 = vmul.f32 %v1781_v2, %v9674_v6 }
 0x674   : > { %v7945_v4 = vadd.f32 %v2521_v39, %v2153_v38  ;;  %v7947_v7 = vadd.f32 %v2522_v31, %v2154_v21  ;;  %v9695_v21 = vld [vmem:[#allocation81_spill] sm:$0xff]  ;;  %v1798_v40 = vmul.f32 %v1782_v43, %v9675_v5 }
 0x675   : > { %3546 = vmatpush.msra.mxu2 %v3366_v8  ;;  %v9694_v8 = vld [vmem:[#allocation96_spill] sm:$0xff] }
 0x676   : > { %9687 = vst [vmem:[#allocation22_spill] sm:$0xff] %v7945_v4  ;;  %v2489_v19 = vpop.permute.xlu2 %2488  ;;  %v2448_v60 = vpop.permute.xlu1 %2447  ;;  %v9757_v4 = vld [vmem:[#allocation132_spill] sm:$0xff] }
 0x677   : > { %9688 = vst [vmem:[#allocation58_spill] sm:$0xff] %v7947_v7  ;;  %3547 = vmatpush.msra.mxu2 %v3364_v55  ;;  %v2509_v11 = vmul.f32 %v2489_v19, %v7839_v47  ;;  %v2510_v15 = vmul.f32 %v2489_v19, %v7843_v58  ;;  %v7964_v25 = vsel %vm1261_vm6, %v2432_v57, %v2448_v60  ;;  %v9697_v55 = vld [vmem:[#allocation134_spill] sm:$0xff] }
 0x678   : > { %v7968_v61 = vsel %vm1261_vm6, %v2448_v60, %v2432_v57  ;;  %v2444_v52 = vpop.permute.xlu0 %2443  ;;  %v9700_v60 = vld [vmem:[#allocation112_spill] sm:$0xff] }
 0x679   : > { %3548 = vmatpush.msra.mxu2 %v3362_v63  ;;  %v2455_v47 = vsel %vm1261_vm6, %v7704_v22, %v2444_v52  ;;  %v2463_v58 = vsel %vm1261_vm6, %v2444_v52, %v7704_v22  ;;  %v2525_v28 = vmul.f32 %v2509_v11, %v9679_v59  ;;  %v2526_v57 = vmul.f32 %v2510_v15, %v9680_v26  ;;  %v9696_v22 = vld [vmem:[#allocation64_spill] sm:$0xff]  ;;  %v9701_v11 = vld [vmem:[#allocation98_spill] sm:$0xff] }
 0x67a   : > { %3549 = vmatmul.f32.vlgmr.msra.gmra.mxu2 %v7849_v54  ;;  %v2133_v31 = vmul.f32 %v9696_v22, %v9670_v18  ;;  %v2134_v63 = vmul.f32 %v9697_v55, %v9672_v48  ;;  %v1735_v15 = vsel %vm523_vm0, %v9701_v11, %v9700_v60  ;;  %v1743_v24 = vsel %vm523_vm0, %v9700_v60, %v9701_v11 }
 0x67b   : > { %v2541_v38 = vadd.f32 %v2525_v28, %v9694_v8  ;;  %v2542_v39 = vadd.f32 %v2526_v57, %v9695_v21 }
 0x67c   : > { %v2149_v52 = vadd.f32 %v2133_v31, %v1797_v20  ;;  %v2150_v28 = vadd.f32 %v2134_v63, %v1798_v40  ;;  %v9706_v20 = vld [vmem:[#allocation92_spill] sm:$0xff] }
 0x67d   : > { %v7993_v13 = vadd.f32 %v2541_v38, %v1693_v12  ;;  %v7995_v54 = vadd.f32 %v2542_v39, %v1694_v14  ;;  %v9702_v12 = vld [vmem:[#allocation126_spill] sm:$0xff]  ;;  %v9703_v38 = vld [vmem:[#allocation59_spill] sm:$0xff]  ;;  %v9704_v39 = vld [vmem:[#allocation48_spill] sm:$0xff] }
 0x67e   : > { %v7999_v23 = vpop.permute.xlu2 %2547  ;;  %v2473_v19 = vpop.permute.xlu1 %2472  ;;  %v1787_v14 = vmul.f32 %v9702_v12, %v1743_v24  ;;  %v2139_v21 = vmul.f32 %v9703_v38, %v9670_v18  ;;  %v2140_v22 = vmul.f32 %v9704_v39, %v9672_v48  ;;  %v9707_v40 = vld [vmem:[#allocation124_spill] sm:$0xff]  ;;  %v9708_v24 = vld [vmem:[#allocation135_spill] sm:$0xff] }
 0x67f   : > { %9698 = vst [vmem:[#allocation43_spill] sm:$0xff] %v7993_v13  ;;  %v2501_v50 = vmul.f32 %v2473_v19, %v2452_v33  ;;  %v2502_v44 = vmul.f32 %v2473_v19, %v2460_v1  ;;  %v1788_v33 = vmul.f32 %v9702_v12, %v1735_v15  ;;  %v1737_v19 = vsel %vm523_vm0, %v9707_v40, %v9706_v20 }
 0x680   : > { %9699 = vst [vmem:[#allocation13_spill] sm:$0xff] %v7995_v54  ;;  %v2450_v57 = vpop.permute.xlu0 %2449  ;;  %v1745_v60 = vsel %vm523_vm0, %v9706_v20, %v9707_v40  ;;  %v9713_v40 = vld [vmem:[#allocation75_spill] sm:$0xff] }
 0x681   : > { %v2458_v34 = vsel %vm1261_vm6, %v7764_v36, %v2450_v57  ;;  %v2466_v2 = vsel %vm1261_vm6, %v2450_v57, %v7764_v36  ;;  %v2517_v43 = vmul.f32 %v2501_v50, %v9679_v59  ;;  %v2518_v16 = vmul.f32 %v2502_v44, %v9680_v26  ;;  %v9709_v50 = vld [vmem:[#allocation121_spill] sm:$0xff] }
 0x682   : > { %v1803_v36 = vmul.f32 %v1787_v14, %v9674_v6  ;;  %v1804_v31 = vmul.f32 %v1788_v33, %v9675_v5  ;;  %v1738_v44 = vsel %vm523_vm0, %v9709_v50, %v9708_v24  ;;  %v9710_v14 = vld [vmem:[#allocation31_spill] sm:$0xff] }
 0x683   : > { %v8019_v1 = vadd.f32 %v2517_v43, %v2149_v52  ;;  %v8021_v8 = vadd.f32 %v2518_v16, %v2150_v28  ;;  %v1746_v52 = vsel %vm523_vm0, %v9708_v24, %v9709_v50  ;;  %v1791_v33 = vmul.f32 %v9710_v14, %v1745_v60 }
 0x684   : > { %v2155_v28 = vadd.f32 %v2139_v21, %v1803_v36  ;;  %v2156_v57 = vadd.f32 %v2140_v22, %v1804_v31  ;;  %v1792_v38 = vmul.f32 %v9710_v14, %v1737_v19  ;;  %v9711_v22 = vld [vmem:[#allocation19_spill] sm:$0xff]  ;;  %v9712_v36 = vld [vmem:[#allocation136_spill] sm:$0xff]  ;;  %v2144_v60 = vmul.f32 %v9713_v40, %v9672_v48 }
 0x685   : > { %v2143_v31 = vmul.f32 %v9712_v36, %v9670_v18  ;;  %v1807_v50 = vmul.f32 %v1791_v33, %v9674_v6 }
 0x686   : > { %v8029_v55 = vpop.permute.xlu2 %2553  ;;  %v2485_v63 = vpop.permute.xlu1 %2484 }
 0x687   : > { %9705 = vst [vmem:[#allocation52_spill] sm:$0xff] %v8029_v55  ;;  %v2507_v11 = vmul.f32 %v2485_v63, %v2455_v47  ;;  %v2508_v15 = vmul.f32 %v2485_v63, %v2463_v58  ;;  %v2159_v33 = vadd.f32 %v2143_v31, %v1807_v50  ;;  %v9722_v31 = vld [vmem:[#allocation106_spill] sm:$0xff] }
 0x688   : > { %v2477_v43 = vpop.permute.xlu0 %2476 }
 0x689   : > { %v2503_v16 = vmul.f32 %v2477_v43, %v7805_v27  ;;  %v2504_v12 = vmul.f32 %v2477_v43, %v7809_v56  ;;  %v2523_v47 = vmul.f32 %v2507_v11, %v9679_v59  ;;  %v2524_v58 = vmul.f32 %v2508_v15, %v9680_v26  ;;  %v9714_v11 = vld [vmem:[#allocation76_spill] sm:$0xff] }
 0x68a   : > { %v1793_v27 = vmul.f32 %v9711_v22, %v1746_v52  ;;  %v1794_v56 = vmul.f32 %v9711_v22, %v1738_v44  ;;  %v9715_v15 = vld [vmem:[#allocation56_spill] sm:$0xff]  ;;  %v9716_v52 = vld [vmem:[#allocation3_spill] sm:$0xff]  ;;  %v9717_v44 = vld [vmem:[#allocation142_spill] sm:$0xff] }
 0x68b   : > { %v2519_v39 = vmul.f32 %v2503_v16, %v9679_v59  ;;  %v2520_v63 = vmul.f32 %v2504_v12, %v9680_v26  ;;  %v8055_v20 = vadd.f32 %v2523_v47, %v2155_v28  ;;  %v8057_v21 = vadd.f32 %v2524_v58, %v2156_v57 }
 0x68c   : > { %v1808_v28 = vmul.f32 %v1792_v38, %v9675_v5  ;;  %v2145_v57 = vmul.f32 %v9716_v52, %v9670_v18  ;;  %v2146_v43 = vmul.f32 %v9717_v44, %v9672_v48  ;;  %v1809_v14 = vmul.f32 %v1793_v27, %v9674_v6  ;;  %v9724_v52 = vld [vmem:[#allocation105_spill] sm:$0xff] }
 0x68d   : > { %v8066_v19 = vadd.f32 %v2519_v39, %v9714_v11  ;;  %v8069_v24 = vadd.f32 %v2520_v63, %v9715_v15  ;;  %v1810_v39 = vmul.f32 %v1794_v56, %v9675_v5  ;;  %v1642_v44 = vmul.f32 %v9724_v52, %v6293_v3  ;;  %v9728_v3 = vld [vmem:[#allocation114_spill] sm:$0xff] }
 0x68e   : > { %v8077_v16 = vpop.permute.xlu2 %2559  ;;  %v2493_v12 = vpop.permute.xlu1 %2492  ;;  %v2160_v63 = vadd.f32 %v2144_v60, %v1808_v28  ;;  %v2161_v40 = vadd.f32 %v2145_v57, %v1809_v14  ;;  %v1631_v60 = vmul.f32 %v9722_v31, %v5944_v10  ;;  %v1641_v57 = vmul.f32 %v9724_v52, %v6228_v37  ;;  %v9740_v52 = vld [vmem:[#allocation40_spill] sm:$0xff] }
 0x68f   : > { %9718 = vst [vmem:[#allocation99_spill] sm:$0xff] %v8077_v16  ;;  %v2511_v47 = vmul.f32 %v2493_v12, %v7964_v25  ;;  %v2512_v58 = vmul.f32 %v2493_v12, %v7968_v61  ;;  %v2162_v11 = vadd.f32 %v2146_v43, %v1810_v39  ;;  %v9725_v43 = vld [vmem:[#allocation111_spill] sm:$0xff]  ;;  %v9730_v39 = vld [vmem:[#allocation88_spill] sm:$0xff] }
 0x690   : > { %v2497_v38 = vpop.permute.xlu0 %2496  ;;  %v1629_v12 = vmul.f32 %v9725_v43, %v6140_v46  ;;  %v1630_v10 = vmul.f32 %v9725_v43, %v6259_v35  ;;  %v8130_v14 = vadd.f32 %v9728_v3, %v1631_v60  ;;  %v9729_v35 = vld [vmem:[#allocation97_spill] sm:$0xff]  ;;  %v9739_v60 = vld [vmem:[#allocation107_spill] sm:$0xff] }
 0x691   : > { %v2513_v22 = vmul.f32 %v2497_v38, %v2458_v34  ;;  %v2514_v36 = vmul.f32 %v2497_v38, %v2466_v2  ;;  %v2527_v18 = vmul.f32 %v2511_v47, %v9679_v59  ;;  %v2528_v48 = vmul.f32 %v2512_v58, %v9680_v26  ;;  %v9726_v47 = vld [vmem:[#allocation51_spill] sm:$0xff] }
 0x693   : > { %v2529_v15 = vmul.f32 %v2513_v22, %v9679_v59  ;;  %v2530_v25 = vmul.f32 %v2514_v36, %v9680_v26  ;;  %v8087_v61 = vadd.f32 %v2527_v18, %v2159_v33  ;;  %v8089_v6 = vadd.f32 %v2528_v48, %v2160_v63  ;;  %v9723_v26 = vld [vmem:[#allocation108_spill] sm:$0xff]  ;;  %v9732_v63 = vld [vmem:[#allocation71_spill] sm:$0xff]  ;;  %v9735_v48 = vld [vmem:[#allocation102_spill] sm:$0xff] }
 0x694   : > { %v1632_v59 = vmul.f32 %v9722_v31, %v6261_v29  ;;  %v1635_v50 = vmul.f32 %v9723_v26, %v6186_v53  ;;  %v1636_v28 = vmul.f32 %v9723_v26, %v6279_v42  ;;  %v9727_v29 = vld [vmem:[#allocation153_spill] sm:$0xff]  ;;  %v8137_v33 = vmul.f32 %v9730_v39, %v9729_v35  ;;  %v9734_v22 = vld [vmem:[#allocation95_spill] sm:$0xff] }
 0x695   : > { %9719 = vst [vmem:[#allocation128_spill] sm:$0xff] %v8087_v61  ;;  %v8091_v5 = vadd.f32 %v2529_v15, %v2161_v40  ;;  %v8093_v27 = vadd.f32 %v2530_v25, %v2162_v11  ;;  %v1844_v53 = vsel %vm638_vm1, %v9727_v29, %v9726_v47  ;;  %v1852_v42 = vsel %vm638_vm1, %v9726_v47, %v9727_v29  ;;  %v9736_v40 = vld [vmem:[#allocation101_spill] sm:$0xff] }
 0x696   : > { %9720 = vst [vmem:[#allocation113_spill] sm:$0xff] %v8089_v6  ;;  %v8095_v34 = vpop.permute.xlu2 %2565  ;;  %v8097_v2 = vpop.permute.xlu1 %2549  ;;  %v8133_v46 = vadd.f32 %v9728_v3, %v1632_v59  ;;  %v8141_v38 = vmul.f32 %v9730_v39, %v9732_v63  ;;  %v8144_v36 = vadd.f32 %v9734_v22, %v1635_v50  ;;  %v8147_v18 = vadd.f32 %v9734_v22, %v1636_v28  ;;  %v9737_v15 = vld [vmem:[#allocation85_spill] sm:$0xff]  ;;  %v9742_v3 = vld [vmem:[#allocation86_spill] sm:$0xff] }
 0x697   : > { %9721 = vst [vmem:[#allocation34_spill] sm:$0xff] %v8093_v27  ;;  %v1639_v11 = vmul.f32 %v9736_v40, %v9735_v48  ;;  %v1640_v25 = vmul.f32 %v9736_v40, %v9737_v15  ;;  %v8156_v59 = vadd.f32 %v9739_v60, %v1641_v57  ;;  %v8159_v26 = vadd.f32 %v9739_v60, %v1642_v44  ;;  %v9741_v28 = vld [vmem:[#allocation117_spill] sm:$0xff]  ;;  %v9745_v57 = vld [vmem:[#allocation18_spill] sm:$0xff]  ;;  %v9749_v48 = vld [vmem:[#allocation39_spill] sm:$0xff] }
 0x698   : > { %v8099_v56 = vpop.permute.xlu0 %2551  ;;  %9731 = vst [vmem:[#allocation28_spill] sm:$0xff] %v8137_v33  ;;  %v1893_v50 = vmul.f32 %v9740_v52, %v1852_v42  ;;  %v1894_v43 = vmul.f32 %v9740_v52, %v1844_v53  ;;  %v8164_v47 = vadd.f32 %v9741_v28, %v1629_v12  ;;  %v8167_v29 = vadd.f32 %v9741_v28, %v1630_v10  ;;  %v9746_v63 = vld [vmem:[#allocation154_spill] sm:$0xff]  ;;  %v9747_v53 = vld [vmem:[#allocation141_spill] sm:$0xff]  ;;  %v9750_v40 = vld [vmem:[#allocation35_spill] sm:$0xff] }
 0x699   : > { %9733 = vst [vmem:[#allocation152_spill] sm:$0xff] %v8141_v38  ;;  %v8170_v35 = vadd.f32 %v9742_v3, %v1639_v11  ;;  %v8173_v39 = vadd.f32 %v9742_v3, %v1640_v25  ;;  %v1843_v44 = vsel %vm638_vm1, %v9746_v63, %v9745_v57  ;;  %v1851_v12 = vsel %vm638_vm1, %v9745_v57, %v9746_v63  ;;  %v9748_v42 = vld [vmem:[#allocation2_spill] sm:$0xff]  ;;  %v9751_v25 = vld [vmem:[#allocation33_spill] sm:$0xff]  ;;  %v9752_v60 = vld [vmem:[#allocation127_spill] sm:$0xff] }
 0x69a   : > { %v1847_v10 = vsel %vm638_vm1, %v9748_v42, %v9747_v53  ;;  %v1855_v22 = vsel %vm638_vm1, %v9747_v53, %v9748_v42  ;;  %v1846_v11 = vsel %vm638_vm1, %v9750_v40, %v9749_v48  ;;  %v1854_v15 = vsel %vm638_vm1, %v9749_v48, %v9750_v40  ;;  %v9753_v3 = vld [vmem:[#allocation155_spill] sm:$0xff]  ;;  %v9754_v63 = vld [vmem:[#allocation157_spill] sm:$0xff]  ;;  %v9755_v42 = vld [vmem:[#allocation10_spill] sm:$0xff] }
 0x69b   : > { %9743 = vst [vmem:[#allocation89_spill] sm:$0xff] %v8170_v35  ;;  %v1849_v52 = vsel %vm638_vm1, %v9752_v60, %v9751_v25  ;;  %v1857_v28 = vsel %vm638_vm1, %v9751_v25, %v9752_v60  ;;  %v8208_v57 = vmul.f32 %v1893_v50, %v9753_v3  ;;  %v8211_v53 = vmul.f32 %v1894_v43, %v9754_v63  ;;  %v9756_v40 = vld [vmem:[#allocation122_spill] sm:$0xff]  ;;  %v9759_v60 = vld [vmem:[#allocation119_spill] sm:$0xff] }
 0x69c   : > { %9744 = vst [vmem:[#allocation129_spill] sm:$0xff] %v8173_v39  ;;  %v1903_v54 = vmul.f32 %v9755_v42, %v1857_v28  ;;  %v1904_v48 = vmul.f32 %v9755_v42, %v1849_v52  ;;  %v1899_v13 = vmul.f32 %v9756_v40, %v1855_v22  ;;  %v1900_v7 = vmul.f32 %v9756_v40, %v1847_v10  ;;  %v9758_v38 = vld [vmem:[#allocation138_spill] sm:$0xff]  ;;  %v9760_v52 = vld [vmem:[#allocation143_spill] sm:$0xff] }
 0x69d   : > { %v1845_v33 = vsel %vm638_vm1, %v9758_v38, %v9757_v4  ;;  %v1853_v50 = vsel %vm638_vm1, %v9757_v4, %v9758_v38  ;;  %v1850_v22 = vsel %vm638_vm1, %v9760_v52, %v9759_v60  ;;  %v1858_v10 = vsel %vm638_vm1, %v9759_v60, %v9760_v52  ;;  %v9761_v28 = vld [vmem:[#allocation15_spill] sm:$0xff]  ;;  %v9766_v60 = vld [vmem:[#allocation36_spill] sm:$0xff] }
 0x69e   : > { %v8125_v37 = vpop.permute.xlu2 %2571  ;;  %v8127_v58 = vpop.permute.xlu1 %2555  ;;  %v1895_v42 = vmul.f32 %v9761_v28, %v1853_v50  ;;  %v1896_v40 = vmul.f32 %v9761_v28, %v1845_v33  ;;  %v1891_v41 = vmul.f32 %v9763_v49, %v1851_v12  ;;  %v1892_v55 = vmul.f32 %v9763_v49, %v1843_v44  ;;  %v9767_v12 = vld [vmem:[#allocation11_spill] sm:$0xff]  ;;  %v9768_v49 = vld [vmem:[#allocation125_spill] sm:$0xff] }
 0x69f   : > { %v8246_v39 = vmul.f32 %v1903_v54, %v9753_v3  ;;  %v8249_v61 = vmul.f32 %v1904_v48, %v9754_v63  ;;  %v1897_v50 = vmul.f32 %v9766_v60, %v1854_v15  ;;  %v1898_v33 = vmul.f32 %v9766_v60, %v1846_v11  ;;  %v9769_v48 = vld [vmem:[#allocation151_spill] sm:$0xff] }
 0x6a0   : > { %v8153_v31 = vpop.permute.xlu0 %2557  ;;  %v8254_v52 = vmul.f32 %v1899_v13, %v9753_v3  ;;  %v1956_v44 = vsel %vm753_vm2, %v9768_v49, %v9767_v12  ;;  %v1964_v54 = vsel %vm753_vm2, %v9767_v12, %v9768_v49  ;;  %v1911_v15 = vmul.f32 %v1895_v42, %v9753_v3  ;;  %v9770_v13 = vld [vmem:[#allocation25_spill] sm:$0xff]  ;;  %v9773_v49 = vld [vmem:[#allocation131_spill] sm:$0xff] }
 0x6a1   : > { %9738 = vst [vmem:[#allocation118_spill] sm:$0xff] %v8153_v31  ;;  %v9762_v31 = vld [vmem:[#allocation130_spill] sm:$0xff]  ;;  %v1912_v11 = vmul.f32 %v1896_v40, %v9754_v63  ;;  %v1907_v60 = vmul.f32 %v1891_v41, %v9753_v3  ;;  %v1908_v42 = vmul.f32 %v1892_v55, %v9754_v63  ;;  %v8282_v40 = vmul.f32 %v1897_v50, %v9753_v3  ;;  %v9779_v55 = vld [vmem:[#allocation37_spill] sm:$0xff] }
 0x6a2   : > { %v1905_v4 = vmul.f32 %v9762_v31, %v1858_v10  ;;  %v1906_v38 = vmul.f32 %v9762_v31, %v1850_v22  ;;  %9764 = vst [vmem:[#allocation20_spill] sm:$0xff] %v8246_v39  ;;  %v8257_v31 = vmul.f32 %v1900_v7, %v9754_v63  ;;  %v1848_v7 = vsel %vm638_vm1, %v9770_v13, %v9769_v48  ;;  %v9774_v39 = vld [vmem:[#allocation123_spill] sm:$0xff]  ;;  %v9778_v41 = vld [vmem:[#allocation70_spill] sm:$0xff] }
 0x6a3   : > { %9765 = vst [vmem:[#allocation23_spill] sm:$0xff] %v8249_v61  ;;  %v1856_v22 = vsel %vm638_vm1, %v9769_v48, %v9770_v13  ;;  %v8285_v12 = vmul.f32 %v1898_v33, %v9754_v63  ;;  %v2005_v35 = vmul.f32 %v9773_v49, %v1964_v54  ;;  %v2006_v61 = vmul.f32 %v9773_v49, %v1956_v44  ;;  %v9781_v33 = vld [vmem:[#allocation73_spill] sm:$0xff]  ;;  %v9782_v54 = vld [vmem:[#allocation90_spill] sm:$0xff] }
 0x6a4   : > { %v1921_v10 = vmul.f32 %v1905_v4, %v9753_v3  ;;  %v1922_v28 = vmul.f32 %v1906_v38, %v9754_v63  ;;  %9771 = vst [vmem:[#allocation29_spill] sm:$0xff] %v8282_v40  ;;  %v8290_v48 = vmul.f32 %v9774_v39, %v1856_v22  ;;  %v8293_v4 = vmul.f32 %v9774_v39, %v1848_v7  ;;  %v9777_v38 = vld [vmem:[#allocation54_spill] sm:$0xff]  ;;  %v9786_v63 = vld [vmem:[#allocation133_spill] sm:$0xff] }
 0x6a5   : > { %9772 = vst [vmem:[#allocation140_spill] sm:$0xff] %v8285_v12  ;;  %v2263_v13 = vmul.f32 %v9778_v41, %v9777_v38  ;;  %v2264_v50 = vmul.f32 %v9780_v45, %v9779_v55  ;;  %v2261_v12 = vmul.f32 %v9781_v33, %v9777_v38  ;;  %v2262_v44 = vmul.f32 %v9782_v54, %v9779_v55  ;;  %v9783_v7 = vld [vmem:[#allocation42_spill] sm:$0xff] }
 0x6a6   : > { %v8225_v43 = vpop.permute.xlu2 %2577  ;;  %v8227_v25 = vpop.permute.xlu1 %2561  ;;  %9775 = vst [vmem:[#allocation147_spill] sm:$0xff] %v8290_v48  ;;  %v9784_v49 = vld [vmem:[#allocation30_spill] sm:$0xff] }
 0x6a7   : > { %9776 = vst [vmem:[#allocation149_spill] sm:$0xff] %v8293_v4  ;;  %v1958_v45 = vsel %vm753_vm2, %v9784_v49, %v9783_v7  ;;  %v1966_v41 = vsel %vm753_vm2, %v9783_v7, %v9784_v49  ;;  %v2279_v16 = vadd.f32 %v2263_v13, %v1911_v15  ;;  %v2280_v27 = vadd.f32 %v2264_v50, %v1912_v11  ;;  %v8334_v7 = vld [vmem:[%s8679_s7 + $0x10] ss:$0 sm:$0xff]  ;;  %v9789_v13 = vld [vmem:[#allocation145_spill] sm:$0xff] }
 0x6a8   : > { %v8243_v6 = vpop.permute.xlu0 %2563  ;;  %v8320_v48 = vmul.f32 %v9786_v63, %v1966_v41  ;;  %v8323_v30 = vmul.f32 %v9786_v63, %v1958_v45  ;;  %v8340_v63 = vld [vmem:[%s8679_s7 + $0x18] ss:$0 sm:$0xff]  ;;  %v9788_v15 = vld [vmem:[#allocation4_spill] sm:$0xff]  ;;  %v2268_v50 = vmul.f32 %v9789_v13, %v9779_v55  ;;  %v9791_v45 = vld [vmem:[#allocation94_spill] sm:$0xff]  ;;  %v2680_v13 = vadd.f32 %v8069_v24, %v8133_v46 }
 0x6a9   : > { %v2267_v11 = vmul.f32 %v9788_v15, %v9777_v38  ;;  %v2274_v41 = vmul.f32 %v9791_v45, %v9779_v55  ;;  %v2679_v15 = vadd.f32 %v8066_v19, %v8130_v14  ;;  %v9796_v19 = vld [vmem:[#allocation45_spill] sm:$0xff]  ;;  %v9797_v24 = vld [vmem:[#allocation63_spill] sm:$0xff] }
 0x6aa   : > { %9787 = vst [vmem:[#allocation104_spill] sm:$0xff] %v8323_v30  ;;  %v8377_v14 = vmul.f32 %v9796_v19, %v9777_v38  ;;  %v8381_v46 = vmul.f32 %v9797_v24, %v9779_v55 }
 0x6ae   : > { %v2605_v40 = vpop.permute.xlu2 %2604  ;;  %v2568_v3 = vpop.permute.xlu1 %2567 }
 0x6af   : > { %v2581_v22 = vsel %vm1392_vm7, %v8099_v56, %v2568_v3  ;;  %v2589_v39 = vsel %vm1392_vm7, %v2568_v3, %v8099_v56  ;;  %v8326_v56 = vmul.f32 %v2005_v35, %v9620_v9  ;;  %v8329_v3 = vmul.f32 %v2006_v61, %v9498_v17 }
 0x6b0   : > { %v8317_v33 = vpop.permute.xlu0 %2569  ;;  %v2631_v54 = vmul.f32 %v2605_v40, %v2581_v22  ;;  %v2632_v4 = vmul.f32 %v2605_v40, %v2589_v39  ;;  %v8344_v22 = vadd.f32 %v2261_v12, %v8208_v57  ;;  %v8347_v61 = vadd.f32 %v2262_v44, %v8211_v53  ;;  %v9790_v39 = vld [vmem:[#allocation67_spill] sm:$0xff]  ;;  %v9792_v57 = vld [vmem:[#allocation57_spill] sm:$0xff]  ;;  %v9793_v53 = vld [vmem:[#allocation16_spill] sm:$0xff] }
 0x6b1   : > { %9785 = vst [vmem:[#allocation120_spill] sm:$0xff] %v8317_v33  ;;  %v2273_v49 = vmul.f32 %v9790_v39, %v9777_v38  ;;  %v2259_v12 = vmul.f32 %v9792_v57, %v9777_v38  ;;  %v2260_v44 = vmul.f32 %v9793_v53, %v9779_v55  ;;  %v2583_v39 = vsel %vm1392_vm7, %v8127_v58, %v8125_v37 }
 0x6b2   : > { %v2647_v40 = vmul.f32 %v8334_v7, %v2631_v54  ;;  %v2648_v35 = vmul.f32 %v8340_v63, %v2632_v4  ;;  %v2283_v17 = vadd.f32 %v2267_v11, %v8254_v52  ;;  %v9800_v52 = vld [vmem:[#allocation87_spill] sm:$0xff]  ;;  %v9801_v11 = vld [vmem:[#allocation77_spill] sm:$0xff] }
 0x6b4   : > { %v2663_v54 = vadd.f32 %v2647_v40, %v2279_v16  ;;  %v2664_v4 = vadd.f32 %v2648_v35, %v2280_v27  ;;  %v2591_v16 = vsel %vm1392_vm7, %v8125_v37, %v8127_v58  ;;  %v9794_v27 = vld [vmem:[#allocation61_spill] sm:$0xff]  ;;  %v2284_v37 = vadd.f32 %v2268_v50, %v8257_v31  ;;  %v9802_v50 = vld [vmem:[#allocation84_spill] sm:$0xff] }
 0x6b5   : > { %v9795_v35 = vld [vmem:[#allocation69_spill] sm:$0xff]  ;;  %v8401_v31 = vmul.f32 %v9800_v52, %v9779_v55 }
 0x6b6   : > { %v2695_v40 = vadd.f32 %v2663_v54, %v9794_v27  ;;  %v2696_v45 = vadd.f32 %v2664_v4, %v9795_v35  ;;  %v2613_v57 = vpop.permute.xlu2 %2612  ;;  %v2289_v27 = vadd.f32 %v2273_v49, %v1921_v10  ;;  %v2290_v35 = vadd.f32 %v2274_v41, %v1922_v28 }
 0x6b7   : > { %v2635_v53 = vmul.f32 %v2613_v57, %v2583_v39  ;;  %v2636_v33 = vmul.f32 %v2613_v57, %v2591_v16  ;;  %v8383_v30 = vpop.permute.xlu1 %2573  ;;  %v2275_v39 = vadd.f32 %v2259_v12, %v1907_v60  ;;  %v2276_v16 = vadd.f32 %v2260_v44, %v1908_v42  ;;  %v9799_v57 = vld [vmem:[#allocation148_spill] sm:$0xff]  ;;  %v9804_v44 = vld [vmem:[#allocation91_spill] sm:$0xff] }
 0x6b8   : > { %9798 = vst [vmem:[#allocation26_spill] sm:$0xff] %v8383_v30  ;;  %v8387_v58 = vadd.f32 %v2695_v40, %v2679_v15  ;;  %v8389_v54 = vadd.f32 %v2696_v45, %v2680_v13  ;;  %v8391_v4 = vpop.permute.xlu0 %2575  ;;  %v8397_v30 = vmul.f32 %v9799_v57, %v9777_v38  ;;  %v2326_v10 = vsel %vm1130_vm5, %v9802_v50, %v9801_v11 }
 0x6b9   : > { %v2651_v19 = vmul.f32 %v8334_v7, %v2635_v53  ;;  %v2652_v24 = vmul.f32 %v8340_v63, %v2636_v33  ;;  %v2334_v28 = vsel %vm1130_vm5, %v9801_v11, %v9802_v50  ;;  %v9803_v33 = vld [vmem:[#allocation46_spill] sm:$0xff]  ;;  %v2389_v12 = vmul.f32 %v7785_v51, %v9621_v62  ;;  %v9806_v53 = vld [vmem:[#allocation144_spill] sm:$0xff] }
 0x6ba   : > { %v8412_v49 = vmul.f32 %v9803_v33, %v2326_v10  ;;  %v8415_v41 = vmul.f32 %v9803_v33, %v2334_v28  ;;  %v2390_v15 = vmul.f32 %v9804_v44, %v5701_v0  ;;  %v2683_v13 = vadd.f32 %v8055_v20, %v8144_v36 }
 0x6bb   : > { %v2667_v60 = vadd.f32 %v2651_v19, %v2283_v17  ;;  %v2668_v42 = vadd.f32 %v2652_v24, %v2284_v37  ;;  %v2684_v40 = vadd.f32 %v8057_v21, %v8147_v18  ;;  %v9805_v17 = vld [vmem:[#allocation53_spill] sm:$0xff]  ;;  %v2579_v19 = vsel %vm1392_vm7, %v7999_v23, %v8243_v6 }
 0x6bc   : > { %v2587_v51 = vsel %vm1392_vm7, %v8243_v6, %v7999_v23  ;;  %v2586_v20 = vsel %vm1392_vm7, %v8227_v25, %v8225_v43  ;;  %v2594_v21 = vsel %vm1392_vm7, %v8225_v43, %v8227_v25  ;;  %v2580_v23 = vsel %vm1392_vm7, %v8097_v2, %v8095_v34 }
 0x6bd   : > { %v2699_v45 = vadd.f32 %v2667_v60, %v9805_v17  ;;  %v2700_v37 = vadd.f32 %v2668_v42, %v9806_v53  ;;  %v2588_v6 = vsel %vm1392_vm7, %v8095_v34, %v8097_v2  ;;  %v2405_v25 = vadd.f32 %v2389_v12, %v8326_v56 }
 0x6be   : > { %v2625_v24 = vpop.permute.xlu2 %2624  ;;  %v2406_v28 = vadd.f32 %v2390_v15, %v8329_v3  ;;  %v2677_v34 = vadd.f32 %v8019_v1, %v8164_v47  ;;  %v2678_v2 = vadd.f32 %v8021_v8, %v8167_v29  ;;  %v2689_v53 = vadd.f32 %v8091_v5, %v8156_v59  ;;  %v9808_v47 = vld [vmem:[#allocation41_spill] sm:$0xff] }
 0x6bf   : > { %v8443_v36 = vadd.f32 %v2699_v45, %v2683_v13  ;;  %v8445_v18 = vadd.f32 %v2700_v37, %v2684_v40  ;;  %v2641_v57 = vmul.f32 %v2625_v24, %v2586_v20  ;;  %v2642_v52 = vmul.f32 %v2625_v24, %v2594_v21  ;;  %v2597_v11 = vpop.permute.xlu1 %2596  ;;  %v9807_v37 = vld [vmem:[#allocation34_spill] sm:$0xff]  ;;  %v9809_v29 = vld [vmem:[#allocation49_spill] sm:$0xff]  ;;  %v9810_v20 = vld [vmem:[#allocation60_spill] sm:$0xff] }
 0x6c0   : > { %v2627_v10 = vmul.f32 %v2597_v11, %v2579_v19  ;;  %v2628_v43 = vmul.f32 %v2597_v11, %v2587_v51  ;;  %v2690_v19 = vadd.f32 %v9807_v37, %v8159_v26  ;;  %v9823_v37 = vld [vmem:[#allocation29_spill] sm:$0xff] }
 0x6c1   : > { %v2601_v50 = vpop.permute.xlu0 %2600  ;;  %v2657_v33 = vmul.f32 %v8334_v7, %v2641_v57  ;;  %v2658_v44 = vmul.f32 %v8340_v63, %v2642_v52  ;;  %v9812_v57 = vld [vmem:[#allocation99_spill] sm:$0xff]  ;;  %v9813_v52 = vld [vmem:[#allocation80_spill] sm:$0xff] }
 0x6c2   : > { %v2629_v60 = vmul.f32 %v2601_v50, %v2580_v23  ;;  %v2630_v42 = vmul.f32 %v2601_v50, %v2588_v6  ;;  %v2643_v13 = vmul.f32 %v8334_v7, %v2627_v10  ;;  %v2644_v40 = vmul.f32 %v8340_v63, %v2628_v43  ;;  %v9814_v23 = vld [vmem:[#allocation103_spill] sm:$0xff] }
 0x6c3   : > { %v2673_v12 = vadd.f32 %v2657_v33, %v2289_v27  ;;  %v2674_v15 = vadd.f32 %v2658_v44, %v2290_v35  ;;  %v9811_v27 = vld [vmem:[#allocation14_spill] sm:$0xff]  ;;  %v2585_v5 = vsel %vm1392_vm7, %v9812_v57, %v8391_v4  ;;  %v2593_v59 = vsel %vm1392_vm7, %v8391_v4, %v9812_v57  ;;  %v9816_v4 = vld [vmem:[#allocation147_spill] sm:$0xff]  ;;  %v9817_v33 = vld [vmem:[#allocation157_spill] sm:$0xff] }
 0x6c4   : > { %v2645_v56 = vmul.f32 %v8334_v7, %v2629_v60  ;;  %v2646_v3 = vmul.f32 %v8340_v63, %v2630_v42  ;;  %v2659_v17 = vadd.f32 %v2643_v13, %v2275_v39  ;;  %v2660_v45 = vadd.f32 %v2644_v40, %v2276_v16  ;;  %v9815_v60 = vld [vmem:[#allocation155_spill] sm:$0xff]  ;;  %v9818_v44 = vld [vmem:[#allocation149_spill] sm:$0xff]  ;;  %v9835_v57 = vld [vmem:[#allocation26_spill] sm:$0xff] }
 0x6c5   : > { %v2705_v8 = vadd.f32 %v2673_v12, %v9808_v47  ;;  %v2706_v24 = vadd.f32 %v2674_v15, %v9809_v29  ;;  %v1917_v42 = vmul.f32 %v9816_v4, %v9815_v60  ;;  %v1918_v13 = vmul.f32 %v9818_v44, %v9817_v33  ;;  %v9821_v15 = vld [vmem:[#allocation20_spill] sm:$0xff]  ;;  %v9826_v47 = vld [vmem:[#allocation79_spill] sm:$0xff] }
 0x6c6   : > { %v2661_v51 = vadd.f32 %v2645_v56, %v8344_v22  ;;  %v2662_v1 = vadd.f32 %v2646_v3, %v8347_v61  ;;  %v2691_v21 = vadd.f32 %v2659_v17, %v9810_v20  ;;  %v2692_v35 = vadd.f32 %v2660_v45, %v9811_v27  ;;  %v9819_v56 = vld [vmem:[#allocation12_spill] sm:$0xff]  ;;  %v9822_v17 = vld [vmem:[#allocation23_spill] sm:$0xff]  ;;  %v9827_v20 = vld [vmem:[#allocation89_spill] sm:$0xff] }
 0x6c7   : > { %v2609_v26 = vpop.permute.xlu1 %2608  ;;  %v8485_v22 = vadd.f32 %v2705_v8, %v2689_v53  ;;  %v8487_v61 = vadd.f32 %v2706_v24, %v2690_v19  ;;  %v2025_v40 = vmul.f32 %v8320_v48, %v9620_v9  ;;  %v9820_v3 = vld [vmem:[#allocation104_spill] sm:$0xff]  ;;  %v2281_v19 = vadd.f32 %v8397_v30, %v9823_v37  ;;  %v9825_v9 = vld [vmem:[#allocation150_spill] sm:$0xff]  ;;  %v9829_v27 = vld [vmem:[#allocation129_spill] sm:$0xff] }
 0x6c8   : > { %v2693_v39 = vadd.f32 %v2661_v51, %v2405_v25  ;;  %v2694_v16 = vadd.f32 %v2662_v1, %v2406_v28  ;;  %v8490_v11 = vadd.f32 %v2691_v21, %v9813_v52  ;;  %v8493_v6 = vadd.f32 %v2692_v35, %v9814_v23  ;;  %v9824_v51 = vld [vmem:[#allocation140_spill] sm:$0xff]  ;;  %v9830_v35 = vld [vmem:[#allocation113_spill] sm:$0xff] }
 0x6c9   : > { %v2621_v50 = vpop.permute.xlu0 %2620  ;;  %v2026_v12 = vmul.f32 %v9820_v3, %v9819_v56  ;;  %v2282_v1 = vadd.f32 %v8401_v31, %v9824_v51  ;;  %v2269_v48 = vmul.f32 %v9825_v9, %v9777_v38  ;;  %v2270_v8 = vmul.f32 %v9826_v47, %v9779_v55  ;;  %v9828_v21 = vld [vmem:[#allocation128_spill] sm:$0xff]  ;;  %v9833_v55 = vld [vmem:[#allocation82_spill] sm:$0xff] }
 0x6ca   : > { %v8495_v10 = vadd.f32 %v2693_v39, %v2677_v34  ;;  %v8497_v43 = vadd.f32 %v2694_v16, %v2678_v2  ;;  %v2639_v25 = vmul.f32 %v2621_v50, %v2585_v5  ;;  %v2640_v28 = vmul.f32 %v2621_v50, %v2593_v59  ;;  %v9831_v39 = vld [vmem:[#allocation120_spill] sm:$0xff]  ;;  %v9836_v5 = vld [vmem:[#allocation118_spill] sm:$0xff] }
 0x6cb   : > { %v2287_v34 = vadd.f32 %v8377_v14, %v9821_v15  ;;  %v2288_v2 = vadd.f32 %v8381_v46, %v9822_v17  ;;  %v2393_v14 = vmul.f32 %v8412_v49, %v9621_v62  ;;  %v2394_v46 = vmul.f32 %v8415_v41, %v5701_v0  ;;  %v9832_v16 = vld [vmem:[#allocation52_spill] sm:$0xff]  ;;  %v9840_v47 = vld [vmem:[#allocation22_spill] sm:$0xff] }
 0x6cc   : > { %v2655_v45 = vmul.f32 %v8334_v7, %v2639_v25  ;;  %v2656_v53 = vmul.f32 %v8340_v63, %v2640_v28  ;;  %v2687_v30 = vadd.f32 %v9828_v21, %v9827_v20  ;;  %v2688_v31 = vadd.f32 %v9830_v35, %v9829_v27  ;;  %v9834_v49 = vld [vmem:[#allocation100_spill] sm:$0xff]  ;;  %v9842_v21 = vld [vmem:[#allocation83_spill] sm:$0xff] }
 0x6cd   : > { %v2582_v38 = vsel %vm1392_vm7, %v9832_v16, %v9831_v39  ;;  %v2590_v62 = vsel %vm1392_vm7, %v9831_v39, %v9832_v16  ;;  %v2584_v59 = vsel %vm1392_vm7, %v9836_v5, %v9835_v57  ;;  %v2592_v52 = vsel %vm1392_vm7, %v9835_v57, %v9836_v5  ;;  %v9837_v17 = vld [vmem:[#allocation28_spill] sm:$0xff] }
 0x6ce   : > { %v2671_v29 = vadd.f32 %v2655_v45, %v2287_v34  ;;  %v2672_v24 = vadd.f32 %v2656_v53, %v2288_v2  ;;  %v2633_v50 = vmul.f32 %v2609_v26, %v2582_v38  ;;  %v2634_v25 = vmul.f32 %v2609_v26, %v2590_v62  ;;  %v9838_v2 = vld [vmem:[#allocation115_spill] sm:$0xff]  ;;  %v9839_v26 = vld [vmem:[#allocation152_spill] sm:$0xff] }
 0x6cf   : > { %v2617_v23 = vpop.permute.xlu1 %2616  ;;  %v2285_v4 = vadd.f32 %v2269_v48, %v1917_v42  ;;  %v2286_v33 = vadd.f32 %v2270_v8, %v1918_v13  ;;  %v1689_v45 = vadd.f32 %v9838_v2, %v9837_v17  ;;  %v1690_v53 = vadd.f32 %v9838_v2, %v9839_v26 }
 0x6d0   : > { %v2703_v0 = vadd.f32 %v2671_v29, %v9833_v55  ;;  %v2704_v41 = vadd.f32 %v2672_v24, %v9834_v49  ;;  %v2637_v28 = vmul.f32 %v2617_v23, %v2584_v59  ;;  %v2638_v60 = vmul.f32 %v2617_v23, %v2592_v52  ;;  %v9841_v29 = vld [vmem:[#allocation58_spill] sm:$0xff] }
 0x6d1   : > { %v2649_v3 = vmul.f32 %v8334_v7, %v2633_v50  ;;  %v2650_v15 = vmul.f32 %v8340_v63, %v2634_v25  ;;  %v2409_v42 = vadd.f32 %v2393_v14, %v2025_v40  ;;  %v2410_v13 = vadd.f32 %v2394_v46, %v2026_v12  ;;  %v9844_v40 = vld [vmem:[#allocation43_spill] sm:$0xff] }
 0x6d2   : > { %v8547_v44 = vadd.f32 %v2703_v0, %v2687_v30  ;;  %v8549_v56 = vadd.f32 %v2704_v41, %v2688_v31  ;;  %v2653_v34 = vmul.f32 %v8334_v7, %v2637_v28  ;;  %v2654_v32 = vmul.f32 %v8340_v63, %v2638_v60  ;;  %v9843_v30 = vld [vmem:[#allocation65_spill] sm:$0xff] }
 0x6d3   : > { %v2665_v37 = vadd.f32 %v2649_v3, %v2281_v19  ;;  %v2666_v51 = vadd.f32 %v2650_v15, %v2282_v1  ;;  %v2681_v8 = vadd.f32 %v9840_v47, %v1689_v45  ;;  %v2682_v24 = vadd.f32 %v9841_v29, %v1690_v53  ;;  %v9845_v19 = vld [vmem:[#allocation13_spill] sm:$0xff] }
 0x6d4   : > { %v2669_v9 = vadd.f32 %v2653_v34, %v2285_v4  ;;  %v2670_v48 = vadd.f32 %v2654_v32, %v2286_v33  ;;  %v2727_v15 = vmax.f32 %v8387_v58, 0.0  ;;  %v2728_v34 = vmax.f32 %v8389_v54, 0.0 }
 0x6d5   : > { %v2697_v20 = vadd.f32 %v2665_v37, %v2409_v42  ;;  %v2698_v7 = vadd.f32 %v2666_v51, %v2410_v13  ;;  %v2731_v42 = vmax.f32 %v8443_v36, 0.0  ;;  %v3953_v13 = vld [vmem:[%s4093_s27 + $0x20] sm:$0xff]  ;;  %v2732_v47 = vmax.f32 %v8445_v18, 0.0 }
 0x6d6   : > { %v2701_v63 = vadd.f32 %v2669_v9, %v9842_v21  ;;  %v2702_v27 = vadd.f32 %v2670_v48, %v9843_v30  ;;  %v2743_v17 = vmin.f32 %v2727_v15, 6.0  ;;  %v2744_v45 = vmin.f32 %v2728_v34, 6.0  ;;  %v3954_v9 = vld [vmem:[%s4093_s27 + $0x28] sm:$0xff]  ;;  %v3959_v34 = vld [vmem:[%s4093_s27 + $0x10] sm:$0xff] }
 0x6d7   : > { %v8563_v35 = vadd.f32 %v2697_v20, %v2681_v8  ;;  %v8565_v31 = vadd.f32 %v2698_v7, %v2682_v24  ;;  %v3510_v41 = vpop.f32.mrf.mxu1  ;;  %v2747_v24 = vmin.f32 %v2731_v42, 6.0  ;;  %v2723_v20 = vmax.f32 %v8490_v11, 0.0 }
 0x6d8   : > { %v8568_v12 = vadd.f32 %v2701_v63, %v9844_v40  ;;  %v8571_v1 = vadd.f32 %v2702_v27, %v9845_v19  ;;  %v8577_v37 = vadd.f32 %v3953_v13, %v2743_v17  ;;  %v8580_v48 = vadd.f32 %v3954_v9, %v2744_v45 }
 0x6d9   : > { %v3450_v16 = vpop.f32.mrf.mxu0  ;;  %v2724_v7 = vmax.f32 %v8493_v6, 0.0  ;;  %v2748_v18 = vmin.f32 %v2732_v47, 6.0  ;;  %v2725_v27 = vmax.f32 %v8495_v10, 0.0  ;;  %v2737_v40 = vmax.f32 %v8485_v22, 0.0  ;;  %v3955_v22 = vld [vmem:[%s4093_s27 + $0x40] sm:$0xff]  ;;  %v9851_v47 = vld [vmem:[#allocation27_spill] sm:$0xff] }
 0x6da   : > { %v2726_v19 = vmax.f32 %v8497_v43, 0.0  ;;  %v3956_v43 = vld [vmem:[%s4093_s27 + $0x48] sm:$0xff]  ;;  %v2730_v15 = vmax.f32 %v8565_v31, 0.0  ;;  %v2735_v17 = vmax.f32 %v8547_v44, 0.0  ;;  %v2736_v13 = vmax.f32 %v8549_v56, 0.0 }
 0x6db   : > { %v2740_v10 = vmin.f32 %v2724_v7, 6.0  ;;  %v2733_v31 = vmax.f32 %v8568_v12, 0.0  ;;  %v9853_v7 = vld [vmem:[#allocation9_spill] sm:$0xff]  ;;  %v9854_v56 = vld [vmem:[#allocation55_spill] sm:$0xff] }
 0x6dc   : > { %v3410_v14 = vpop.f32.mrf.mxu2  ;;  %v2746_v44 = vmin.f32 %v2730_v15, 6.0  ;;  %v9860_v15 = vld [vmem:[#allocation78_spill] sm:$0xff] }
 0x6dd   : > { %v3430_v46 = vpop.f32.mrf.mxu3 }
 0x6de   : > { %v3431_v39 = vadd.f32 %v3430_v46, %v3410_v14  ;;  %v2738_v46 = vmax.f32 %v8487_v61, 0.0  ;;  %v8601_v61 = vmin.f32 %v2737_v40, 6.0  ;;  %v2752_v40 = vmin.f32 %v2736_v13, 6.0 }
 0x6e0   : > { %v3451_v62 = vadd.f32 %v3450_v16, %v3431_v39 }
 0x6e1   : > { %v3530_v59 = vpop.f32.mrf.mxu0 }
 0x6e5   : > { %v3470_v38 = vpop.f32.mrf.mxu2  ;;  %v3490_v49 = vpop.f32.mrf.mxu3 }
 0x6e6   : > { %v3471_v55 = vadd.f32 %v3470_v38, %v3451_v62  ;;  %v3511_v57 = vadd.f32 %v3510_v41, %v3490_v49  ;;  %v2739_v38 = vmin.f32 %v2723_v20, 6.0  ;;  %v2741_v49 = vmin.f32 %v2725_v27, 6.0 }
 0x6e7   : > { %v2734_v20 = vmax.f32 %v8571_v1, 0.0 }
 0x6e8   : > { %v3773_v0 = vmul.f32 -1.442695, %v3471_v55  ;;  %v3531_v52 = vadd.f32 %v3530_v59, %v3511_v57  ;;  %v8596_v55 = vadd.f32 %v3955_v22, %v2747_v24  ;;  %v2742_v57 = vmin.f32 %v2726_v19, 6.0 }
 0x6e9   : > { %v2750_v22 = vmin.f32 %v2734_v20, 6.0 }
 0x6ea   : > { %3895 = vpow2.f32 %v3773_v0  ;;  %v8599_v0 = vadd.f32 %v3956_v43, %v2748_v18  ;;  %v9857_v43 = vld [vmem:[#allocation62_spill] sm:$0xff] }
 0x6f0   : > { %v3896_v5 = vpop.eup %3895 }
 0x6f1   : > { %v3559_v23 = vadd.f32 1.0, %v3896_v5 }
 0x6f3   : > { %3897 = vrcp.f32 %v3559_v23  ;;  %vm3566_vm2 = vweird.f32 %v3559_v23  ;;  %v3572_v36 = vand.u32 2147483648, %v3559_v23  ;;  %v3570_v63 = vand.u32 2147483647, %v3559_v23 }
 0x6f5   : > { %v3573_v39 = vor.u32 1.1754944e-38, %v3572_v36  ;;  %vm3571_vm4 = vcmp.eq.f32.partialorder %v3570_v63, 8.507059e+37  ;;  %v2751_v63 = vmin.f32 %v2735_v17, 6.0  ;;  %v3964_v17 = vld [vmem:[%s4093_s27 + $0x58] sm:$0xff] }
 0x6f9   : > { %v3898_v60 = vpop.eup %3897 }
 0x6fa   : > { %v3562_v3 = vmul.f32 %v3898_v60, %v3559_v23  ;;  %vm3567_vm0 = vweird.f32 %v3898_v60 }
 0x6fb   : > { %vm8585_vm5 = vmor %vm3566_vm2, %vm3567_vm0 }
 0x6fc   : > { %v3563_v32 = vsub.f32 1.0, %v3562_v3 }
 0x6fd   : > { %v3550_v50 = vpop.f32.mrf.mxu2 }
 0x6fe   : > { %v3551_v25 = vadd.f32 %v3550_v50, %v3531_v52  ;;  %v3564_v26 = vmul.f32 %v3898_v60, %v3563_v32  ;;  %v2729_v52 = vmax.f32 %v8563_v35, 0.0  ;;  %v3624_v32 = vadd.f32 %v3959_v34, %v2741_v49  ;;  %v3960_v35 = vld [vmem:[%s4093_s27 + $0x18] sm:$0xff] }
 0x6ff   : > { %v3625_v42 = vadd.f32 %v3960_v35, %v2742_v57  ;;  %v9858_v57 = vld [vmem:[#allocation139_spill] sm:$0xff] }
 0x700   : > { %v3774_v28 = vmul.f32 -1.442695, %v3551_v25  ;;  %v3565_v54 = vadd.f32 %v3898_v60, %v3564_v26  ;;  %v9849_v26 = vld [vmem:[#allocation66_spill] sm:$0xff] }
 0x702   : > { %3899 = vpow2.f32 %v3774_v28  ;;  %v3569_v6 = vsel %vm8585_vm5, %v3898_v60, %v3565_v54  ;;  %v8605_v28 = vmin.f32 %v2738_v46, 6.0  ;;  %v3957_v60 = vld [vmem:[%s4093_s27] sm:$0xff]  ;;  %v2745_v54 = vmin.f32 %v2729_v52, 6.0 }
 0x703   : > { %v3574_v41 = vsel %vm3571_vm4, %v3573_v39, %v3569_v6  ;;  %v2749_v39 = vmin.f32 %v2733_v31, 6.0  ;;  %v9863_v31 = vld [vmem:[#allocation7_spill] sm:$0xff] }
 0x708   : > { %v3900_v4 = vpop.eup %3899 }
 0x709   : > { %v3560_v33 = vadd.f32 1.0, %v3900_v4  ;;  %v3622_v4 = vadd.f32 %v3957_v60, %v2739_v38 }
 0x70b   : > { %3901 = vrcp.f32 %v3560_v33  ;;  %v3587_v58 = vand.u32 2147483648, %v3560_v33  ;;  %v3585_v29 = vand.u32 2147483647, %v3560_v33  ;;  %vm3581_vm6 = vweird.f32 %v3560_v33 }
 0x70d   : > { %v3588_v11 = vor.u32 1.1754944e-38, %v3587_v58  ;;  %vm3586_vm15 = vcmp.eq.f32.partialorder %v3585_v29, 8.507059e+37  ;;  %v9852_v29 = vld [vmem:[#allocation21_spill] sm:$0xff] }
 0x711   : > { %v3902_v2 = vpop.eup %3901 }
 0x712   : > { %v3577_v53 = vmul.f32 %v3902_v2, %v3560_v33  ;;  %vm3582_vm1 = vweird.f32 %v3902_v2  ;;  %v3958_v33 = vld [vmem:[%s4093_s27 + $0x8] sm:$0xff] }
 0x713   : > { %vm3583_vm7 = vmor %vm3581_vm6, %vm3582_vm1  ;;  %v3623_v3 = vadd.f32 %v3958_v33, %v2740_v10  ;;  %v3962_v10 = vld [vmem:[%s4093_s27 + $0x38] sm:$0xff]  ;;  %v3963_v33 = vld [vmem:[%s4093_s27 + $0x50] sm:$0xff] }
 0x714   : > { %v3578_v51 = vsub.f32 1.0, %v3577_v53 }
 0x716   : > { %v3579_v8 = vmul.f32 %v3902_v2, %v3578_v51  ;;  %v9850_v51 = vld [vmem:[#allocation47_spill] sm:$0xff] }
 0x718   : > { %v3580_v30 = vadd.f32 %v3902_v2, %v3579_v8 }
 0x71a   : > { %v3584_v14 = vsel %vm3583_vm7, %v3902_v2, %v3580_v30  ;;  %v9848_v2 = vld [vmem:[#allocation93_spill] sm:$0xff] }
 0x71b   : > { %v3589_v16 = vsel %vm3586_vm15, %v3588_v11, %v3584_v14  ;;  %v9855_v11 = vld [vmem:[#allocation50_spill] sm:$0xff]  ;;  %v3961_v14 = vld [vmem:[%s4093_s27 + $0x30] sm:$0xff] }
 0x71c   : > { %v3593_v62 = vrot.slane %v3589_v16, 7  ;;  %v3628_v46 = vadd.f32 %v3961_v14, %v2745_v54  ;;  %v9856_v16 = vld [vmem:[#allocation156_spill] sm:$0xff] }
 0x71e   : > { %v3595_v5 = vsel %vm3594_vm3, %v3574_v41, %v3593_v62  ;;  %v3596_v59 = vsel %vm3252_vm14, %v3574_v41, %v3593_v62  ;;  %v3629_v62 = vadd.f32 %v3962_v10, %v2746_v44 }
 0x71f   : > { %v3597_v23 = vrot.slane %v3596_v59, 1  ;;  %v3598_v50 = vperm.slane %v3595_v5, 0  ;;  %v3599_v25 = vperm.slane %v3595_v5, 1 }
 0x721   : > { %v3606_v45 = vmul.f32 %v3598_v50, %v9848_v2  ;;  %v3607_v53 = vmul.f32 %v3599_v25, %v9849_v26  ;;  %v3608_v9 = vmul.f32 %v3598_v50, %v9850_v51  ;;  %v3609_v58 = vmul.f32 %v3599_v25, %v9851_v47  ;;  %v9862_v51 = vld [vmem:[#allocation6_spill] sm:$0xff] }
 0x722   : > { %v3600_v8 = vperm.slane %v3597_v23, 0  ;;  %v3610_v24 = vmul.f32 %v3598_v50, %v9852_v29  ;;  %v3601_v36 = vperm.slane %v3597_v23, 1  ;;  %v3611_v21 = vmul.f32 %v3599_v25, %v9853_v7  ;;  %v9859_v23 = vld [vmem:[#allocation5_spill] sm:$0xff] }
 0x723   : > { %v3612_v30 = vmul.f32 %v3598_v50, %v9854_v56  ;;  %v3638_v18 = vadd.f32 %v3622_v4, %v3606_v45  ;;  %v3639_v27 = vadd.f32 %v3623_v3, %v3607_v53  ;;  %v3613_v19 = vmul.f32 %v3599_v25, %v9855_v11  ;;  %v9861_v45 = vld [vmem:[#allocation146_spill] sm:$0xff] }
 0x724   : > { %v3640_v12 = vadd.f32 %v3624_v32, %v3608_v9  ;;  %v3641_v6 = vadd.f32 %v3625_v42, %v3609_v58  ;;  %v3614_v1 = vmul.f32 %v3600_v8, %v9856_v16  ;;  %v3642_v38 = vadd.f32 %v8577_v37, %v3610_v24  ;;  %v3965_v42 = vld [vmem:[%s4093_s27 + $0x60] sm:$0xff]  ;;  %v3966_v58 = vld [vmem:[%s4093_s27 + $0x68] sm:$0xff] }
 0x725   : > { %v3615_v49 = vmul.f32 %v3601_v36, %v9857_v43  ;;  %v3643_v41 = vadd.f32 %v8580_v48, %v3611_v21  ;;  %v3616_v5 = vmul.f32 %v3600_v8, %v9858_v57  ;;  %v3644_v59 = vadd.f32 %v3628_v46, %v3612_v30 }
 0x726   : > { %v3654_v52 = vmax.f32 %v3638_v18, 0.0  ;;  %v3655_v37 = vmax.f32 %v3639_v27, 0.0  ;;  %v3617_v50 = vmul.f32 %v3601_v36, %v9859_v23  ;;  %v3645_v25 = vadd.f32 %v3629_v62, %v3613_v19 }
 0x727   : > { %v3656_v60 = vmax.f32 %v3640_v12, 0.0  ;;  %v3657_v4 = vmax.f32 %v3641_v6, 0.0  ;;  %v3632_v3 = vadd.f32 %v3963_v33, %v2749_v39  ;;  %v3618_v34 = vmul.f32 %v3600_v8, %v9860_v15 }
 0x728   : > { %v3646_v48 = vadd.f32 %v8596_v55, %v3614_v1  ;;  %v3658_v32 = vmax.f32 %v3642_v38, 0.0  ;;  %3670 = vst [vmem:[%s8633_s14] sm:$0xff] %v3654_v52  ;;  %v3633_v2 = vadd.f32 %v3964_v17, %v2750_v22  ;;  %v3619_v26 = vmul.f32 %v3601_v36, %v9861_v45 }
 0x729   : > { %v3647_v53 = vadd.f32 %v8599_v0, %v3615_v49  ;;  %v3659_v35 = vmax.f32 %v3643_v41, 0.0  ;;  %3671 = vst [vmem:[%s8633_s14 + $0x8] sm:$0xff] %v3655_v37  ;;  %v3634_v13 = vadd.f32 %v3965_v42, %v2751_v63  ;;  %v3620_v9 = vmul.f32 %v3600_v8, %v9862_v51  ;;  %v3967_v0 = vld [vmem:[%s4093_s27 + $0x70] sm:$0xff]  ;;  %v3968_v8 = vld [vmem:[%s4093_s27 + $0x78] sm:$0xff] }
 0x72a   : > { %v3648_v47 = vadd.f32 %v3632_v3, %v3616_v5  ;;  %v3660_v55 = vmax.f32 %v3644_v59, 0.0  ;;  %3672 = vst [vmem:[%s8633_s14 + $0x10] sm:$0xff] %v3656_v60  ;;  %v3635_v54 = vadd.f32 %v3966_v58, %v2752_v40  ;;  %v3621_v29 = vmul.f32 %v3601_v36, %v9863_v31 }
 0x72b   : > { %v3649_v24 = vadd.f32 %v3633_v2, %v3617_v50  ;;  %v3661_v44 = vmax.f32 %v3645_v25, 0.0  ;;  %3673 = vst [vmem:[%s8633_s14 + $0x18] sm:$0xff] %v3657_v4  ;;  %v3636_v20 = vadd.f32 %v3967_v0, %v8601_v61  ;;  %v3650_v7 = vadd.f32 %v3634_v13, %v3618_v34 }
 0x72c   : > { %v3662_v21 = vmax.f32 %v3646_v48, 0.0  ;;  %3674 = vst [vmem:[%s8633_s14 + $0x20] sm:$0xff] %v3658_v32  ;;  %v3637_v63 = vadd.f32 %v3968_v8, %v8605_v28  ;;  %v3651_v56 = vadd.f32 %v3635_v54, %v3619_v26  ;;  %v3663_v36 = vmax.f32 %v3647_v53, 0.0 }
 0x72d   : > { %3675 = vst [vmem:[%s8633_s14 + $0x28] sm:$0xff] %v3659_v35  ;;  %v3652_v30 = vadd.f32 %v3636_v20, %v3620_v9  ;;  %v3664_v18 = vmax.f32 %v3648_v47, 0.0  ;;  %v3665_v27 = vmax.f32 %v3649_v24, 0.0  ;;  %v3666_v40 = vmax.f32 %v3650_v7, 0.0 }
 0x72e   : > { %3676 = vst [vmem:[%s8633_s14 + $0x30] sm:$0xff] %v3660_v55  ;;  %v3653_v61 = vadd.f32 %v3637_v63, %v3621_v29  ;;  %v3667_v11 = vmax.f32 %v3651_v56, 0.0 }
 0x72f   : > { %3677 = vst [vmem:[%s8633_s14 + $0x38] sm:$0xff] %v3661_v44  ;;  %v3668_v19 = vmax.f32 %v3652_v30, 0.0 }
 0x730   : > { %3678 = vst [vmem:[%s8633_s14 + $0x40] sm:$0xff] %v3662_v21  ;;  %v3669_v28 = vmax.f32 %v3653_v61, 0.0 }
 0x731   : > { %3679 = vst [vmem:[%s8633_s14 + $0x48] sm:$0xff] %v3663_v36 }
 0x732   : > { %3680 = vst [vmem:[%s8633_s14 + $0x50] sm:$0xff] %v3664_v18 }
 0x733   : > { %3681 = vst [vmem:[%s8633_s14 + $0x58] sm:$0xff] %v3665_v27 }
 0x734   : > { %3682 = vst [vmem:[%s8633_s14 + $0x60] sm:$0xff] %v3666_v40 }
 0x735   : > { %3683 = vst [vmem:[%s8633_s14 + $0x68] sm:$0xff] %v3667_v11 }
 0x736   : > { %3684 = vst [vmem:[%s8633_s14 + $0x70] sm:$0xff] %v3668_v19 }
 0x737   : > { %3685 = vst [vmem:[%s8633_s14 + $0x78] sm:$0xff] %v3669_v28 }
 0x738 PF: > { %s19_s30 = sadd.s32 1, %s3975_s30  }
 0x739   : > { %p16_p4 = scmp.ge.s32.totalorder %s19_s30, 4  }
 0x73b   :  { %18 = sbr.rel (!%p16_p4) target bundleno = 1 (0x1), region = 86 }

</bundles_post_ra>
